<compile_context>
chip_gen: v7x
topology: tpu7x:2x2x1
jax: 0.10.0
libtpu: 0.0.40
codegen_flags: <defaults>
</compile_context>

<pallas_src>
import jax
import jax.numpy as jnp
from jax.experimental import pallas as pl
from jax.experimental.pallas import tpu as pltpu

NEG_SLOPE = 0.01  # nn.LeakyReLU default negative_slope
BN_EPS = 1e-5


def _tpu_vmem_capacity_bytes():
    """Physical VMEM per TensorCore; conservative (v7x-sized) fallback if unavailable."""
    try:
        return int(pltpu.get_tpu_info().vmem_capacity_bytes)
    except Exception:
        return 64 * 1024 * 1024


def _banded_weights(w_hwio, W, PW):
    """Fold the 3 kx taps + channel mixing of a 3x3 HWIO conv into, per ky, a
    block-banded matrix Wb[ky] of shape (PW*Cin, W*Cout) so that
        out_row[j*Cout + co] = sum_ky (padded_row[r + ky] @ Wb[ky])[j*Cout + co]
    reproduces the 'same'-padded conv.  Built wrapper-side in f32 (exact placement)."""
    KH, KW, Ci, Co = w_hwio.shape
    eye = jnp.eye(W, dtype=jnp.float32)
    bands = []
    for ky in range(KH):
        band = jnp.zeros((PW * Ci, W * Co), jnp.float32)
        for kx in range(KW):
            shift = jnp.zeros((PW, W), jnp.float32).at[kx:kx + W, :].set(eye)
            band = band + jnp.kron(shift, w_hwio[ky, kx].astype(jnp.float32))
        bands.append(band)
    return jnp.stack(bands)  # (3, PW*Ci, W*Co)


def encoder_block(x_nhwc, w1, scale1, bias1, w2, scale2, bias2, images_per_step=None):
    """Fused EncoderBlock forward. x_nhwc: (N,H,W,Cin) f32 -> (N,H//2,W//2,Cout) f32."""
    N, H, W, Cin = x_nhwc.shape
    KH, KW, _, Cout = w1.shape
    assert (KH, KW) == (3, 3) and H % 2 == 0 and W % 2 == 0
    Ho, Wo = H // 2, W // 2
    PH, PW = H + 2, W + 2  # 'same' padding for a 3x3 kernel

    vmem_cap = _tpu_vmem_capacity_bytes()

    # Images folded per grid step: whole batch on single-TC v5e/v6e (128 MiB VMEM);
    # keep >= 2 grid steps on v7x (64 MiB VMEM, 2 TensorCores).  Tunable.
    if images_per_step is None:
        images_per_step = N if vmem_cap > 80 * 1024 * 1024 else max(1, N // 2)
    B = max(1, min(int(images_per_step), N))
    while N % B:
        B -= 1
    steps = N // B
    R = B * PH - 2  # conv-output rows computed per step (valid + ignored boundary rows)

    bf16, f32 = jnp.bfloat16, jnp.float32

    x2d = x_nhwc.astype(f32).reshape(N, H, W * Cin)         # lane-dense activations
    wb1 = _banded_weights(w1, W, PW).astype(bf16)            # (3, PW*Cin,  W*Cout)
    wb2 = _banded_weights(w2, W, PW).astype(bf16)            # (3, PW*Cout, W*Cout)
    # Per-channel scale/bias tiled across the W output-column blocks of the lane axis.
    s1 = jnp.tile(scale1.astype(f32), W).reshape(1, W * Cout)
    b1 = jnp.tile(bias1.astype(f32), W).reshape(1, W * Cout)
    s2 = jnp.tile(scale2.astype(f32), W).reshape(1, W * Cout)
    b2 = jnp.tile(bias2.astype(f32), W).reshape(1, W * Cout)

    def kernel(x_ref, wb1_ref, s1_ref, b1_ref, wb2_ref, s2_ref, b2_ref,
               o_ref, xpad, ypad):
        # ---- stage padded input: one full unmasked zero, interiors overwritten ----
        xpad[...] = jnp.zeros_like(xpad)
        for b in range(B):
            xpad[b * PH + 1:b * PH + 1 + H, Cin:Cin + W * Cin] = x_ref[b].astype(bf16)

        # ---- conv1: 3 banded MXU matmuls (ky = sublane slice; kx folded into weight)
        acc = jnp.dot(xpad[0:R, :], wb1_ref[0], preferred_element_type=f32)
        for ky in range(1, 3):
            acc += jnp.dot(xpad[ky:ky + R, :], wb1_ref[ky], preferred_element_type=f32)
        y1 = acc * s1_ref[...] + b1_ref[...]            # folded conv bias + eval-mode BN
        y1 = jnp.maximum(y1, NEG_SLOPE * y1)            # LeakyReLU (single vmax)

        # ---- stage padded conv1 activation, bf16 end-to-end ----
        ypad[...] = jnp.zeros_like(ypad)
        ypad[1:1 + R, Cout:Cout + W * Cout] = y1.astype(bf16)
        # Re-zero the 2 inter-image halo rows hit by the boundary (garbage) conv rows.
        for b in range(B - 1):
            ypad[(b + 1) * PH - 1:(b + 1) * PH + 1, :] = jnp.zeros((2, PW * Cout), bf16)

        # ---- conv2: same 3-matmul banded structure, bf16 operands / f32 accumulate ----
        acc = jnp.dot(ypad[0:R, :], wb2_ref[0], preferred_element_type=f32)
        for ky in range(1, 3):
            acc += jnp.dot(ypad[ky:ky + R, :], wb2_ref[ky], preferred_element_type=f32)
        y2 = acc * s2_ref[...] + b2_ref[...]
        y2 = jnp.maximum(y2, NEG_SLOPE * y2)

        # ---- 2x2 stride-2 max-pool per image, in registers, lane-dense store ----
        for b in range(B):
            yb = y2[b * PH:b * PH + H, :]                        # (H, W*Cout)
            v = yb.reshape(Ho, 2, W * Cout)
            vmax = jnp.maximum(v[:, 0, :], v[:, 1, :])           # (Ho, W*Cout)
            hp = vmax.reshape(Ho, Wo, 2 * Cout)
            pooled = jnp.maximum(hp[:, :, :Cout], hp[:, :, Cout:])
            o_ref[b] = pooled.reshape(Ho, Wo * Cout)             # full-lane-width store

    # VMEM budget: double-buffered I/O blocks + (double-buffered) banded weights +
    # bf16 scratches + live f32 activations.  Limit derived from detected capacity.
    vmem_need = (
        2 * B * H * W * Cin * 4 + 2 * B * Ho * Wo * Cout * 4
        + 2 * 2 * 3 * PW * W * Cout * (Cin + Cout)      # banded bf16 weights, 2 bufs
        + 2 * 4 * W * Cout * 4                          # scale/bias
        + B * PH * PW * (Cin + Cout) * 2                # bf16 padded scratches
        + 6 * R * W * Cout * 4)                         # live f32 accum/activations
    vmem_limit = int(min(max(2 * vmem_need, 32 * 1024 * 1024), int(0.85 * vmem_cap)))

    grid_spec = pltpu.PrefetchScalarGridSpec(
        num_scalar_prefetch=0,
        grid=(steps,),  # B images per grid step
        in_specs=[
            pl.BlockSpec((B, H, W * Cin), lambda n: (n, 0, 0)),
            pl.BlockSpec((3, PW * Cin, W * Cout), lambda n: (0, 0, 0)),
            pl.BlockSpec((1, W * Cout), lambda n: (0, 0)),
            pl.BlockSpec((1, W * Cout), lambda n: (0, 0)),
            pl.BlockSpec((3, PW * Cout, W * Cout), lambda n: (0, 0, 0)),
            pl.BlockSpec((1, W * Cout), lambda n: (0, 0)),
            pl.BlockSpec((1, W * Cout), lambda n: (0, 0)),
        ],
        out_specs=pl.BlockSpec((B, Ho, Wo * Cout), lambda n: (n, 0, 0)),
        scratch_shapes=[
            pltpu.VMEM((B * PH, PW * Cin), bf16),    # zero-halo padded input (bf16)
            pltpu.VMEM((B * PH, PW * Cout), bf16),   # zero-halo padded conv1 act (bf16)
        ],
    )

    out_flat = pl.pallas_call(
        kernel,
        out_shape=jax.ShapeDtypeStruct((N, Ho, Wo * Cout), jnp.float32),
        grid_spec=grid_spec,
        compiler_params=pltpu.CompilerParams(
            dimension_semantics=("parallel",),   # batch-step axis -> both TCs on v7x
            vmem_limit_bytes=vmem_limit,
        ),
    )(x2d, wb1, s1, b1, wb2, s2, b2)

    return out_flat.reshape(N, Ho, Wo, Cout)


def reference(x_nhwc, w1, s1, b1, w2, s2, b2):
    """Pure-JAX reference (same folded eval-mode BN semantics)."""
    dn = ('NHWC', 'HWIO', 'NHWC')
    y = jax.lax.conv_general_dilated(x_nhwc, w1, (1, 1), 'SAME',
                                     dimension_numbers=dn,
                                     precision=jax.lax.Precision.HIGHEST)
    y = y * s1 + b1
    y = jnp.where(y > 0, y, NEG_SLOPE * y)
    y = jax.lax.conv_general_dilated(y, w2, (1, 1), 'SAME',
                                     dimension_numbers=dn,
                                     precision=jax.lax.Precision.HIGHEST)
    y = y * s2 + b2
    y = jnp.where(y > 0, y, NEG_SLOPE * y)
    y = jax.lax.reduce_window(y, -jnp.inf, jax.lax.max,
                              (1, 2, 2, 1), (1, 2, 2, 1), 'VALID')
    return y


if __name__ == "__main__":
    N, Cin, H, W, Cout = 2, 4, 16, 16, 32

    key = jax.random.PRNGKey(0)
    ks = jax.random.split(key, 13)

    # PyTorch-style NCHW input, converted to NHWC for the kernel.
    x_nchw = jax.random.normal(ks[0], (N, Cin, H, W), jnp.float32)
    x_nhwc = jnp.transpose(x_nchw, (0, 2, 3, 1))

    # Conv + BN parameters (deterministic synthetic init, shapes per nn.Module).
    w1 = 0.2 * jax.random.normal(ks[1], (3, 3, Cin, Cout), jnp.float32)     # HWIO
    cb1 = 0.1 * jax.random.normal(ks[2], (Cout,), jnp.float32)              # conv1 bias
    g1 = 1.0 + 0.1 * jax.random.normal(ks[3], (Cout,), jnp.float32)         # BN1 gamma
    be1 = 0.1 * jax.random.normal(ks[4], (Cout,), jnp.float32)              # BN1 beta
    rm1 = 0.1 * jax.random.normal(ks[5], (Cout,), jnp.float32)              # BN1 running_mean
    rv1 = jax.random.uniform(ks[6], (Cout,), jnp.float32, 0.5, 1.5)         # BN1 running_var

    w2 = 0.2 * jax.random.normal(ks[7], (3, 3, Cout, Cout), jnp.float32)
    cb2 = 0.1 * jax.random.normal(ks[8], (Cout,), jnp.float32)
    g2 = 1.0 + 0.1 * jax.random.normal(ks[9], (Cout,), jnp.float32)
    be2 = 0.1 * jax.random.normal(ks[10], (Cout,), jnp.float32)
    rm2 = 0.1 * jax.random.normal(ks[11], (Cout,), jnp.float32)
    rv2 = jax.random.uniform(ks[12], (Cout,), jnp.float32, 0.5, 1.5)

    # Fold conv bias + eval-mode BN into per-channel scale/bias.
    s1 = g1 / jnp.sqrt(rv1 + BN_EPS)
    b1 = (cb1 - rm1) * s1 + be1
    s2 = g2 / jnp.sqrt(rv2 + BN_EPS)
    b2 = (cb2 - rm2) * s2 + be2

    out = encoder_block(x_nhwc, w1, s1, b1, w2, s2, b2)
    out = jax.block_until_ready(out)

    ref = reference(x_nhwc, w1, s1, b1, w2, s2, b2)
    assert out.shape == (N, H // 2, W // 2, Cout), out.shape
    # bf16 MXU operands with f32 accumulation -> loose per-element tolerance.
    assert jnp.allclose(out, ref, atol=5e-2, rtol=5e-2), (
        float(jnp.max(jnp.abs(out - ref))))

    print("KERNEL_OK")
</pallas_src>

<mosaic_0001>
module attributes {stable_mosaic.version = 11 : i64} {
  func.func @kernel(%arg0: i32, %arg1: memref<1x16x64xf32, #tpu.memory_space<vmem>>, %arg2: memref<3x72x512xbf16, #tpu.memory_space<vmem>>, %arg3: memref<1x512xf32, #tpu.memory_space<vmem>>, %arg4: memref<1x512xf32, #tpu.memory_space<vmem>>, %arg5: memref<3x576x512xbf16, #tpu.memory_space<vmem>>, %arg6: memref<1x512xf32, #tpu.memory_space<vmem>>, %arg7: memref<1x512xf32, #tpu.memory_space<vmem>>, %arg8: memref<1x8x256xf32, #tpu.memory_space<vmem>>, %arg9: memref<18x72xbf16, #tpu.memory_space<vmem>>, %arg10: memref<18x576xbf16, #tpu.memory_space<vmem>>) attributes {dimension_semantics = [#tpu.dimension_semantics<parallel>], iteration_bounds = array<i64: 2>, scalar_prefetch = 0 : i64, scratch_operands = 2 : i64, tpu.core_type = #tpu.core_type<tc>, window_params = [{transform_indices = @transform_0, window_bounds = array<i64: 1, 16, 64>}, {pipeline_mode = #tpu.pipeline_mode<synchronous>, transform_indices = @transform_1, window_bounds = array<i64: 3, 72, 512>}, {pipeline_mode = #tpu.pipeline_mode<synchronous>, transform_indices = @transform_2, window_bounds = array<i64: 1, 512>}, {pipeline_mode = #tpu.pipeline_mode<synchronous>, transform_indices = @transform_3, window_bounds = array<i64: 1, 512>}, {pipeline_mode = #tpu.pipeline_mode<synchronous>, transform_indices = @transform_4, window_bounds = array<i64: 3, 576, 512>}, {pipeline_mode = #tpu.pipeline_mode<synchronous>, transform_indices = @transform_5, window_bounds = array<i64: 1, 512>}, {pipeline_mode = #tpu.pipeline_mode<synchronous>, transform_indices = @transform_6, window_bounds = array<i64: 1, 512>}, {transform_indices = @transform_7, window_bounds = array<i64: 1, 8, 256>}]} {
    %cst = arith.constant 0.000000e+00 : bf16
    %0 = vector.broadcast %cst : bf16 to vector<18x72xbf16>
    %c0 = arith.constant 0 : index
    %c0_0 = arith.constant 0 : index
    %1 = vector.load %arg9[%c0, %c0_0] : memref<18x72xbf16, #tpu.memory_space<vmem>>, vector<18x72xbf16>
    tpu.vector_store %arg9[%c0, %c0_0], %0 {strides = array<i32>} : memref<18x72xbf16, #tpu.memory_space<vmem>>, vector<18x72xbf16>,
    %c0_1 = arith.constant 0 : index
    %c0_2 = arith.constant 0 : index
    %c0_3 = arith.constant 0 : index
    %2 = vector.load %arg1[%c0_1, %c0_2, %c0_3] : memref<1x16x64xf32, #tpu.memory_space<vmem>>, vector<1x16x64xf32>
    %3 = vector.shape_cast %2 : vector<1x16x64xf32> to vector<16x64xf32>
    %4 = arith.truncf %3 : vector<16x64xf32> to vector<16x64xbf16>
    %c1 = arith.constant 1 : index
    %c4 = arith.constant 4 : index
    %5 = vector.load %arg9[%c1, %c4] : memref<18x72xbf16, #tpu.memory_space<vmem>>, vector<16x64xbf16>
    tpu.vector_store %arg9[%c1, %c4], %4 {strides = array<i32>} : memref<18x72xbf16, #tpu.memory_space<vmem>>, vector<16x64xbf16>,
    %c0_4 = arith.constant 0 : index
    %c0_5 = arith.constant 0 : index
    %6 = vector.load %arg9[%c0_4, %c0_5] : memref<18x72xbf16, #tpu.memory_space<vmem>>, vector<16x72xbf16>
    %c0_6 = arith.constant 0 : index
    %c0_7 = arith.constant 0 : index
    %c0_8 = arith.constant 0 : index
    %7 = vector.load %arg2[%c0_6, %c0_7, %c0_8] : memref<3x72x512xbf16, #tpu.memory_space<vmem>>, vector<1x72x512xbf16>
    %8 = vector.shape_cast %7 : vector<1x72x512xbf16> to vector<72x512xbf16>
    %cst_9 = arith.constant dense<0.000000e+00> : vector<16x512xf32>
    %9 = tpu.matmul %6, %8, %cst_9 {dimension_numbers = #tpu.dot_dimension_numbers<[1], [0], [0], [1], [0, 0, 1, 1], [], []>} : vector<16x72xbf16>, vector<72x512xbf16>, vector<16x512xf32> -> vector<16x512xf32>
    %c1_10 = arith.constant 1 : index
    %c0_11 = arith.constant 0 : index
    %10 = vector.load %arg9[%c1_10, %c0_11] : memref<18x72xbf16, #tpu.memory_space<vmem>>, vector<16x72xbf16>
    %c1_12 = arith.constant 1 : index
    %c0_13 = arith.constant 0 : index
    %c0_14 = arith.constant 0 : index
    %11 = vector.load %arg2[%c1_12, %c0_13, %c0_14] : memref<3x72x512xbf16, #tpu.memory_space<vmem>>, vector<1x72x512xbf16>
    %12 = vector.shape_cast %11 : vector<1x72x512xbf16> to vector<72x512xbf16>
    %cst_15 = arith.constant dense<0.000000e+00> : vector<16x512xf32>
    %13 = tpu.matmul %10, %12, %cst_15 {dimension_numbers = #tpu.dot_dimension_numbers<[1], [0], [0], [1], [0, 0, 1, 1], [], []>} : vector<16x72xbf16>, vector<72x512xbf16>, vector<16x512xf32> -> vector<16x512xf32>
    %14 = arith.addf %9, %13 : vector<16x512xf32>
    %c2 = arith.constant 2 : index
    %c0_16 = arith.constant 0 : index
    %15 = vector.load %arg9[%c2, %c0_16] : memref<18x72xbf16, #tpu.memory_space<vmem>>, vector<16x72xbf16>
    %c2_17 = arith.constant 2 : index
    %c0_18 = arith.constant 0 : index
    %c0_19 = arith.constant 0 : index
    %16 = vector.load %arg2[%c2_17, %c0_18, %c0_19] : memref<3x72x512xbf16, #tpu.memory_space<vmem>>, vector<1x72x512xbf16>
    %17 = vector.shape_cast %16 : vector<1x72x512xbf16> to vector<72x512xbf16>
    %cst_20 = arith.constant dense<0.000000e+00> : vector<16x512xf32>
    %18 = tpu.matmul %15, %17, %cst_20 {dimension_numbers = #tpu.dot_dimension_numbers<[1], [0], [0], [1], [0, 0, 1, 1], [], []>} : vector<16x72xbf16>, vector<72x512xbf16>, vector<16x512xf32> -> vector<16x512xf32>
    %19 = arith.addf %14, %18 : vector<16x512xf32>
    %c0_21 = arith.constant 0 : index
    %c0_22 = arith.constant 0 : index
    %20 = vector.load %arg3[%c0_21, %c0_22] : memref<1x512xf32, #tpu.memory_space<vmem>>, vector<1x512xf32>
    %21 = vector.broadcast %20 : vector<1x512xf32> to vector<16x512xf32>
    %22 = arith.mulf %19, %21 : vector<16x512xf32>
    %c0_23 = arith.constant 0 : index
    %c0_24 = arith.constant 0 : index
    %23 = vector.load %arg4[%c0_23, %c0_24] : memref<1x512xf32, #tpu.memory_space<vmem>>, vector<1x512xf32>
    %24 = vector.broadcast %23 : vector<1x512xf32> to vector<16x512xf32>
    %25 = arith.addf %22, %24 : vector<16x512xf32>
    %cst_25 = arith.constant 0.00999999977 : f32
    %26 = vector.broadcast %cst_25 : f32 to vector<16x512xf32>
    %27 = arith.mulf %26, %25 : vector<16x512xf32>
    %28 = arith.maximumf %25, %27 : vector<16x512xf32>
    %cst_26 = arith.constant 0.000000e+00 : bf16
    %29 = vector.broadcast %cst_26 : bf16 to vector<18x576xbf16>
    %c0_27 = arith.constant 0 : index
    %c0_28 = arith.constant 0 : index
    %30 = vector.load %arg10[%c0_27, %c0_28] : memref<18x576xbf16, #tpu.memory_space<vmem>>, vector<18x576xbf16>
    tpu.vector_store %arg10[%c0_27, %c0_28], %29 {strides = array<i32>} : memref<18x576xbf16, #tpu.memory_space<vmem>>, vector<18x576xbf16>,
    %31 = arith.truncf %28 : vector<16x512xf32> to vector<16x512xbf16>
    %c1_29 = arith.constant 1 : index
    %c32 = arith.constant 32 : index
    %32 = vector.load %arg10[%c1_29, %c32] : memref<18x576xbf16, #tpu.memory_space<vmem>>, vector<16x512xbf16>
    tpu.vector_store %arg10[%c1_29, %c32], %31 {strides = array<i32>} : memref<18x576xbf16, #tpu.memory_space<vmem>>, vector<16x512xbf16>,
    %c0_30 = arith.constant 0 : index
    %c0_31 = arith.constant 0 : index
    %33 = vector.load %arg10[%c0_30, %c0_31] : memref<18x576xbf16, #tpu.memory_space<vmem>>, vector<16x576xbf16>
    %c0_32 = arith.constant 0 : index
    %c0_33 = arith.constant 0 : index
    %c0_34 = arith.constant 0 : index
    %34 = vector.load %arg5[%c0_32, %c0_33, %c0_34] : memref<3x576x512xbf16, #tpu.memory_space<vmem>>, vector<1x576x512xbf16>
    %35 = vector.shape_cast %34 : vector<1x576x512xbf16> to vector<576x512xbf16>
    %cst_35 = arith.constant dense<0.000000e+00> : vector<16x512xf32>
    %36 = tpu.matmul %33, %35, %cst_35 {dimension_numbers = #tpu.dot_dimension_numbers<[1], [0], [0], [1], [0, 0, 1, 1], [], []>} : vector<16x576xbf16>, vector<576x512xbf16>, vector<16x512xf32> -> vector<16x512xf32>
    %c1_36 = arith.constant 1 : index
    %c0_37 = arith.constant 0 : index
    %37 = vector.load %arg10[%c1_36, %c0_37] : memref<18x576xbf16, #tpu.memory_space<vmem>>, vector<16x576xbf16>
    %c1_38 = arith.constant 1 : index
    %c0_39 = arith.constant 0 : index
    %c0_40 = arith.constant 0 : index
    %38 = vector.load %arg5[%c1_38, %c0_39, %c0_40] : memref<3x576x512xbf16, #tpu.memory_space<vmem>>, vector<1x576x512xbf16>
    %39 = vector.shape_cast %38 : vector<1x576x512xbf16> to vector<576x512xbf16>
    %cst_41 = arith.constant dense<0.000000e+00> : vector<16x512xf32>
    %40 = tpu.matmul %37, %39, %cst_41 {dimension_numbers = #tpu.dot_dimension_numbers<[1], [0], [0], [1], [0, 0, 1, 1], [], []>} : vector<16x576xbf16>, vector<576x512xbf16>, vector<16x512xf32> -> vector<16x512xf32>
    %41 = arith.addf %36, %40 : vector<16x512xf32>
    %c2_42 = arith.constant 2 : index
    %c0_43 = arith.constant 0 : index
    %42 = vector.load %arg10[%c2_42, %c0_43] : memref<18x576xbf16, #tpu.memory_space<vmem>>, vector<16x576xbf16>
    %c2_44 = arith.constant 2 : index
    %c0_45 = arith.constant 0 : index
    %c0_46 = arith.constant 0 : index
    %43 = vector.load %arg5[%c2_44, %c0_45, %c0_46] : memref<3x576x512xbf16, #tpu.memory_space<vmem>>, vector<1x576x512xbf16>
    %44 = vector.shape_cast %43 : vector<1x576x512xbf16> to vector<576x512xbf16>
    %cst_47 = arith.constant dense<0.000000e+00> : vector<16x512xf32>
    %45 = tpu.matmul %42, %44, %cst_47 {dimension_numbers = #tpu.dot_dimension_numbers<[1], [0], [0], [1], [0, 0, 1, 1], [], []>} : vector<16x576xbf16>, vector<576x512xbf16>, vector<16x512xf32> -> vector<16x512xf32>
    %46 = arith.addf %41, %45 : vector<16x512xf32>
    %c0_48 = arith.constant 0 : index
    %c0_49 = arith.constant 0 : index
    %47 = vector.load %arg6[%c0_48, %c0_49] : memref<1x512xf32, #tpu.memory_space<vmem>>, vector<1x512xf32>
    %48 = vector.broadcast %47 : vector<1x512xf32> to vector<16x512xf32>
    %49 = arith.mulf %46, %48 : vector<16x512xf32>
    %c0_50 = arith.constant 0 : index
    %c0_51 = arith.constant 0 : index
    %50 = vector.load %arg7[%c0_50, %c0_51] : memref<1x512xf32, #tpu.memory_space<vmem>>, vector<1x512xf32>
    %51 = vector.broadcast %50 : vector<1x512xf32> to vector<16x512xf32>
    %52 = arith.addf %49, %51 : vector<16x512xf32>
    %cst_52 = arith.constant 0.00999999977 : f32
    %53 = vector.broadcast %cst_52 : f32 to vector<16x512xf32>
    %54 = arith.mulf %53, %52 : vector<16x512xf32>
    %55 = arith.maximumf %52, %54 : vector<16x512xf32>
    %56 = vector.shape_cast %55 : vector<16x512xf32> to vector<8x2x512xf32>
    %57 = vector.extract_strided_slice %56 {offsets = [0, 0, 0], sizes = [8, 1, 512], strides = [1, 1, 1]} : vector<8x2x512xf32> to vector<8x1x512xf32>
    %58 = vector.shape_cast %57 : vector<8x1x512xf32> to vector<8x512xf32>
    %59 = vector.extract_strided_slice %56 {offsets = [0, 1, 0], sizes = [8, 1, 512], strides = [1, 1, 1]} : vector<8x2x512xf32> to vector<8x1x512xf32>
    %60 = vector.shape_cast %59 : vector<8x1x512xf32> to vector<8x512xf32>
    %61 = arith.maximumf %58, %60 : vector<8x512xf32>
    %62 = vector.shape_cast %61 : vector<8x512xf32> to vector<8x8x64xf32>
    %63 = vector.extract_strided_slice %62 {offsets = [0, 0, 0], sizes = [8, 8, 32], strides = [1, 1, 1]} : vector<8x8x64xf32> to vector<8x8x32xf32>
    %64 = vector.extract_strided_slice %62 {offsets = [0, 0, 32], sizes = [8, 8, 32], strides = [1, 1, 1]} : vector<8x8x64xf32> to vector<8x8x32xf32>
    %65 = arith.maximumf %63, %64 : vector<8x8x32xf32>
    %66 = vector.shape_cast %65 : vector<8x8x32xf32> to vector<8x256xf32>
    %c0_53 = arith.constant 0 : index
    %c0_54 = arith.constant 0 : index
    %c0_55 = arith.constant 0 : index
    %67 = vector.load %arg8[%c0_53, %c0_54, %c0_55] : memref<1x8x256xf32, #tpu.memory_space<vmem>>, vector<1x8x256xf32>
    %68 = vector.shape_cast %67 : vector<1x8x256xf32> to vector<8x256xf32>
    %69 = vector.shape_cast %66 : vector<8x256xf32> to vector<1x8x256xf32>
    tpu.vector_store %arg8[%c0_53, %c0_54, %c0_55], %69 {strides = array<i32>} : memref<1x8x256xf32, #tpu.memory_space<vmem>>, vector<1x8x256xf32>,
    return
  }
  func.func @transform_0(%arg0: i32) -> (i32, i32, i32) {
    %c0_i32 = arith.constant 0 : i32
    %c0_i32_0 = arith.constant 0 : i32
    %c0_i32_1 = arith.constant 0 : i32
    return %arg0, %c0_i32, %c0_i32_0 : i32, i32, i32
  }
  func.func @transform_1(%arg0: i32) -> (i32, i32, i32) {
    %c0_i32 = arith.constant 0 : i32
    %c0_i32_0 = arith.constant 0 : i32
    %c0_i32_1 = arith.constant 0 : i32
    %c0_i32_2 = arith.constant 0 : i32
    return %c0_i32, %c0_i32_0, %c0_i32_1 : i32, i32, i32
  }
  func.func @transform_2(%arg0: i32) -> (i32, i32) {
    %c0_i32 = arith.constant 0 : i32
    %c0_i32_0 = arith.constant 0 : i32
    %c0_i32_1 = arith.constant 0 : i32
    return %c0_i32, %c0_i32_0 : i32, i32
  }
  func.func @transform_3(%arg0: i32) -> (i32, i32) {
    %c0_i32 = arith.constant 0 : i32
    %c0_i32_0 = arith.constant 0 : i32
    %c0_i32_1 = arith.constant 0 : i32
    return %c0_i32, %c0_i32_0 : i32, i32
  }
  func.func @transform_4(%arg0: i32) -> (i32, i32, i32) {
    %c0_i32 = arith.constant 0 : i32
    %c0_i32_0 = arith.constant 0 : i32
    %c0_i32_1 = arith.constant 0 : i32
    %c0_i32_2 = arith.constant 0 : i32
    return %c0_i32, %c0_i32_0, %c0_i32_1 : i32, i32, i32
  }
  func.func @transform_5(%arg0: i32) -> (i32, i32) {
    %c0_i32 = arith.constant 0 : i32
    %c0_i32_0 = arith.constant 0 : i32
    %c0_i32_1 = arith.constant 0 : i32
    return %c0_i32, %c0_i32_0 : i32, i32
  }
  func.func @transform_6(%arg0: i32) -> (i32, i32) {
    %c0_i32 = arith.constant 0 : i32
    %c0_i32_0 = arith.constant 0 : i32
    %c0_i32_1 = arith.constant 0 : i32
    return %c0_i32, %c0_i32_0 : i32, i32
  }
  func.func @transform_7(%arg0: i32) -> (i32, i32, i32) {
    %c0_i32 = arith.constant 0 : i32
    %c0_i32_0 = arith.constant 0 : i32
    %c0_i32_1 = arith.constant 0 : i32
    return %arg0, %c0_i32, %c0_i32_0 : i32, i32, i32
  }
}

</mosaic_0001>

<bundles_post_ra>
// kernel: tpu_custom_call.1
= control target key start
LH: loop header
LB: loop body
LE: loop exit
PB: predicated region body
PF: predicated region fallthrough
CT: control target
= control target key end

     0   :  { %12 = vsyncpa [#allocation5], 0  ;;  %s9197_s0 = inlined_call_operand.hbm [shape: f32[2,16,64], index: 0, kind: input, shape index: {}]   ;;  %s9198_s1 = inlined_call_operand.hbm [shape: bf16[3,72,512], index: 1, kind: input, shape index: {}]   ;;  %s9199_s2 = inlined_call_operand.hbm [shape: f32[1,512], index: 2, kind: input, shape index: {}]   ;;  %s9200_s3 = inlined_call_operand.hbm [shape: f32[1,512], index: 3, kind: input, shape index: {}]   ;;  %s9201_s4 = inlined_call_operand.hbm [shape: bf16[3,576,512], index: 4, kind: input, shape index: {}]   ;;  %s9202_s5 = inlined_call_operand.hbm [shape: f32[1,512], index: 5, kind: input, shape index: {}]   ;;  %s9203_s6 = inlined_call_operand.hbm [shape: f32[1,512], index: 6, kind: input, shape index: {}]   ;;  %s9204_s7 = inlined_call_operand.hbm [shape: f32[2,8,256], index: 7, kind: output, shape index: {}]  }
   0x1   :  { %14 = vsyncpa [#allocation5 + $0x1], 0 }
   0x2   :  { %15 = vsyncpa [#allocation8], 0 }
   0x3   :  { %16 = vsyncpa [#allocation11], 0 }
   0x4   :  { %17 = vsyncpa [#allocation14], 0 }
   0x5   :  { %18 = vsyncpa [#allocation6], 0 }
   0x6   :  { %20 = vsyncpa [#allocation6 + $0x1], 0  ;;  %s8042_s24 = smov 0   ;;  %s8044_s25 = smov 0  }
   0x7   :  { %s8046_s26 = smov 0   ;;  %s8048_s27 = smov 0  }
   0x8 LB: > { %s7982_s28 = smov [#allocation7]   ;;  %s8063_s30 = sadd.s32 4294967295, %s7980_s27   ;;  %s7980_s27 = sphi %s8048_s27, %s9248_s27   ;;  %s7976_s26 = sphi %s8046_s26, %s9247_s26   ;;  %s7972_s25 = sphi %s8044_s25, %s9246_s25   ;;  %s7968_s24 = sphi %s8042_s24, %s9245_s24  }
   0x9   : > { %s221_s29 = sshll.u32 %s7982_s28, 4  ;;  %p6177_p0 = scmp.ge.s32.totalorder %s7980_s27, 1  ;;  %s8068_s29 = int_to_ptr.vmem [resolvable:$true] %s221_s29 }
   0xa   : > { %p9205_p1 = scmp.eq.s32.totalorder %s8063_s30, 0  ;;  %p209_p2 = scmp.lt.s32.totalorder %s7980_s27, 3 }
   0xb   : > { %s7983_s9 = smov [#allocation10]   ;;  %s7984_s12 = smov [#allocation13]  }
   0xc   : > { %p8070_p3 = pnand %p6177_p0, %p209_p2  ;;  %s246_s10 = sshll.u32 %s7983_s9, 4  ;;  %s8083_s10 = int_to_ptr.vmem [resolvable:$true] %s246_s10 }
   0xd   : > { %s270_s13 = sshll.u32 %s7984_s12, 4  ;;  %s7704_s16 = scalar_lea.hbm %s9198_s1, 6912  ;;  %s8085_s13 = int_to_ptr.vmem [resolvable:$true] %s270_s13 }
   0xe   : > { %s9209_s8 = scalar_select %p8070_p3, 1, 0 }
   0xf   : > { %p6868_p5 = pneg %p8070_p3  ;;  %p7705_p7 = scmp.ne.s32.totalorder %s9198_s1, %s7704_s16 }
  0x10   : > { %p7711_p11 = scmp.lt.u32.totalorder %s7704_s16, %s9198_s1 }
  0x11   : > { %p8079_p6 = pnand %p6868_p5, %p9205_p1 }
  0x13   : > { %p8095_p8 = pneg %p8079_p6 }
  0x15   : > { %p7707_p9 = pnand %p8095_p8, %p7705_p7 }
  0x17   : > { %p7708_p10 = pneg %p7707_p9 }
  0x19   : > { %p7713_p12 = pnand %p7711_p11, %p7708_p10 }
  0x1b   : > { %7716 = shalt.err (!%p7713_p12)
}
  0x1c   : > { %s7717_s22 = scalar_lea.vmem %s8068_s29, 6912  ;;  %p7725_p5 = scmp.lt.s32.totalorder %s8068_s29, %s8068_s29 }
  0x1d   : > { %p7718_p13 = scmp.ne.s32.totalorder %s8068_s29, %s7717_s22  ;;  %p7726_p4 = scmp.lt.s32.totalorder %s7717_s22, %s7717_s22 }
  0x1f   : > { %p7720_p0 = pnand %p7718_p13, %p8095_p8  ;;  %p7727_p7 = por %p7726_p4, %p7725_p5 }
  0x21   : > { %p7721_p2 = pneg %p7720_p0 }
  0x23   : > { %p7728_p9 = pnand %p7727_p7, %p7721_p2 }
  0x25   : > { %7731 = shalt.err (!%p7728_p9)
}
  0x26   : > { %s7985_s23 = smov 256   ;;  %s7986_s28 = smov 16  }
  0x27   : > { %6871 = dma.hbm_to_vmem [thread:$0]  (!%p8079_p6), %s9198_s1, 6912, %s8068_s29, [#allocation8], %s7985_s23, %s7985_s23, %s7986_s28  }
  0x28   : > { %s7732_s16 = scalar_lea.hbm %s9200_s3, 64 }
  0x29   : > { %p7733_p4 = scmp.ne.s32.totalorder %s9200_s3, %s7732_s16  ;;  %p7739_p12 = scmp.lt.u32.totalorder %s7732_s16, %s9200_s3 }
  0x2b   : > { %p7735_p10 = pnand %p7733_p4, %p8095_p8 }
  0x2d   : > { %p7736_p11 = pneg %p7735_p10 }
  0x2f   : > { %p7741_p13 = pnand %p7739_p12, %p7736_p11 }
  0x31   : > { %7744 = shalt.err (!%p7741_p13)
}
  0x32   : > { %s7745_s29 = scalar_lea.vmem %s8083_s10, 64  ;;  %p7753_p7 = scmp.lt.s32.totalorder %s8083_s10, %s8083_s10 }
  0x33   : > { %p7746_p0 = scmp.ne.s32.totalorder %s8083_s10, %s7745_s29  ;;  %p7754_p9 = scmp.lt.s32.totalorder %s7745_s29, %s7745_s29 }
  0x35   : > { %p7748_p2 = pnand %p7746_p0, %p8095_p8  ;;  %p7755_p4 = por %p7754_p9, %p7753_p7 }
  0x37   : > { %p7749_p5 = pneg %p7748_p2 }
  0x39   : > { %p7756_p10 = pnand %p7755_p4, %p7749_p5 }
  0x3b   : > { %7759 = shalt.err (!%p7756_p10)
}
  0x3c   : > { %6877 = dma.hbm_to_vmem [thread:$0]  (!%p8079_p6), %s9200_s3, 64, %s8083_s10, [#allocation11]  }
  0x3d   : > { %s7760_s15 = scalar_lea.hbm %s9202_s5, 64 }
  0x3e   : > { %p7761_p11 = scmp.ne.s32.totalorder %s9202_s5, %s7760_s15  ;;  %p7767_p0 = scmp.lt.u32.totalorder %s7760_s15, %s9202_s5 }
  0x40   : > { %p7763_p12 = pnand %p7761_p11, %p8095_p8 }
  0x42   : > { %p7764_p13 = pneg %p7763_p12 }
  0x44   : > { %p7769_p2 = pnand %p7767_p0, %p7764_p13 }
  0x46   : > { %7772 = shalt.err (!%p7769_p2)
}
  0x47   : > { %s7773_s10 = scalar_lea.vmem %s8085_s13, 64  ;;  %p7781_p4 = scmp.lt.s32.totalorder %s8085_s13, %s8085_s13 }
  0x48   : > { %p7774_p5 = scmp.ne.s32.totalorder %s8085_s13, %s7773_s10  ;;  %p7782_p10 = scmp.lt.s32.totalorder %s7773_s10, %s7773_s10 }
  0x4a   : > { %p7776_p7 = pnand %p7774_p5, %p8095_p8  ;;  %p7783_p11 = por %p7782_p10, %p7781_p4 }
  0x4c   : > { %p7777_p9 = pneg %p7776_p7 }
  0x4e   : > { %p7784_p12 = pnand %p7783_p11, %p7777_p9 }
  0x50   : > { %7787 = shalt.err (!%p7784_p12)
}
  0x51   : > { %6883 = dma.hbm_to_vmem [thread:$0]  (!%p8079_p6), %s9202_s5, 64, %s8085_s13, [#allocation14]  }
  0x52   : > { %s7987_s22 = smov [#allocation9]   ;;  %s7988_s12 = smov [#allocation12]  }
  0x53   : > { %s235_s9 = sshll.u32 %s7987_s22, 4  ;;  %s256_s14 = sshll.u32 %s7988_s12, 4  ;;  %s236_s9 = int_to_ptr.vmem [resolvable:$true] %s235_s9  ;;  %s257_s14 = int_to_ptr.vmem [resolvable:$true] %s256_s14 }
  0x54   : > { %s7788_s17 = scalar_lea.hbm %s9199_s2, 64 }
  0x55   : > { %p7789_p13 = scmp.ne.s32.totalorder %s9199_s2, %s7788_s17  ;;  %p7795_p5 = scmp.lt.u32.totalorder %s7788_s17, %s9199_s2 }
  0x57   : > { %p7791_p0 = pnand %p7789_p13, %p8095_p8 }
  0x59   : > { %p7792_p2 = pneg %p7791_p0 }
  0x5b   : > { %p7797_p7 = pnand %p7795_p5, %p7792_p2 }
  0x5d   : > { %7800 = shalt.err (!%p7797_p7)
}
  0x5e   : > { %s7801_s13 = scalar_lea.vmem %s236_s9, 64  ;;  %p7809_p11 = scmp.lt.s32.totalorder %s236_s9, %s236_s9 }
  0x5f   : > { %p7802_p9 = scmp.ne.s32.totalorder %s236_s9, %s7801_s13  ;;  %p7810_p12 = scmp.lt.s32.totalorder %s7801_s13, %s7801_s13 }
  0x61   : > { %p7804_p4 = pnand %p7802_p9, %p8095_p8  ;;  %p7811_p1 = por %p7810_p12, %p7809_p11 }
  0x63   : > { %p7805_p10 = pneg %p7804_p4 }
  0x65   : > { %p7812_p3 = pnand %p7811_p1, %p7805_p10 }
  0x67   : > { %7815 = shalt.err (!%p7812_p3)
}
  0x68   : > { %6874 = dma.hbm_to_vmem [thread:$0]  (!%p8079_p6), %s9199_s2, 64, %s236_s9, [#allocation8]  }
  0x69   : > { %s7816_s16 = scalar_lea.hbm %s9201_s4, 55296 }
  0x6a   : > { %p7817_p13 = scmp.ne.s32.totalorder %s9201_s4, %s7816_s16  ;;  %p7823_p3 = scmp.lt.u32.totalorder %s7816_s16, %s9201_s4 }
  0x6c   : > { %p7819_p0 = pnand %p7817_p13, %p8095_p8 }
  0x6e   : > { %p7820_p1 = pneg %p7819_p0 }
  0x70   : > { %p7825_p2 = pnand %p7823_p3, %p7820_p1 }
  0x72   : > { %7828 = shalt.err (!%p7825_p2)
}
  0x73   : > { %s7829_s21 = scalar_lea.vmem %s257_s14, 55296  ;;  %p7837_p4 = scmp.lt.s32.totalorder %s257_s14, %s257_s14 }
  0x74   : > { %p7830_p5 = scmp.ne.s32.totalorder %s257_s14, %s7829_s21  ;;  %p7838_p10 = scmp.lt.s32.totalorder %s7829_s21, %s7829_s21 }
  0x76   : > { %p7832_p7 = pnand %p7830_p5, %p8095_p8  ;;  %p7839_p11 = por %p7838_p10, %p7837_p4 }
  0x78   : > { %p7833_p9 = pneg %p7832_p7 }
  0x7a   : > { %p7840_p12 = pnand %p7839_p11, %p7833_p9 }
  0x7c   : > { %7843 = shalt.err (!%p7840_p12)
}
  0x7d   : > { %6880 = dma.hbm_to_vmem [thread:$0]  (!%p8079_p6), %s9201_s4, 55296, %s257_s14, [#allocation11], %s7985_s23, %s7985_s23, %s7986_s28  }
  0x7e   : > { %s7989_s29 = smov [#allocation15]   ;;  %s7844_s16 = scalar_lea.hbm %s9203_s6, 64 }
  0x7f   : > { %s281_s22 = sshll.u32 %s7989_s29, 4  ;;  %p7845_p13 = scmp.ne.s32.totalorder %s9203_s6, %s7844_s16  ;;  %s282_s22 = int_to_ptr.vmem [resolvable:$true] %s281_s22 }
  0x80   : > { %p7851_p3 = scmp.lt.u32.totalorder %s7844_s16, %s9203_s6 }
  0x81   : > { %p7847_p0 = pnand %p7845_p13, %p8095_p8 }
  0x83   : > { %p7848_p1 = pneg %p7847_p0 }
  0x85   : > { %p7853_p2 = pnand %p7851_p3, %p7848_p1 }
  0x87   : > { %7856 = shalt.err (!%p7853_p2)
}
  0x88   : > { %s7857_s23 = scalar_lea.vmem %s282_s22, 64  ;;  %p7865_p4 = scmp.lt.s32.totalorder %s282_s22, %s282_s22 }
  0x89   : > { %p7858_p5 = scmp.ne.s32.totalorder %s282_s22, %s7857_s23  ;;  %p7866_p10 = scmp.lt.s32.totalorder %s7857_s23, %s7857_s23 }
  0x8b   : > { %p7860_p7 = pnand %p7858_p5, %p8095_p8  ;;  %p7867_p11 = por %p7866_p10, %p7865_p4 }
  0x8d   : > { %p7861_p9 = pneg %p7860_p7 }
  0x8f   : > { %p7868_p12 = pnand %p7867_p11, %p7861_p9 }
  0x91   : > { %7871 = shalt.err (!%p7868_p12)
}
  0x92   : > { %6886 = dma.hbm_to_vmem [thread:$0]  (!%p8079_p6), %s9203_s6, 64, %s282_s22, [#allocation14]  }
  0x93   : > { %s6176_s19 = sadd.s32 4294967294, %s7980_s27   ;;  %s8224_s11 = sadd.s32 1, %s7980_s27  }
  0x94   : > { %s30_s21 = ssub.s32 %s7980_s27, %s8224_s11  ;;  %s33_s9 = sadd.s32 1, %s7976_s26 }
  0x95   : > { %p31_p8 = scmp.eq.s32.totalorder %s30_s21, 0  ;;  %p40_p13 = scmp.ne.s32.totalorder %s7976_s26, %s7972_s25 }
  0x96   : > { %p41_p0 = scmp.eq.s32.totalorder %s7980_s27, 0  ;;  %p46_p1 = scmp.ne.s32.totalorder %s7972_s25, %s7968_s24 }
  0x97   : > { %s8235_s13 = scalar_select %p31_p8, %s7976_s26, %s33_s9  }
  0x98   : > { %p8237_p3 = por %p41_p0, %p40_p13  ;;  %p9213_p2 = scmp.eq.s32.totalorder %s8063_s30, 0 }
  0x99   : > { %p196_p5 = scmp.eq.s32.totalorder %s8063_s30, 1  ;;  %p202_p7 = scmp.eq.s32.totalorder %s6176_s19, 1 }
  0x9a   : > { %p8243_p6 = por %p9213_p2, %p46_p1  ;;  %p6901_p9 = scmp.lt.s32.totalorder %s7980_s27, 2 }
  0x9b   : > { %s292_s12 = sand.u32 1, %s7976_s26   ;;  %p8250_p4 = por %p196_p5, %p40_p13 }
  0x9c   : > { %p8254_p10 = por %p202_p7, %p46_p1  ;;  %s6185_s17 = sshll.u32 %s292_s12, 4 }
  0x9d   : > { %s9215_s15 = scalar_select %p8250_p4, 1, 0 }
  0x9e   : > { %s9216_s16 = scalar_select %p8254_p10, 1, 0 }
  0x9f   : > { %s6752_s18 = sshll.u32 %s7980_s27, 8  ;;  %s296_s28 = scalar_lea.vmem [#allocation4], %s6185_s17 }
  0xa0   : > { %s8262_s23 = scalar_lea.hbm %s9197_s0, %s6752_s18  ;;  %s303_s14 = sshll.u32 %s296_s28, 4  ;;  %s8264_s14 = int_to_ptr.vmem [resolvable:$true] %s303_s14 }
  0xa1   : > { %p8268_p11 = pnand %p6901_p9, %p8237_p3  ;;  %s8272_s21 = scalar_lea.sflag [#allocation5], %s292_s12 }
  0xa2   : > { %s7872_s9 = scalar_lea.hbm %s8262_s23, 256  ;;  %s7877_s29 = scalar_lea.hbm %s9197_s0, 512 }
  0xa3   : > { %p7873_p12 = scmp.ne.s32.totalorder %s8262_s23, %s7872_s9  ;;  %p7874_p8 = pneg %p8268_p11 }
  0xa4   : > { %p7878_p1 = scmp.lt.u32.totalorder %s8262_s23, %s9197_s0  ;;  %p7879_p3 = scmp.lt.u32.totalorder %s7877_s29, %s7872_s9 }
  0xa5   : > { %p7875_p13 = pnand %p7874_p8, %p7873_p12  ;;  %p7881_p5 = scmp.lt.u32.totalorder %s7872_s9, %s8262_s23 }
  0xa6   : > { %p7880_p2 = por %p7879_p3, %p7878_p1 }
  0xa7   : > { %p7876_p0 = pneg %p7875_p13 }
  0xa8   : > { %p7882_p7 = por %p7881_p5, %p7880_p2 }
  0xaa   : > { %p7883_p9 = pnand %p7882_p7, %p7876_p0 }
  0xac   : > { %7886 = shalt.err (!%p7883_p9)
}
  0xad   : > { %s7887_s12 = scalar_lea.vmem %s8264_s14, 256  ;;  %s7990_s28 = smov [#allocation4]  }
  0xae   : > { %p7888_p12 = scmp.ne.s32.totalorder %s8264_s14, %s7887_s12  ;;  %s7892_s17 = sshll.u32 %s7990_s28, 4  ;;  %s7893_s17 = int_to_ptr.vmem [resolvable:$false] %s7892_s17 }
  0xaf   : > { %s7894_s18 = scalar_lea.vmem %s7893_s17, 512  ;;  %p7895_p4 = scmp.lt.s32.totalorder %s8264_s14, %s7893_s17 }
  0xb0   : > { %p7890_p13 = pnand %p7888_p12, %p7874_p8  ;;  %p7896_p1 = scmp.lt.s32.totalorder %s7894_s18, %s7887_s12 }
  0xb2   : > { %p7891_p10 = pneg %p7890_p13  ;;  %p7897_p3 = por %p7896_p1, %p7895_p4 }
  0xb4   : > { %p7898_p2 = pnand %p7897_p3, %p7891_p10 }
  0xb6   : > { %7901 = shalt.err (!%p7898_p2)
}
  0xb7   : > { %s7991_s9 = smov 128   ;;  %s7992_s29 = smov 8  }
  0xb8   : > { %6890 = dma.hbm_to_vmem [thread:$0]  (!%p8268_p11), %s8262_s23, 256, %s8264_s14, %s8272_s21, %s7991_s9, %s7991_s9, %s7992_s29  }
  0xb9   : > { %p9218_p8 = scmp.ne.s32.totalorder %s9209_s8, 0 }
  0xba   : > { %s8303_s20 = sand.u32 (!%p9218_p8), 1, %s7972_s25  }
  0xbb   : > { %315 = sbr.rel (%p9218_p8) target bundleno = 1809 (0x711), region = 48  ;;  %s6189_s10 = sshll.u32 (!%p9218_p8), %s8303_s20, 4 }
  0xbc   : > { %s318_s12 = scalar_lea.sflag (!%p9218_p8), [#allocation5], %s8303_s20  ;;  %s321_s28 = scalar_lea.vmem (!%p9218_p8), [#allocation4], %s6189_s10 }
  0xc2   : > { %7947 = dma.done.wait (%p8243_p6), %s318_s12, 256  }
  0xc3   : > { %7949 = vsyncadd (%p8243_p6), %s318_s12, 4294967040  ;;  %p9219_p4 = scmp.eq.s32.totalorder %s8063_s30, 0 }
  0xc5   : > { %7951 = dma.done.wait (%p9219_p4), [#allocation8], 6976   ;;  %p9220_p10 = pmov %p9219_p4 }
  0xc6   : > { %p9221_p11 = pmov %p9219_p4 }
  0xc7   : > { %7953 = vsyncadd (%p9220_p10), [#allocation8], 4294960320 }
  0xc8   : > { %7955 = dma.done.wait (%p9221_p11), [#allocation11], 55360   ;;  %p9222_p0 = pmov %p9219_p4 }
  0xca   : > { %7957 = vsyncadd (%p9222_p0), [#allocation11], 4294911936  ;;  %p9223_p5 = pmov %p9222_p0 }
  0xcb   : > { %p9224_p7 = pmov %p9222_p0 }
  0xcc   : > { %7959 = dma.done.wait (%p9223_p5), [#allocation14], 128  }
  0xcd   : > { %7961 = vsyncadd (%p9224_p7), [#allocation14], 4294967168  ;;  %vm377_vm0 = vcmask 584704   ;;  %v7993_v0 = vmov 0   ;;  %vm380_vm1 = vcmask 581632   ;;  %v382_v1 = vld [vmem:[%s321_s28] sm:$0xff] }
  0xce   : > { %378 = vst.msk [vmem:[#allocation2] sm:$0xf] %vm377_vm0, %v7993_v0  ;;  %379 = vst.msk [vmem:[#allocation2 + $0x4] sm:$0xf] %vm377_vm0, %v7993_v0  ;;  %632 = vmatprep.mubr.bf16.mxu0 %v7993_v0  ;;  %675 = vmatprep.mubr.bf16.mxu1 %v7993_v0  ;;  %v383_v2 = vld [vmem:[%s321_s28 + $0x8] sm:$0xff]  ;;  %v6753_v3 = vpack.c.bf16 %v382_v1, %v382_v1  ;;  %s7994_s8 = smov 4  }
  0xcf   : > { %1182 = vst [vmem:[#allocation3 + $0x14] sm:$0xff] %v7993_v0  ;;  %1185 = vst [vmem:[#allocation3 + $0x28] sm:$0x11] %v7993_v0  ;;  %vm390_vm2 = vsmask.f32 256  ;;  %v6754_v4 = vpack.c.bf16 %v383_v2, %v383_v2  ;;  %v470_v31 = vld [vmem:[#allocation7 + $0x110] sm:$0xff] }
  0xd0   : > { %1186 = vst [vmem:[#allocation3 + $0x30] sm:$0x11] %v7993_v0  ;;  %381 = vst.msk [vmem:[#allocation2 + $0x8] sm:$0x1] %vm380_vm1, %v7993_v0  ;;  %vm391_vm3 = vsmask.f32 4368  ;;  %v6218_v35 = vcombine.high %v470_v31, %v470_v31  ;;  %v6217_v37 = vcombine.low %v470_v31, %v470_v31 }
  0xd1   : > { %v6959_v5 = vld [vmem:[#allocation7 + $0x94] ss:$16 sps:$4 sm:$0xff]   ;;  %v6961_v6 = vld [vmem:[#allocation7 + $0x9c] ss:$16 sps:$4 sm:$0xff]   ;;  %v394_v7 = vshrl.u32 %v6753_v3, 16  ;;  %v397_v8 = vshll.u32 %v6753_v3, 16  ;;  %vm8334_vm4 = vmor %vm390_vm2, %vm391_vm3 }
  0xd2   : > { %v402_v9 = vshrl.u32 %v6754_v4, 16  ;;  %v405_v10 = vshll.u32 %v6754_v4, 16  ;;  %600 = vmatprep.subr.bf16.mxu0 %v6959_v5  ;;  %v6963_v11 = vld [vmem:[#allocation7 + $0x90] ss:$16 sps:$4 sm:$0xff]   ;;  %643 = vmatprep.subr.bf16.mxu1 %v6961_v6  ;;  %v6964_v13 = vld [vmem:[#allocation7 + $0x98] ss:$16 sps:$4 sm:$0xff]  }
  0xd3   : > { %v396_v14 = vrot.slane %v394_v7, 7  ;;  %601 = vmatpush1.bf16.msra.mxu0 %v6963_v11  ;;  %v6965_v16 = vld [vmem:[#allocation7 + $0xb4] ss:$16 sps:$4 sm:$0xff]   ;;  %644 = vmatpush1.bf16.msra.mxu1 %v6964_v13  ;;  %v6967_v17 = vld [vmem:[#allocation7 + $0xbc] ss:$16 sps:$4 sm:$0xff]   ;;  %vm587_vm5 = vcmask 1043456  }
  0xd4   : > { %v404_v15 = vrot.slane %v402_v9, 7  ;;  %v6969_v18 = vld [vmem:[#allocation7 + $0xb0] ss:$16 sps:$4 sm:$0xff]   ;;  %602 = vmatprep.subr.bf16.mxu0 %v6965_v16  ;;  %v6970_v23 = vld [vmem:[#allocation7 + $0xb8] ss:$16 sps:$4 sm:$0xff]   ;;  %645 = vmatprep.subr.bf16.mxu1 %v6967_v17  ;;  %v589_v40 = vsel %vm587_vm5, %v6217_v37, 0 }
  0xd5   : > { %v399_v19 = vor.u32 %v397_v8, %v396_v14  ;;  %v400_v20 = vrot.slane %v396_v14, 4  ;;  %v6971_v24 = vld [vmem:[#allocation7 + $0xd4] ss:$16 sps:$4 sm:$0xff]   ;;  %v6973_v25 = vld [vmem:[#allocation7 + $0xdc] ss:$16 sps:$4 sm:$0xff]   ;;  %vm419_vm6 = vcmask 551968  }
  0xd6   : > { %v409_v21 = vrot.slane %v404_v15, 4  ;;  %v407_v22 = vor.u32 %v405_v10, %v404_v15  ;;  %v6975_v26 = vld [vmem:[#allocation7 + $0xd0] ss:$16 sps:$4 sm:$0xff]   ;;  %v6976_v27 = vld [vmem:[#allocation7 + $0xd8] ss:$16 sps:$4 sm:$0xff]   ;;  %vm427_vm8 = vcmask 548896  }
  0xd7   : > { %410 = vrot.lane.b32.xlu0 %v399_v19, %s7994_s8  ;;  %603 = vmatpush1.bf16.msra.mxu0 %v6969_v18  ;;  %v6977_v29 = vld [vmem:[#allocation7 + $0xf4] ss:$16 sps:$4 sm:$0xff]   ;;  %v6979_v30 = vld [vmem:[#allocation7 + $0xfc] ss:$16 sps:$4 sm:$0xff]   ;;  %v6981_v33 = vld [vmem:[#allocation7 + $0xf0] ss:$16 sps:$4 sm:$0xff]  }
  0xd8   : > { %414 = vrot.lane.b32.xlu1 %v409_v21, %s7994_s8  ;;  %v408_v28 = vsel %vm8334_vm4, %v400_v20, %v407_v22  ;;  %646 = vmatpush1.bf16.msra.mxu1 %v6970_v23  ;;  %v471_v32 = vld [vmem:[#allocation7 + $0x118] sm:$0xff]  ;;  %v6989_v39 = vld [vmem:[#allocation7 + $0x4] ss:$16 sps:$4 sm:$0xff]   ;;  %vm420_vm7 = vsmask.f32 7938  ;;  %vm428_vm10 = vmand %vm427_vm8, %vm390_vm2  ;;  %vm583_vm12 = vcmask 588800  }
  0xd9   : > { %604 = vmatprep.subr.bf16.mxu0 %v6971_v24  ;;  %647 = vmatprep.subr.bf16.mxu1 %v6973_v25  ;;  %v6982_v34 = vld [vmem:[#allocation7 + $0xf8] ss:$16 sps:$4 sm:$0xff]   ;;  %v6220_v36 = vcombine.high %v471_v32, %v471_v32  ;;  %v6219_v38 = vcombine.low %v471_v32, %v471_v32  ;;  %v6992_v42 = vld [vmem:[#allocation7 + $0xc] ss:$16 sps:$4 sm:$0xff]   ;;  %vm421_vm9 = vmand %vm419_vm6, %vm420_vm7  ;;  %vm480_vm11 = vsmask.f32 7424 }
  0xda   : > { %v422_v43 = vld [vmem:[#allocation2] sm:$0xf]  ;;  %v429_v44 = vld [vmem:[#allocation2 + $0x8] sm:$0x1]  ;;  %v6997_v61 = vld [vmem:[#allocation7 + $0x24] ss:$16 sps:$4 sm:$0xff]  }
  0xdb   : > { %412 = vrot.lane.b32.xlu0 %v408_v28, %s7994_s8  ;;  %605 = vmatpush1.bf16.msra.mxu0 %v6975_v26  ;;  %v595_v41 = vsel %vm587_vm5, %v6219_v38, 0  ;;  %v6987_v56 = vld [vmem:[#allocation7] ss:$16 sps:$4 sm:$0xff]   ;;  %v6990_v57 = vld [vmem:[#allocation7 + $0x8] ss:$16 sps:$4 sm:$0xff]   ;;  %vm9208_vm13 = vcmask 1046528  }
  0xdc   : > { %648 = vmatpush1.bf16.msra.mxu1 %v6976_v27  ;;  %606 = vmatprep.subr.bf16.mxu0 %v6977_v29  ;;  %v7000_v62 = vld [vmem:[#allocation7 + $0x2c] ss:$16 sps:$4 sm:$0xff]   ;;  %v6995_v2 = vld [vmem:[#allocation7 + $0x20] ss:$16 sps:$4 sm:$0xff]   ;;  %v6998_v3 = vld [vmem:[#allocation7 + $0x28] ss:$16 sps:$4 sm:$0xff]  }
  0xdd   : > { %649 = vmatprep.subr.bf16.mxu1 %v6979_v30  ;;  %v7003_v4 = vld [vmem:[#allocation7 + $0x44] ss:$16 sps:$4 sm:$0xff]   ;;  %v7006_v5 = vld [vmem:[#allocation7 + $0x4c] ss:$16 sps:$4 sm:$0xff]   ;;  %v7001_v6 = vld [vmem:[#allocation7 + $0x40] ss:$16 sps:$4 sm:$0xff]  }
  0xde   : > { %v7004_v7 = vld [vmem:[#allocation7 + $0x48] ss:$16 sps:$4 sm:$0xff]   ;;  %v7009_v8 = vld [vmem:[#allocation7 + $0x64] ss:$16 sps:$4 sm:$0xff]   ;;  %v7012_v9 = vld [vmem:[#allocation7 + $0x6c] ss:$16 sps:$4 sm:$0xff]  }
  0xdf   : > { %607 = vmatpush1.bf16.msra.mxu0 %v6981_v33  ;;  %v450_v10 = vld [vmem:[#allocation7 + $0x80] sm:$0xff]  ;;  %v451_v11 = vld [vmem:[#allocation7 + $0x88] sm:$0xff]  ;;  %v8369_v32 = vld [vmem:[#allocation3 + $0x14] sm:$0xff]  ;;  %vm1180_vm14 = vcmask 519168   ;;  %vm1187_vm15 = vcmask 516096   ;;  %s7995_s22 = smov 32  }
  0xe0   : > { %650 = vmatpush1.bf16.msra.mxu1 %v6982_v34  ;;  %6221 = vmatprep.subr.msk.bf16.mxu0 %vm587_vm5, %v6218_v35  ;;  %v7007_v13 = vld [vmem:[#allocation7 + $0x60] ss:$16 sps:$4 sm:$0xff]   ;;  %v7010_v14 = vld [vmem:[#allocation7 + $0x68] ss:$16 sps:$4 sm:$0xff]   ;;  %v6242_v15 = vcombine.high %v450_v10, %v450_v10  ;;  %v6244_v16 = vcombine.high %v451_v11, %v451_v11  ;;  %v6241_v17 = vcombine.low %v450_v10, %v450_v10  ;;  %v7019_v19 = vld [vmem:[#allocation7 + $0x124] ss:$16 sps:$4 sm:$0xff]  }
  0xe1   : > { %6223 = vmatprep.subr.msk.bf16.mxu1 %vm587_vm5, %v6220_v36  ;;  %v6243_v18 = vcombine.low %v451_v11, %v451_v11  ;;  %v7017_v22 = vld [vmem:[#allocation7 + $0x120] ss:$16 sps:$4 sm:$0xff]   ;;  %v7020_v23 = vld [vmem:[#allocation7 + $0x128] ss:$16 sps:$4 sm:$0xff]   ;;  %v7025_v24 = vld [vmem:[#allocation7 + $0x144] ss:$16 sps:$4 sm:$0xff]  }
  0xe2   : > { %v779_v20 = vsel %vm587_vm5, %v6241_v17, 0  ;;  %v7028_v25 = vld [vmem:[#allocation7 + $0x14c] ss:$16 sps:$4 sm:$0xff]   ;;  %v7023_v26 = vld [vmem:[#allocation7 + $0x140] ss:$16 sps:$4 sm:$0xff]   ;;  %vm1281_vm0 = vcmask 1043712  }
  0xe3   : > { %609 = vmatpush1.bf16.msra.mxu0 %v589_v40  ;;  %v785_v21 = vsel %vm587_vm5, %v6243_v18, 0  ;;  %v7026_v27 = vld [vmem:[#allocation7 + $0x148] ss:$16 sps:$4 sm:$0xff]   ;;  %v7031_v28 = vld [vmem:[#allocation7 + $0x164] ss:$16 sps:$4 sm:$0xff]   ;;  %vm1283_vm1 = vcmask 1047556  }
  0xe4   : > { %652 = vmatpush1.bf16.msra.mxu1 %v595_v41  ;;  %790 = vmatprep.subr.bf16.mxu0 %v6989_v39  ;;  %v7034_v29 = vld [vmem:[#allocation7 + $0x16c] ss:$16 sps:$4 sm:$0xff]   ;;  %v7029_v30 = vld [vmem:[#allocation7 + $0x160] ss:$16 sps:$4 sm:$0xff]   ;;  %v7032_v31 = vld [vmem:[#allocation7 + $0x168] ss:$16 sps:$4 sm:$0xff]  }
  0xe5   : > { %833 = vmatprep.subr.bf16.mxu1 %v6992_v42  ;;  %v7037_v33 = vld [vmem:[#allocation7 + $0x184] ss:$16 sps:$4 sm:$0xff]   ;;  %v7040_v34 = vld [vmem:[#allocation7 + $0x18c] ss:$16 sps:$4 sm:$0xff]   ;;  %v7035_v37 = vld [vmem:[#allocation7 + $0x180] ss:$16 sps:$4 sm:$0xff]  }
  0xe6   : > { %v894_v35 = vld [vmem:[#allocation7 + $0x1a0] sm:$0xff]  ;;  %v895_v36 = vld [vmem:[#allocation7 + $0x1a8] sm:$0xff]  ;;  %1181 = vst.msk [vmem:[#allocation3 + $0x10] sm:$0xf] %vm1180_vm14, %v8369_v32  ;;  %1184 = vst.msk [vmem:[#allocation3 + $0x24] sm:$0xf] %vm1180_vm14, %v8369_v32 }
  0xe7   : > { %v7038_v38 = vld [vmem:[#allocation7 + $0x188] ss:$16 sps:$4 sm:$0xff]   ;;  %v6267_v40 = vcombine.high %v894_v35, %v894_v35  ;;  %v6269_v41 = vcombine.high %v895_v36, %v895_v36  ;;  %v6266_v42 = vcombine.low %v894_v35, %v894_v35  ;;  %v7079_v10 = vld [vmem:[#allocation12 + $0x528] ss:$16 sps:$4 sm:$0xff]   ;;  %v7084_v11 = vld [vmem:[#allocation12 + $0x544] ss:$16 sps:$4 sm:$0xff]  }
  0xe8   : > { %v7093_v17 = vld [vmem:[#allocation12 + $0x56c] ss:$16 sps:$4 sm:$0xff]   ;;  %v7088_v18 = vld [vmem:[#allocation12 + $0x560] ss:$16 sps:$4 sm:$0xff]   ;;  %1188 = vst.msk [vmem:[#allocation3 + $0x38] sm:$0x1] %vm1187_vm15, %v8369_v32 }
  0xe9   : > { %v7139_v12 = vld [vmem:[#allocation12 + $0x668] ss:$16 sps:$4 sm:$0xff]   ;;  %vm1284_vm3 = vsmask.f32 7954  ;;  %vm1307_vm8 = vcmask 1040640   ;;  %s7997_s23 = smov 64  }
  0xea   : > { %vm8427_vm15 = vmand %vm1307_vm8, %vm390_vm2  ;;  %s7999_s14 = smov 96   ;;  %s375_s19 = scalar_lea.vmem [#allocation16], %s6189_s10 }
  0xeb   : > { %s6049_s21 = sshll.u32 %s375_s19, 4  ;;  %s6759_s17 = sshll.u32 %s8063_s30, 8  ;;  %s9155_s21 = int_to_ptr.vmem [resolvable:$true] %s6049_s21 }
  0xec   : > { %s9153_s29 = scalar_lea.hbm %s9204_s7, %s6759_s17  ;;  %s6035_s30 = scalar_lea.sflag [#allocation6], %s8303_s20 }
  0xed   : > { %s7902_s10 = scalar_lea.vmem %s9155_s21, 256  ;;  %p9242_p9 = scmp.ne.s32.totalorder %s9215_s15, 0 }
  0xee   : > { %p7903_p6 = scmp.ne.s32.totalorder %s9155_s21, %s7902_s10  ;;  %s8001_s12 = smov [#allocation16]  }
  0xef   : > { %s7906_s28 = sshll.u32 %s8001_s12, 4  ;;  %s7907_s28 = int_to_ptr.vmem [resolvable:$false] %s7906_s28 }
  0xf0   : > { %p7904_p12 = pnand %p7903_p6, %p9242_p9  ;;  %s7908_s8 = scalar_lea.vmem %s7907_s28, 512 }
  0xf1   : > { %p7909_p1 = scmp.lt.s32.totalorder %s9155_s21, %s7907_s28  ;;  %p7910_p3 = scmp.lt.s32.totalorder %s7908_s8, %s7902_s10 }
  0xf2   : > { %p7905_p13 = pneg %p7904_p12 }
  0xf3   : > { %p7911_p2 = por %p7910_p3, %p7909_p1 }
  0xf5   : > { %p7912_p8 = pnand %p7911_p2, %p7905_p13 }
 0x149   : > { %v411_v45 = vpop.permute.xlu0 %410 }
 0x14a   : > { %v415_v46 = vpop.permute.xlu1 %414  ;;  %v423_v47 = vsel %vm421_vm9, %v411_v45, %v422_v43  ;;  %v6268_v43 = vcombine.low %v895_v36, %v895_v36  ;;  %v997_v45 = vsel %vm587_vm5, %v6266_v42, 0  ;;  %v1102_v36 = vld [vmem:[#allocation9] sm:$0xf]  ;;  %vm1309_vm9 = vcmask 1044484  }
 0x14b   : > { %v430_v48 = vsel %vm428_vm10, %v415_v46, %v429_v44  ;;  %424 = vst [vmem:[#allocation2] sm:$0xf] %v423_v47  ;;  %vm1310_vm10 = vsmask.f32 4352 }
 0x14c   : > { %431 = vst [vmem:[#allocation2 + $0x8] sm:$0x1] %v430_v48  ;;  %v1003_v46 = vsel %vm587_vm5, %v6268_v43, 0 }
 0x14d   : > { %v413_v49 = vpop.permute.xlu0 %412 }
 0x14e   : > { %426 = vst.msk [vmem:[#allocation2 + $0x4] sm:$0xf] %vm419_vm6, %v413_v49  ;;  %vm8420_vm6 = vmand %vm1283_vm1, %vm1284_vm3 }
 0x14f   : > { %vm1302_vm3 = vmor %vm1283_vm1, %vm1281_vm0  ;;  %vm1316_vm1 = vcmask 1040384  }
 0x152   : > { %v432_v50 = vld [vmem:[#allocation2] sm:$0xf] }
 0x153   : > { %v8346_v51 = vld [vmem:[#allocation2 + $0x8] ss:$0 sps:$4 sm:$0x11]   ;;  %v876_v39 = vld [vmem:[#allocation2] sm:$0xe] }
 0x154   : > { %v489_v54 = vshll.u32 %v8346_v51, 16  ;;  %v901_v48 = vrot.slane %v8346_v51, 1  ;;  %v7055_v51 = vld [vmem:[#allocation12 + $0x4a8] ss:$16 sps:$4 sm:$0xff]  }
 0x155   : > { %v8348_v52 = vld [vmem:[#allocation2 + $0x4] sm:$0xf] }
 0x156   : > { %v8351_v53 = vcombine.low %v432_v50, %v8348_v52  ;;  %v491_v60 = vrot.slane %v489_v54, 1  ;;  %v6249_v44 = vcombine.low %v876_v39, %v8348_v52  ;;  %v7046_v50 = vld [vmem:[#allocation12 + $0x480] ss:$16 sps:$4 sm:$0xff]   ;;  %v7048_v52 = vld [vmem:[#allocation12 + $0x484] ss:$16 sps:$4 sm:$0xff]  }
 0x157   : > { %v7051_v54 = vld [vmem:[#allocation12 + $0x48c] ss:$16 sps:$4 sm:$0xff]  }
 0x158   : > { %v484_v55 = vshll.u32 %v8351_v53, 16  ;;  %v482_v58 = vshrl.u32 %v8351_v53, 16  ;;  %v900_v47 = vrot.slane %v6249_v44, 1  ;;  %v1132_v39 = vld [vmem:[#allocation10] sm:$0xf] }
 0x15a   : > { %v486_v59 = vrot.slane %v484_v55, 1  ;;  %v902_v49 = vsel %vm9208_vm13, %v900_v47, %v901_v48  ;;  %v7054_v55 = vld [vmem:[#allocation12 + $0x4a4] ss:$16 sps:$4 sm:$0xff]   ;;  %vm8431_vm13 = vmand %vm1309_vm9, %vm1310_vm10  ;;  %vm1322_vm10 = vcmask 253952  }
 0x15b   : > { %vm1312_vm8 = vmor %vm8431_vm13, %vm8427_vm15 }
 0x15c   : > { %v487_v63 = vor.u32 %v486_v59, %v482_v58  ;;  %v7060_v58 = vld [vmem:[#allocation12 + $0x4c4] ss:$16 sps:$4 sm:$0xff]   ;;  %v7063_v59 = vld [vmem:[#allocation12 + $0x4cc] ss:$16 sps:$4 sm:$0xff]   ;;  %vm8446_vm9 = vmand %vm587_vm5, %vm420_vm7 }
 0x15d   : > { %vm8459_vm15 = vmand %vm1316_vm1, %vm390_vm2  ;;  %vm5137_vm1 = vcmask 1047559  }
 0x15e   : > { %v492_v1 = vsel %vm480_vm11, %v487_v63, %v491_v60  ;;  %v7058_v60 = vld [vmem:[#allocation12 + $0x4c0] ss:$16 sps:$4 sm:$0xff]   ;;  %v7069_v63 = vld [vmem:[#allocation12 + $0x4ec] ss:$16 sps:$4 sm:$0xff]  }
 0x15f   : > { %6222 = vmatmul.mubr.msk.bf16.vlgmr.msra.gmra.mrb[0].mxu0 %vm583_vm12, %v492_v1  ;;  %6224 = vmatmul.mubr.msk.bf16.vlgmr.msra.gmra.mrb[0].mxu1 %vm583_vm12, %v492_v1  ;;  %v7064_v1 = vld [vmem:[#allocation12 + $0x4e0] ss:$16 sps:$4 sm:$0xff]  }
 0x160   : > { %791 = vmatpush1.bf16.msra.mxu0 %v6987_v56  ;;  %834 = vmatpush1.bf16.msra.mxu1 %v6990_v57  ;;  %v7057_v56 = vld [vmem:[#allocation12 + $0x4ac] ss:$16 sps:$4 sm:$0xff]   ;;  %v7052_v57 = vld [vmem:[#allocation12 + $0x4a0] ss:$16 sps:$4 sm:$0xff]  }
 0x161   : > { %792 = vmatprep.subr.bf16.mxu0 %v6997_v61  ;;  %835 = vmatprep.subr.bf16.mxu1 %v7000_v62  ;;  %v7061_v61 = vld [vmem:[#allocation12 + $0x4c8] ss:$16 sps:$4 sm:$0xff]   ;;  %v7066_v62 = vld [vmem:[#allocation12 + $0x4e4] ss:$16 sps:$4 sm:$0xff]  }
 0x162   : > { %822 = vmatprep.mubr.bf16.mxu0 %v7993_v0  ;;  %865 = vmatprep.mubr.bf16.mxu1 %v7993_v0  ;;  %v7022_v0 = vld [vmem:[#allocation7 + $0x12c] ss:$16 sps:$4 sm:$0xff]  }
 0x164   : > { %793 = vmatpush1.bf16.msra.mxu0 %v6995_v2  ;;  %836 = vmatpush1.bf16.msra.mxu1 %v6998_v3  ;;  %v7067_v2 = vld [vmem:[#allocation12 + $0x4e8] ss:$16 sps:$4 sm:$0xff]   ;;  %v7072_v3 = vld [vmem:[#allocation12 + $0x504] ss:$16 sps:$4 sm:$0xff]  }
 0x165   : > { %794 = vmatprep.subr.bf16.mxu0 %v7003_v4  ;;  %837 = vmatprep.subr.bf16.mxu1 %v7006_v5  ;;  %v7075_v4 = vld [vmem:[#allocation12 + $0x50c] ss:$16 sps:$4 sm:$0xff]   ;;  %v7070_v5 = vld [vmem:[#allocation12 + $0x500] ss:$16 sps:$4 sm:$0xff]  }
 0x168   : > { %795 = vmatpush1.bf16.msra.mxu0 %v7001_v6  ;;  %838 = vmatpush1.bf16.msra.mxu1 %v7004_v7  ;;  %v7073_v6 = vld [vmem:[#allocation12 + $0x508] ss:$16 sps:$4 sm:$0xff]   ;;  %v7078_v7 = vld [vmem:[#allocation12 + $0x524] ss:$16 sps:$4 sm:$0xff]  }
 0x169   : > { %796 = vmatprep.subr.bf16.mxu0 %v7009_v8  ;;  %839 = vmatprep.subr.bf16.mxu1 %v7012_v9  ;;  %v7081_v8 = vld [vmem:[#allocation12 + $0x52c] ss:$16 sps:$4 sm:$0xff]   ;;  %v7076_v9 = vld [vmem:[#allocation12 + $0x520] ss:$16 sps:$4 sm:$0xff]  }
 0x16c   : > { %797 = vmatpush1.bf16.msra.mxu0 %v7007_v13  ;;  %840 = vmatpush1.bf16.msra.mxu1 %v7010_v14  ;;  %v7087_v13 = vld [vmem:[#allocation12 + $0x54c] ss:$16 sps:$4 sm:$0xff]   ;;  %v7082_v14 = vld [vmem:[#allocation12 + $0x540] ss:$16 sps:$4 sm:$0xff]  }
 0x16d   : > { %6245 = vmatprep.subr.msk.bf16.mxu0 %vm587_vm5, %v6242_v15  ;;  %6247 = vmatprep.subr.msk.bf16.mxu1 %vm587_vm5, %v6244_v16  ;;  %v7085_v15 = vld [vmem:[#allocation12 + $0x548] ss:$16 sps:$4 sm:$0xff]   ;;  %v7090_v16 = vld [vmem:[#allocation12 + $0x564] ss:$16 sps:$4 sm:$0xff]  }
 0x170   : > { %799 = vmatpush1.bf16.msra.mxu0 %v779_v20  ;;  %842 = vmatpush1.bf16.msra.mxu1 %v785_v21  ;;  %v7099_v20 = vld [vmem:[#allocation12 + $0x58c] ss:$16 sps:$4 sm:$0xff]   ;;  %v7094_v21 = vld [vmem:[#allocation12 + $0x580] ss:$16 sps:$4 sm:$0xff]  }
 0x171   : > { %1008 = vmatprep.subr.bf16.mxu0 %v7019_v19  ;;  %1051 = vmatprep.subr.bf16.mxu1 %v7022_v0  ;;  %v7091_v19 = vld [vmem:[#allocation12 + $0x568] ss:$16 sps:$4 sm:$0xff]   ;;  %v7096_v0 = vld [vmem:[#allocation12 + $0x584] ss:$16 sps:$4 sm:$0xff]  }
 0x173   : > { %6246 = vmatmul.mubr.msk.bf16.vlgmr.msra.gmra.mrb[0].mxu0 %vm583_vm12, %v8351_v53  ;;  %6248 = vmatmul.mubr.msk.bf16.vlgmr.msra.gmra.mrb[0].mxu1 %vm583_vm12, %v8351_v53  ;;  %v7049_v53 = vld [vmem:[#allocation12 + $0x488] ss:$16 sps:$4 sm:$0xff]  }
 0x174   : > { %1009 = vmatpush1.bf16.msra.mxu0 %v7017_v22  ;;  %1052 = vmatpush1.bf16.msra.mxu1 %v7020_v23  ;;  %v7097_v22 = vld [vmem:[#allocation12 + $0x588] ss:$16 sps:$4 sm:$0xff]   ;;  %v7102_v23 = vld [vmem:[#allocation12 + $0x5a4] ss:$16 sps:$4 sm:$0xff]  }
 0x175   : > { %1010 = vmatprep.subr.bf16.mxu0 %v7025_v24  ;;  %1053 = vmatprep.subr.bf16.mxu1 %v7028_v25  ;;  %v7105_v24 = vld [vmem:[#allocation12 + $0x5ac] ss:$16 sps:$4 sm:$0xff]   ;;  %v7100_v25 = vld [vmem:[#allocation12 + $0x5a0] ss:$16 sps:$4 sm:$0xff]  }
 0x176   : > { %1040 = vmatprep.mubr.bf16.mxu0 %v8369_v32  ;;  %1083 = vmatprep.mubr.bf16.mxu1 %v8369_v32 }
 0x178   : > { %1011 = vmatpush1.bf16.msra.mxu0 %v7023_v26  ;;  %1054 = vmatpush1.bf16.msra.mxu1 %v7026_v27  ;;  %v7103_v26 = vld [vmem:[#allocation12 + $0x5a8] ss:$16 sps:$4 sm:$0xff]   ;;  %v7108_v27 = vld [vmem:[#allocation12 + $0x5c4] ss:$16 sps:$4 sm:$0xff]  }
 0x179   : > { %1012 = vmatprep.subr.bf16.mxu0 %v7031_v28  ;;  %1055 = vmatprep.subr.bf16.mxu1 %v7034_v29  ;;  %v7111_v28 = vld [vmem:[#allocation12 + $0x5cc] ss:$16 sps:$4 sm:$0xff]   ;;  %v7106_v29 = vld [vmem:[#allocation12 + $0x5c0] ss:$16 sps:$4 sm:$0xff]  }
 0x17c   : > { %1013 = vmatpush1.bf16.msra.mxu0 %v7029_v30  ;;  %1056 = vmatpush1.bf16.msra.mxu1 %v7032_v31  ;;  %v7109_v30 = vld [vmem:[#allocation12 + $0x5c8] ss:$16 sps:$4 sm:$0xff]   ;;  %v1104_v31 = vlaneseq }
 0x17d   : > { %1014 = vmatprep.subr.bf16.mxu0 %v7037_v33  ;;  %1057 = vmatprep.subr.bf16.mxu1 %v7040_v34 }
 0x17e   : > { %v8382_v33 = vshrl.u32 %v1104_v31, 7 }
 0x180   : > { %1015 = vmatpush1.bf16.msra.mxu0 %v7035_v37  ;;  %1058 = vmatpush1.bf16.msra.mxu1 %v7038_v38  ;;  %v8385_v34 = vsub.s32 0, %v8382_v33  ;;  %v8388_v35 = vsub.s32 2, %v8382_v33  ;;  %v8391_v37 = vsub.s32 1, %v8382_v33  ;;  %v8394_v38 = vsub.s32 3, %v8382_v33 }
 0x181   : > { %6270 = vmatprep.subr.msk.bf16.mxu0 %vm587_vm5, %v6267_v40  ;;  %6272 = vmatprep.subr.msk.bf16.mxu1 %vm587_vm5, %v6269_v41 }
 0x182   : > { %v1107_v40 = vrot.slane %v1102_v36, %v8385_v34  ;;  %v1115_v41 = vrot.slane %v1102_v36, %v8388_v35  ;;  %v1111_v42 = vrot.slane %v1102_v36, %v8391_v37  ;;  %v1119_v43 = vrot.slane %v1102_v36, %v8394_v38 }
 0x183   : > { %v1137_v44 = vrot.slane %v1132_v39, %v8385_v34  ;;  %v1141_v48 = vrot.slane %v1132_v39, %v8391_v37 }
 0x184   : > { %1017 = vmatpush1.bf16.msra.mxu0 %v997_v45  ;;  %1060 = vmatpush1.bf16.msra.mxu1 %v1003_v46  ;;  %v1145_v45 = vrot.slane %v1132_v39, %v8388_v35 }
 0x185   : > { %2447 = vmatprep.subr.bf16.mxu0 %v7048_v52  ;;  %2576 = vmatprep.subr.bf16.mxu1 %v7051_v54 }
 0x187   : > { %6271 = vmatmul.mubr.msk.bf16.vlgmr.msra.gmra.mrb[0].mxu0 %vm583_vm12, %v902_v49  ;;  %6273 = vmatmul.mubr.msk.bf16.vlgmr.msra.gmra.mrb[0].mxu1 %vm583_vm12, %v902_v49  ;;  %v1149_v49 = vrot.slane %v1132_v39, %v8394_v38  ;;  %vm1261_vm12 = vcmask 261120  }
 0x188   : > { %2448 = vmatpush1.bf16.msra.mxu0 %v7046_v50  ;;  %2577 = vmatpush1.bf16.msra.mxu1 %v7049_v53 }
 0x189   : > { %2449 = vmatprep.subr.bf16.mxu0 %v7054_v55  ;;  %2578 = vmatprep.subr.bf16.mxu1 %v7057_v56 }
 0x18c   : > { %2450 = vmatpush1.bf16.msra.mxu0 %v7052_v57  ;;  %2579 = vmatpush1.bf16.msra.mxu1 %v7055_v51 }
 0x18d   : > { %2451 = vmatprep.subr.bf16.mxu0 %v7060_v58  ;;  %2580 = vmatprep.subr.bf16.mxu1 %v7063_v59 }
 0x190   : > { %2452 = vmatpush1.bf16.msra.mxu0 %v7058_v60  ;;  %2581 = vmatpush1.bf16.msra.mxu1 %v7061_v61 }
 0x191   : > { %2453 = vmatprep.subr.bf16.mxu0 %v7066_v62  ;;  %2582 = vmatprep.subr.bf16.mxu1 %v7069_v63 }
 0x194   : > { %2454 = vmatpush1.bf16.msra.mxu0 %v7064_v1  ;;  %2583 = vmatpush1.bf16.msra.mxu1 %v7067_v2 }
 0x195   : > { %2455 = vmatprep.subr.bf16.mxu0 %v7072_v3  ;;  %2584 = vmatprep.subr.bf16.mxu1 %v7075_v4 }
 0x198   : > { %2456 = vmatpush1.bf16.msra.mxu0 %v7070_v5  ;;  %2585 = vmatpush1.bf16.msra.mxu1 %v7073_v6 }
 0x199   : > { %2457 = vmatprep.subr.bf16.mxu0 %v7078_v7  ;;  %2586 = vmatprep.subr.bf16.mxu1 %v7081_v8 }
 0x19c   : > { %2458 = vmatpush1.bf16.msra.mxu0 %v7076_v9  ;;  %2587 = vmatpush1.bf16.msra.mxu1 %v7079_v10 }
 0x19d   : > { %2459 = vmatprep.subr.bf16.mxu0 %v7084_v11  ;;  %2588 = vmatprep.subr.bf16.mxu1 %v7087_v13 }
 0x1a0   : > { %2460 = vmatpush1.bf16.msra.mxu0 %v7082_v14  ;;  %2589 = vmatpush1.bf16.msra.mxu1 %v7085_v15 }
 0x1a1   : > { %2461 = vmatprep.subr.bf16.mxu0 %v7090_v16  ;;  %2590 = vmatprep.subr.bf16.mxu1 %v7093_v17 }
 0x1a4   : > { %2462 = vmatpush1.bf16.msra.mxu0 %v7088_v18  ;;  %2591 = vmatpush1.bf16.msra.mxu1 %v7091_v19  ;;  %v7114_v18 = vld [vmem:[#allocation12 + $0x5e4] ss:$16 sps:$4 sm:$0xff]  }
 0x1a5   : > { %2463 = vmatprep.subr.bf16.mxu0 %v7096_v0  ;;  %2592 = vmatprep.subr.bf16.mxu1 %v7099_v20 }
 0x1a8   : > { %2464 = vmatpush1.bf16.msra.mxu0 %v7094_v21  ;;  %2593 = vmatpush1.bf16.msra.mxu1 %v7097_v22  ;;  %v7112_v22 = vld [vmem:[#allocation12 + $0x5e0] ss:$16 sps:$4 sm:$0xff]  }
 0x1a9   : > { %2465 = vmatprep.subr.bf16.mxu0 %v7102_v23  ;;  %2594 = vmatprep.subr.bf16.mxu1 %v7105_v24 }
 0x1ac   : > { %2466 = vmatpush1.bf16.msra.mxu0 %v7100_v25  ;;  %2595 = vmatpush1.bf16.msra.mxu1 %v7103_v26  ;;  %v7115_v25 = vld [vmem:[#allocation12 + $0x5e8] ss:$16 sps:$4 sm:$0xff]   ;;  %v7117_v26 = vld [vmem:[#allocation12 + $0x5ec] ss:$16 sps:$4 sm:$0xff]  }
 0x1ad   : > { %2467 = vmatprep.subr.bf16.mxu0 %v7108_v27  ;;  %2596 = vmatprep.subr.bf16.mxu1 %v7111_v28 }
 0x1b0   : > { %2468 = vmatpush1.bf16.msra.mxu0 %v7106_v29  ;;  %2597 = vmatpush1.bf16.msra.mxu1 %v7109_v30 }
 0x1b1   : > { %2469 = vmatprep.subr.bf16.mxu0 %v7114_v18  ;;  %2598 = vmatprep.subr.bf16.mxu1 %v7117_v26 }
 0x1b4   : > { %2470 = vmatpush1.bf16.msra.mxu0 %v7112_v22  ;;  %2599 = vmatpush1.bf16.msra.mxu1 %v7115_v25  ;;  %v1313_v25 = vld [vmem:[#allocation3 + $0x28] sm:$0x11] }
 0x25a   : > { %v1042_v46 = vpop.f32.mrb[0].mxu0  ;;  %v1085_v47 = vpop.f32.mrb[0].mxu1 }
 0x25b   : > { %v1124_v50 = vmul.f32 %v1107_v40, %v1042_v46  ;;  %v1126_v52 = vmul.f32 %v1115_v41, %v1085_v47  ;;  %v1044_v53 = vpop.f32.mrb[1].mxu0  ;;  %v1087_v54 = vpop.f32.mrb[1].mxu1 }
 0x25c   : > { %v1125_v55 = vmul.f32 %v1111_v42, %v1044_v53  ;;  %v1127_v56 = vmul.f32 %v1119_v43, %v1087_v54  ;;  %v1046_v57 = vpop.f32.mrb[2].mxu0  ;;  %v1089_v51 = vpop.f32.mrb[2].mxu1  ;;  %v7129_v53 = vld [vmem:[#allocation12 + $0x62c] ss:$16 sps:$4 sm:$0xff]  }
 0x25d   : > { %v1154_v58 = vadd.f32 %v1137_v44, %v1124_v50  ;;  %v1156_v59 = vadd.f32 %v1145_v45, %v1126_v52  ;;  %v1128_v60 = vmul.f32 %v1107_v40, %v1046_v57  ;;  %v1130_v61 = vmul.f32 %v1115_v41, %v1089_v51  ;;  %v1048_v62 = vpop.f32.mrb[3].mxu0  ;;  %v1091_v63 = vpop.f32.mrb[3].mxu1  ;;  %v7118_v40 = vld [vmem:[#allocation12 + $0x600] ss:$16 sps:$4 sm:$0xff]   ;;  %v7120_v41 = vld [vmem:[#allocation12 + $0x604] ss:$16 sps:$4 sm:$0xff]  }
 0x25e   : > { %v1155_v1 = vadd.f32 %v1141_v48, %v1125_v55  ;;  %v1157_v2 = vadd.f32 %v1149_v49, %v1127_v56  ;;  %v1129_v3 = vmul.f32 %v1111_v42, %v1048_v62  ;;  %v1131_v4 = vmul.f32 %v1119_v43, %v1091_v63  ;;  %v7121_v43 = vld [vmem:[#allocation12 + $0x608] ss:$16 sps:$4 sm:$0xff]   ;;  %2471 = vmatprep.subr.bf16.mxu0 %v7120_v41  ;;  %v7126_v52 = vld [vmem:[#allocation12 + $0x624] ss:$16 sps:$4 sm:$0xff]   ;;  %v7124_v51 = vld [vmem:[#allocation12 + $0x620] ss:$16 sps:$4 sm:$0xff]  }
 0x25f   : > { %v1162_v5 = vmul.f32 0.01, %v1154_v58  ;;  %v1164_v6 = vmul.f32 0.01, %v1156_v59  ;;  %v1158_v7 = vadd.f32 %v1137_v44, %v1128_v60  ;;  %v1160_v8 = vadd.f32 %v1145_v45, %v1130_v61  ;;  %2472 = vmatpush1.bf16.msra.mxu0 %v7118_v40  ;;  %v7127_v62 = vld [vmem:[#allocation12 + $0x628] ss:$16 sps:$4 sm:$0xff]  }
 0x260   : > { %v1163_v9 = vmul.f32 0.01, %v1155_v1  ;;  %v1165_v10 = vmul.f32 0.01, %v1157_v2  ;;  %v1159_v11 = vadd.f32 %v1141_v48, %v1129_v3  ;;  %v1161_v13 = vadd.f32 %v1149_v49, %v1131_v4  ;;  %v7123_v48 = vld [vmem:[#allocation12 + $0x60c] ss:$16 sps:$4 sm:$0xff]   ;;  %2473 = vmatprep.subr.bf16.mxu0 %v7126_v52 }
 0x261   : > { %v1170_v14 = vmax.f32 %v1154_v58, %v1162_v5  ;;  %v1172_v15 = vmax.f32 %v1156_v59, %v1164_v6  ;;  %v1166_v16 = vmul.f32 0.01, %v1158_v7  ;;  %v1168_v17 = vmul.f32 0.01, %v1160_v8  ;;  %2600 = vmatprep.subr.bf16.mxu1 %v7123_v48  ;;  %v7132_v63 = vld [vmem:[#allocation12 + $0x644] ss:$16 sps:$4 sm:$0xff]  }
 0x262   : > { %v1171_v19 = vmax.f32 %v1155_v1, %v1163_v9  ;;  %v1173_v0 = vmax.f32 %v1157_v2, %v1165_v10  ;;  %v1167_v20 = vmul.f32 0.01, %v1159_v11  ;;  %v1169_v21 = vmul.f32 0.01, %v1161_v13  ;;  %2601 = vmatpush1.bf16.msra.mxu1 %v7121_v43  ;;  %v7135_v1 = vld [vmem:[#allocation12 + $0x64c] ss:$16 sps:$4 sm:$0xff]  }
 0x263   : > { %v1174_v23 = vmax.f32 %v1158_v7, %v1166_v16  ;;  %v1176_v24 = vmax.f32 %v1160_v8, %v1168_v17  ;;  %2602 = vmatprep.subr.bf16.mxu1 %v7129_v53  ;;  %2474 = vmatpush1.bf16.msra.mxu0 %v7124_v51  ;;  %v7130_v5 = vld [vmem:[#allocation12 + $0x640] ss:$16 sps:$4 sm:$0xff]   ;;  %v7133_v7 = vld [vmem:[#allocation12 + $0x648] ss:$16 sps:$4 sm:$0xff]   ;;  %v7138_v8 = vld [vmem:[#allocation12 + $0x664] ss:$16 sps:$4 sm:$0xff]  }
 0x264   : > { %v6755_v27 = vpack.c.bf16 %v1171_v19, %v1170_v14  ;;  %v6756_v28 = vpack.c.bf16 %v1173_v0, %v1172_v15  ;;  %v1175_v29 = vmax.f32 %v1159_v11, %v1167_v20  ;;  %v1177_v30 = vmax.f32 %v1161_v13, %v1169_v21  ;;  %2475 = vmatprep.subr.bf16.mxu0 %v7132_v63  ;;  %v7141_v9 = vld [vmem:[#allocation12 + $0x66c] ss:$16 sps:$4 sm:$0xff]   ;;  %v7136_v11 = vld [vmem:[#allocation12 + $0x660] ss:$16 sps:$4 sm:$0xff]   ;;  %v7145_v14 = vld [vmem:[#allocation12 + $0x684] ss:$16 sps:$4 sm:$0xff]  }
 0x265   : > { %v7148_v15 = vld [vmem:[#allocation12 + $0x68c] ss:$16 sps:$4 sm:$0xff]   ;;  %v7143_v16 = vld [vmem:[#allocation12 + $0x680] ss:$16 sps:$4 sm:$0xff]  }
 0x266   : > { %v6757_v31 = vpack.c.bf16 %v1175_v29, %v1174_v23  ;;  %v6758_v36 = vpack.c.bf16 %v1177_v30, %v1176_v24  ;;  %v1210_v39 = vshrl.u32 %v6755_v27, 16  ;;  %v1217_v42 = vshrl.u32 %v6756_v28, 16  ;;  %2603 = vmatpush1.bf16.msra.mxu1 %v7127_v62  ;;  %v1297_v30 = vld [vmem:[#allocation3 + $0x10] sm:$0xf] }
 0x267   : > { %v1213_v47 = vshll.u32 %v6755_v27, 16  ;;  %v1220_v6 = vshll.u32 %v6756_v28, 16  ;;  %2604 = vmatprep.subr.bf16.mxu1 %v7135_v1  ;;  %2476 = vmatpush1.bf16.msra.mxu0 %v7130_v5  ;;  %v1319_v53 = vld [vmem:[#allocation3 + $0x30] sm:$0x11] }
 0x268   : > { %v1225_v44 = vshrl.u32 %v6757_v31, 16  ;;  %v1234_v45 = vshrl.u32 %v6758_v36, 16  ;;  %v1212_v46 = vrot.slane %v1210_v39, 7  ;;  %v1228_v49 = vshll.u32 %v6757_v31, 16  ;;  %2477 = vmatprep.subr.bf16.mxu0 %v7138_v8 }
 0x269   : > { %v1219_v50 = vrot.slane %v1217_v42, 7  ;;  %v1237_v57 = vshll.u32 %v6758_v36, 16 }
 0x26a   : > { %v1215_v54 = vor.u32 %v1213_v47, %v1212_v46  ;;  %v1227_v55 = vrot.slane %v1225_v44, 7  ;;  %v1236_v56 = vrot.slane %v1234_v45, 7  ;;  %v1223_v58 = vrot.slane %v1212_v46, 4  ;;  %2605 = vmatpush1.bf16.msra.mxu1 %v7133_v7  ;;  %v1324_v47 = vld [vmem:[#allocation3 + $0x38] sm:$0x1] }
 0x26b   : > { %v1232_v60 = vrot.slane %v1219_v50, 4  ;;  %v1222_v10 = vor.u32 %v1220_v6, %v1219_v50  ;;  %2606 = vmatprep.subr.bf16.mxu1 %v7141_v9  ;;  %2478 = vmatpush1.bf16.msra.mxu0 %v7136_v11 }
 0x26c   : > { %1243 = vrot.lane.b32.xlu1 %v1215_v54, %s7995_s22  ;;  %v1230_v59 = vor.u32 %v1228_v49, %v1227_v55  ;;  %v1239_v61 = vor.u32 %v1237_v57, %v1236_v56  ;;  %v1241_v3 = vrot.slane %v1227_v55, 4  ;;  %v1242_v13 = vrot.slane %v1236_v56, 4  ;;  %2490 = vmatprep.subr.bf16.mxu0 %v7145_v14 }
 0x26e   : > { %v1231_v2 = vsel %vm8334_vm4, %v1223_v58, %v1230_v59  ;;  %v1240_v4 = vsel %vm8334_vm4, %v1232_v60, %v1239_v61  ;;  %2607 = vmatpush1.bf16.msra.mxu1 %v7139_v12  ;;  %vm1282_vm4 = vmand %vm1281_vm0, %vm420_vm7 }
 0x26f   : > { %1247 = vrot.lane.b32.xlu0 %v1231_v2, %s7995_s22  ;;  %2619 = vmatprep.subr.bf16.mxu1 %v7148_v15  ;;  %vm1286_vm14 = vmor %vm8420_vm6, %vm1282_vm4  ;;  %vm1295_vm4 = vcmask 257024  }
 0x270   : > { %1251 = vrot.lane.b32.xlu1 %v1241_v3, %s7995_s22  ;;  %vm1296_vm0 = vmand %vm1295_vm4, %vm420_vm7 }
 0x271   : > { %vm1323_vm7 = vmand %vm1322_vm10, %vm390_vm2  ;;  %vm9237_vm2 = vcmask 1046528   ;;  %vm6027_vm10 = vcmask 785408  }
 0x273   : > { %1245 = vrot.lane.b32.xlu0 %v1222_v10, %s7995_s22 }
 0x274   : > { %1249 = vrot.lane.b32.xlu1 %v1240_v4, %s7995_s22 }
 0x277   : > { %1253 = vrot.lane.b32.xlu0 %v1242_v13, %s7995_s22 }
 0x2de   : > { %v1244_v17 = vpop.permute.xlu1 %1243 }
 0x2df   : > { %v1255_v18 = vrot.slane %v1244_v17, 4 }
 0x2e1   : > { %v1262_v20 = vsel %vm1261_vm12, %v1255_v18, %v1244_v17  ;;  %v1248_v21 = vpop.permute.xlu0 %1247  ;;  %v7146_v17 = vld [vmem:[#allocation12 + $0x688] ss:$16 sps:$4 sm:$0xff]  }
 0x2e2   : > { %v1288_v22 = vsel %vm1286_vm14, %v1262_v20, %v8369_v32  ;;  %v1257_v23 = vrot.slane %v1248_v21, 4  ;;  %v1252_v24 = vpop.permute.xlu1 %1251  ;;  %vm1291_vm14 = vmor %vm8420_vm6, %vm8446_vm9  ;;  %v7152_v20 = vld [vmem:[#allocation12 + $0x6a4] ss:$16 sps:$4 sm:$0xff]   ;;  %vm5133_vm9 = vcmask 1043459  }
 0x2e3   : > { %1289 = vst [vmem:[#allocation3] sm:$0xff] %v1288_v22  ;;  %v1259_v26 = vrot.slane %v1252_v24, 4  ;;  %vm1318_vm6 = vmor %vm8431_vm13, %vm8459_vm15 }
 0x2e4   : > { %v1266_v27 = vsel %vm1261_vm12, %v1257_v23, %v1248_v21  ;;  %v7155_v21 = vld [vmem:[#allocation12 + $0x6ac] ss:$16 sps:$4 sm:$0xff]   ;;  %vm9239_vm13 = vmmov %vm9237_vm2 }
 0x2e5   : > { %1303 = vst.msk [vmem:[#allocation3 + $0x14] sm:$0xff] %vm1302_vm3, %v1266_v27  ;;  %v1269_v29 = vsel %vm1261_vm12, %v1259_v26, %v1252_v24  ;;  %v1246_v31 = vpop.permute.xlu0 %1245  ;;  %vm9240_vm3 = vmmov %vm9237_vm2 }
 0x2e6   : > { %v1314_v36 = vsel %vm1312_vm8, %v1269_v29, %v1313_v25  ;;  %v1256_v39 = vrot.slane %v1246_v31, 4  ;;  %v1250_v40 = vpop.permute.xlu1 %1249  ;;  %vm2443_vm8 = vcmask 523264  }
 0x2e7   : > { %1315 = vst [vmem:[#allocation3 + $0x28] sm:$0x11] %v1314_v36  ;;  %v1258_v41 = vrot.slane %v1250_v40, 4 }
 0x2e8   : > { %v1264_v42 = vsel %vm587_vm5, %v1255_v18, %v1256_v39  ;;  %v1298_v43 = vsel %vm1296_vm0, %v1256_v39, %v1297_v30  ;;  %v7153_v39 = vld [vmem:[#allocation12 + $0x6a8] ss:$16 sps:$4 sm:$0xff]   ;;  %vm5135_vm0 = vcmask 1045509  }
 0x2e9   : > { %v1265_v45 = vsel %vm1261_vm12, %v1264_v42, %v1246_v31  ;;  %1299 = vst [vmem:[#allocation3 + $0x10] sm:$0xf] %v1298_v43  ;;  %v1267_v46 = vsel %vm587_vm5, %v1257_v23, %v1258_v41  ;;  %1306 = vst.msk [vmem:[#allocation3 + $0x24] sm:$0xf] %vm1295_vm4, %v1258_v41  ;;  %v1254_v48 = vpop.permute.xlu0 %1253  ;;  %v7150_v23 = vld [vmem:[#allocation12 + $0x6a0] ss:$16 sps:$4 sm:$0xff]  }
 0x2ea   : > { %v1293_v49 = vsel %vm1291_vm14, %v1265_v45, %v8369_v32  ;;  %v8469_v50 = vsel %vm1261_vm12, %v1267_v46, %v1250_v40  ;;  %v1260_v52 = vrot.slane %v1254_v48, 4  ;;  %v3689_v8 = vld [vmem:[#allocation3] sm:$0xee]  ;;  %v7158_v45 = vld [vmem:[#allocation12 + $0x6c4] ss:$16 sps:$4 sm:$0xff]   ;;  %vm9241_vm4 = vmmov %vm9237_vm2 }
 0x2eb   : > { %1294 = vst [vmem:[#allocation3 + $0x8] sm:$0xff] %v1293_v49  ;;  %v8476_v54 = vcombine.low %v1293_v49, %v8469_v50  ;;  %v8486_v2 = vcombine.high %v1293_v49, %v8469_v50 }
 0x2ec   : > { %v1270_v55 = vsel %vm587_vm5, %v1259_v26, %v1260_v52  ;;  %v1325_v56 = vsel %vm1323_vm7, %v1260_v52, %v1324_v47  ;;  %v1330_v57 = vld [vmem:[#allocation3 + $0x14] sm:$0xff]  ;;  %vm9238_vm5 = vmmov %vm9237_vm2 }
 0x2ed   : > { %v1271_v51 = vsel %vm1261_vm12, %v1270_v55, %v1254_v48  ;;  %1326 = vst [vmem:[#allocation3 + $0x38] sm:$0x1] %v1325_v56  ;;  %v8480_v58 = vcombine.high %v1288_v22, %v1330_v57  ;;  %v8482_v59 = vcombine.low %v1288_v22, %v1330_v57  ;;  %v6581_v11 = vcombine.high %v3689_v8, %v1330_v57  ;;  %v7162_v48 = vld [vmem:[#allocation12 + $0x6cc] ss:$16 sps:$4 sm:$0xff]  }
 0x2ee   : > { %v1320_v60 = vsel %vm1318_vm6, %v1271_v51, %v1319_v53  ;;  %v1477_v61 = vld [vmem:[#allocation3 + $0x28] sm:$0x11]  ;;  %v1698_v15 = vshll.u32 %v8486_v2, 16  ;;  %v6580_v19 = vcombine.low %v3689_v8, %v1330_v57  ;;  %v1696_v46 = vshrl.u32 %v8486_v2, 16  ;;  %v7156_v57 = vld [vmem:[#allocation12 + $0x6c0] ss:$16 sps:$4 sm:$0xff]  }
 0x2ef   : > { %1321 = vst [vmem:[#allocation3 + $0x30] sm:$0x11] %v1320_v60  ;;  %v6284_v62 = vcombine.high %v1477_v61, %v1477_v61  ;;  %v1674_v63 = vshll.u32 %v8480_v58, 16  ;;  %v6283_v1 = vcombine.low %v1477_v61, %v1477_v61  ;;  %v1662_v3 = vshll.u32 %v8482_v59, 16 }
 0x2f0   : > { %v1672_v4 = vshrl.u32 %v8480_v58, 16  ;;  %v1660_v9 = vshrl.u32 %v8482_v59, 16  ;;  %v8494_v25 = vld [vmem:[#allocation3 + $0x24] sm:$0xf]  ;;  %v3853_v26 = vrot.slane %v6581_v11, 1  ;;  %v1700_v29 = vrot.slane %v1698_v15, 1 }
 0x2f1   : > { %v1676_v5 = vrot.slane %v1674_v63, 1  ;;  %v1679_v6 = vshll.u32 %v6284_v62, 16  ;;  %v1667_v7 = vshll.u32 %v6283_v1, 16  ;;  %v1664_v10 = vrot.slane %v1662_v3, 1  ;;  %v3691_v44 = vld [vmem:[#allocation3 + $0x10] sm:$0xe] }
 0x2f2   : > { %v3854_v27 = vrot.slane %v6284_v62, 1  ;;  %v3690_v36 = vld [vmem:[#allocation3 + $0x8] sm:$0xee]  ;;  %v3850_v41 = vrot.slane %v6580_v19, 1  ;;  %v3851_v42 = vrot.slane %v6283_v1, 1  ;;  %v6584_v56 = vcombine.low %v3691_v44, %v8494_v25 }
 0x2f3   : > { %v1677_v12 = vor.u32 %v1676_v5, %v1672_v4  ;;  %v1681_v13 = vrot.slane %v1679_v6, 1  ;;  %v1669_v14 = vrot.slane %v1667_v7, 1  ;;  %v1665_v18 = vor.u32 %v1664_v10, %v1660_v9  ;;  %v7160_v62 = vld [vmem:[#allocation12 + $0x6c8] ss:$16 sps:$4 sm:$0xff]   ;;  %v7165_v5 = vld [vmem:[#allocation12 + $0x6e4] ss:$16 sps:$4 sm:$0xff]  }
 0x2f4   : > { %v8498_v31 = vld [vmem:[#allocation3 + $0x38] ss:$0 sps:$4 sm:$0x11]   ;;  %v8501_v40 = vsel %vm9237_vm2, %v3853_v26, %v3854_v27  ;;  %v6583_v43 = vcombine.high %v3690_v36, %v8469_v50  ;;  %v6582_v49 = vcombine.low %v3690_v36, %v8469_v50  ;;  %v8507_v52 = vsel %vm9238_vm5, %v3850_v41, %v3851_v42  ;;  %v7168_v6 = vld [vmem:[#allocation12 + $0x6ec] ss:$16 sps:$4 sm:$0xff]  }
 0x2f5   : > { %v1682_v0 = vsel %vm480_vm11, %v1677_v12, %v1681_v13  ;;  %v1670_v22 = vsel %vm480_vm11, %v1665_v18, %v1669_v14  ;;  %v1701_v51 = vor.u32 %v1700_v29, %v1696_v46  ;;  %v3862_v50 = vrot.slane %v6584_v56, 1  ;;  %v7163_v9 = vld [vmem:[#allocation12 + $0x6e0] ss:$16 sps:$4 sm:$0xff]   ;;  %v7166_v10 = vld [vmem:[#allocation12 + $0x6e8] ss:$16 sps:$4 sm:$0xff]  }
 0x2f6   : > { %2479 = vmatprep.mubr.bf16.mxu0 %v1682_v0  ;;  %2608 = vmatprep.mubr.bf16.mxu1 %v1682_v0  ;;  %v1478_v24 = vld [vmem:[#allocation3 + $0x30] sm:$0x11]  ;;  %v3859_v53 = vrot.slane %v6583_v43, 1  ;;  %v3856_v61 = vrot.slane %v6582_v49, 1  ;;  %v3863_v3 = vrot.slane %v8498_v31, 1 }
 0x2f7   : > { %2480 = vmatmul.mubr.bf16.vlgmr.msra.gmra.mrb[4].mxu0 %v1670_v22  ;;  %2609 = vmatmul.mubr.bf16.vlgmr.msra.gmra.mrb[4].mxu1 %v1670_v22  ;;  %v6286_v28 = vcombine.high %v1478_v24, %v1478_v24  ;;  %v8496_v30 = vcombine.low %v1478_v24, %v1478_v24  ;;  %v7171_v11 = vld [vmem:[#allocation12 + $0x704] ss:$16 sps:$4 sm:$0xff]   ;;  %v7174_v12 = vld [vmem:[#allocation12 + $0x70c] ss:$16 sps:$4 sm:$0xff]   ;;  %v7169_v13 = vld [vmem:[#allocation12 + $0x700] ss:$16 sps:$4 sm:$0xff]  }
 0x2f8   : > { %2491 = vmatpush1.bf16.msra.mxu0 %v7143_v16  ;;  %2620 = vmatpush1.bf16.msra.mxu1 %v7146_v17  ;;  %v8520_v8 = vsel %vm9241_vm4, %v3862_v50, %v3863_v3  ;;  %v7172_v14 = vld [vmem:[#allocation12 + $0x708] ss:$16 sps:$4 sm:$0xff]   ;;  %v7177_v15 = vld [vmem:[#allocation12 + $0x724] ss:$16 sps:$4 sm:$0xff]   ;;  %v7180_v16 = vld [vmem:[#allocation12 + $0x72c] ss:$16 sps:$4 sm:$0xff]  }
 0x2f9   : > { %2492 = vmatprep.subr.bf16.mxu0 %v7152_v20  ;;  %2621 = vmatprep.subr.bf16.mxu1 %v7155_v21  ;;  %v1703_v47 = vshll.u32 %v6286_v28, 16  ;;  %v3860_v55 = vrot.slane %v6286_v28, 1  ;;  %v3857_v1 = vrot.slane %v8496_v30, 1  ;;  %v7175_v17 = vld [vmem:[#allocation12 + $0x720] ss:$16 sps:$4 sm:$0xff]  }
 0x2fa   : > { %v7178_v18 = vld [vmem:[#allocation12 + $0x728] ss:$16 sps:$4 sm:$0xff]   ;;  %v7183_v19 = vld [vmem:[#allocation12 + $0x744] ss:$16 sps:$4 sm:$0xff]   ;;  %v7186_v0 = vld [vmem:[#allocation12 + $0x74c] ss:$16 sps:$4 sm:$0xff]  }
 0x2fb   : > { %v1705_v60 = vrot.slane %v1703_v47, 1  ;;  %v8511_v63 = vsel %vm9239_vm13, %v3859_v53, %v3860_v55  ;;  %v8517_v7 = vsel %vm9240_vm3, %v3856_v61, %v3857_v1  ;;  %v7181_v20 = vld [vmem:[#allocation12 + $0x740] ss:$16 sps:$4 sm:$0xff]   ;;  %v7184_v21 = vld [vmem:[#allocation12 + $0x748] ss:$16 sps:$4 sm:$0xff]  }
 0x2fc   : > { %2493 = vmatpush1.bf16.msra.mxu0 %v7150_v23  ;;  %2622 = vmatpush1.bf16.msra.mxu1 %v7153_v39  ;;  %v7189_v22 = vld [vmem:[#allocation12 + $0x764] ss:$16 sps:$4 sm:$0xff]   ;;  %v7192_v23 = vld [vmem:[#allocation12 + $0x76c] ss:$16 sps:$4 sm:$0xff]   ;;  %v7187_v24 = vld [vmem:[#allocation12 + $0x760] ss:$16 sps:$4 sm:$0xff]  }
 0x2fd   : > { %2494 = vmatprep.subr.bf16.mxu0 %v7158_v45  ;;  %v1706_v4 = vsel %vm480_vm11, %v1701_v51, %v1705_v60  ;;  %2623 = vmatprep.subr.bf16.mxu1 %v7162_v48  ;;  %v7190_v26 = vld [vmem:[#allocation12 + $0x768] ss:$16 sps:$4 sm:$0xff]   ;;  %v7195_v27 = vld [vmem:[#allocation12 + $0x784] ss:$16 sps:$4 sm:$0xff]   ;;  %v7198_v28 = vld [vmem:[#allocation12 + $0x78c] ss:$16 sps:$4 sm:$0xff]  }
 0x2fe   : > { %2522 = vmatprep.mubr.bf16.mxu0 %v1706_v4  ;;  %2651 = vmatprep.mubr.bf16.mxu1 %v1706_v4  ;;  %v7193_v29 = vld [vmem:[#allocation12 + $0x780] ss:$16 sps:$4 sm:$0xff]   ;;  %v7196_v36 = vld [vmem:[#allocation12 + $0x788] ss:$16 sps:$4 sm:$0xff]   ;;  %v7201_v39 = vld [vmem:[#allocation12 + $0x7a4] ss:$16 sps:$4 sm:$0xff]  }
 0x2ff   : > { %v7204_v41 = vld [vmem:[#allocation12 + $0x7ac] ss:$16 sps:$4 sm:$0xff]   ;;  %v7199_v42 = vld [vmem:[#allocation12 + $0x7a0] ss:$16 sps:$4 sm:$0xff]   ;;  %v7202_v43 = vld [vmem:[#allocation12 + $0x7a8] ss:$16 sps:$4 sm:$0xff]  }
 0x300   : > { %2495 = vmatpush1.bf16.msra.mxu0 %v7156_v57  ;;  %2624 = vmatpush1.bf16.msra.mxu1 %v7160_v62  ;;  %v7207_v44 = vld [vmem:[#allocation12 + $0x7c4] ss:$16 sps:$4 sm:$0xff]   ;;  %v7210_v45 = vld [vmem:[#allocation12 + $0x7cc] ss:$16 sps:$4 sm:$0xff]   ;;  %v7205_v46 = vld [vmem:[#allocation12 + $0x7c0] ss:$16 sps:$4 sm:$0xff]  }
 0x301   : > { %2496 = vmatprep.subr.bf16.mxu0 %v7165_v5  ;;  %2625 = vmatprep.subr.bf16.mxu1 %v7168_v6  ;;  %v7208_v47 = vld [vmem:[#allocation12 + $0x7c8] ss:$16 sps:$4 sm:$0xff]   ;;  %v7213_v48 = vld [vmem:[#allocation12 + $0x7e4] ss:$16 sps:$4 sm:$0xff]   ;;  %v7216_v49 = vld [vmem:[#allocation12 + $0x7ec] ss:$16 sps:$4 sm:$0xff]  }
 0x302   : > { %v7211_v53 = vld [vmem:[#allocation12 + $0x7e0] ss:$16 sps:$4 sm:$0xff]   ;;  %v7214_v55 = vld [vmem:[#allocation12 + $0x7e8] ss:$16 sps:$4 sm:$0xff]   ;;  %v7219_v56 = vld [vmem:[#allocation12 + $0x804] ss:$16 sps:$4 sm:$0xff]  }
 0x303   : > { %v7222_v57 = vld [vmem:[#allocation12 + $0x80c] ss:$16 sps:$4 sm:$0xff]   ;;  %v7217_v51 = vld [vmem:[#allocation12 + $0x800] ss:$16 sps:$4 sm:$0xff]   ;;  %v7220_v60 = vld [vmem:[#allocation12 + $0x808] ss:$16 sps:$4 sm:$0xff]  }
 0x304   : > { %2497 = vmatpush1.bf16.msra.mxu0 %v7163_v9  ;;  %2626 = vmatpush1.bf16.msra.mxu1 %v7166_v10  ;;  %v7225_v61 = vld [vmem:[#allocation12 + $0x824] ss:$16 sps:$4 sm:$0xff]   ;;  %v7228_v62 = vld [vmem:[#allocation12 + $0x82c] ss:$16 sps:$4 sm:$0xff]   ;;  %v7223_v1 = vld [vmem:[#allocation12 + $0x820] ss:$16 sps:$4 sm:$0xff]  }
 0x305   : > { %2498 = vmatprep.subr.bf16.mxu0 %v7171_v11  ;;  %2627 = vmatprep.subr.bf16.mxu1 %v7174_v12  ;;  %v7226_v50 = vld [vmem:[#allocation12 + $0x828] ss:$16 sps:$4 sm:$0xff]   ;;  %v7231_v3 = vld [vmem:[#allocation12 + $0x844] ss:$16 sps:$4 sm:$0xff]   ;;  %v7234_v4 = vld [vmem:[#allocation12 + $0x84c] ss:$16 sps:$4 sm:$0xff]  }
 0x306   : > { %v7229_v5 = vld [vmem:[#allocation12 + $0x840] ss:$16 sps:$4 sm:$0xff]   ;;  %v7232_v6 = vld [vmem:[#allocation12 + $0x848] ss:$16 sps:$4 sm:$0xff]   ;;  %v1686_v9 = vshll.u32 %v8476_v54, 16  ;;  %v1691_v12 = vshll.u32 %v8496_v30, 16 }
 0x307   : > { %v7237_v10 = vld [vmem:[#allocation12 + $0x864] ss:$16 sps:$4 sm:$0xff]   ;;  %v7240_v11 = vld [vmem:[#allocation12 + $0x86c] ss:$16 sps:$4 sm:$0xff]  }
 0x308   : > { %2499 = vmatpush1.bf16.msra.mxu0 %v7169_v13  ;;  %2628 = vmatpush1.bf16.msra.mxu1 %v7172_v14  ;;  %v7235_v13 = vld [vmem:[#allocation12 + $0x860] ss:$16 sps:$4 sm:$0xff]   ;;  %v7238_v14 = vld [vmem:[#allocation12 + $0x868] ss:$16 sps:$4 sm:$0xff]   ;;  %v7250_v30 = vld [vmem:[#allocation12 + $0x8a4] ss:$16 sps:$4 sm:$0xff]  }
 0x309   : > { %2500 = vmatprep.subr.bf16.mxu0 %v7177_v15  ;;  %2629 = vmatprep.subr.bf16.mxu1 %v7180_v16  ;;  %v1688_v15 = vrot.slane %v1686_v9, 1  ;;  %v7244_v16 = vld [vmem:[#allocation12 + $0x884] ss:$16 sps:$4 sm:$0xff]   ;;  %v7291_v9 = vld [vmem:[#allocation12 + $0x6c] ss:$16 sps:$4 sm:$0xff]  }
 0x30c   : > { %2501 = vmatpush1.bf16.msra.mxu0 %v7175_v17  ;;  %2630 = vmatpush1.bf16.msra.mxu1 %v7178_v18  ;;  %v7247_v17 = vld [vmem:[#allocation12 + $0x88c] ss:$16 sps:$4 sm:$0xff]   ;;  %v1684_v18 = vshrl.u32 %v8476_v54, 16 }
 0x30d   : > { %2502 = vmatprep.subr.bf16.mxu0 %v7183_v19  ;;  %2631 = vmatprep.subr.bf16.mxu1 %v7186_v0  ;;  %v1693_v19 = vrot.slane %v1691_v12, 1  ;;  %v1329_v0 = vld [vmem:[#allocation3 + $0x10] sm:$0xf]  ;;  %v7294_v12 = vld [vmem:[#allocation12 + $0x84] ss:$16 sps:$4 sm:$0xff]  }
 0x310   : > { %2503 = vmatpush1.bf16.msra.mxu0 %v7181_v20  ;;  %2632 = vmatpush1.bf16.msra.mxu1 %v7184_v21  ;;  %v1689_v20 = vor.u32 %v1688_v15, %v1684_v18  ;;  %v7242_v21 = vld [vmem:[#allocation12 + $0x880] ss:$16 sps:$4 sm:$0xff]   ;;  %v7300_v15 = vld [vmem:[#allocation12 + $0xa4] ss:$16 sps:$4 sm:$0xff]   ;;  %v7301_v18 = vld [vmem:[#allocation12 + $0xa8] ss:$16 sps:$4 sm:$0xff]  }
 0x311   : > { %2504 = vmatprep.subr.bf16.mxu0 %v7189_v22  ;;  %2633 = vmatprep.subr.bf16.mxu1 %v7192_v23  ;;  %v7245_v22 = vld [vmem:[#allocation12 + $0x888] ss:$16 sps:$4 sm:$0xff]   ;;  %v7253_v23 = vld [vmem:[#allocation12 + $0x8ac] ss:$16 sps:$4 sm:$0xff]  }
 0x314   : > { %2505 = vmatpush1.bf16.msra.mxu0 %v7187_v24  ;;  %2634 = vmatpush1.bf16.msra.mxu1 %v7190_v26  ;;  %v1694_v24 = vsel %vm480_vm11, %v1689_v20, %v1693_v19  ;;  %v8527_v26 = vcombine.low %v1329_v0, %v8494_v25  ;;  %v7254_v25 = vld [vmem:[#allocation12 + $0x8c0] ss:$16 sps:$4 sm:$0xff]   ;;  %v7306_v19 = vld [vmem:[#allocation12 + $0xc4] ss:$16 sps:$4 sm:$0xff]   ;;  %v7309_v0 = vld [vmem:[#allocation12 + $0xcc] ss:$16 sps:$4 sm:$0xff]  }
 0x315   : > { %2506 = vmatprep.subr.bf16.mxu0 %v7195_v27  ;;  %2635 = vmatprep.subr.bf16.mxu1 %v7198_v28  ;;  %v7248_v27 = vld [vmem:[#allocation12 + $0x8a0] ss:$16 sps:$4 sm:$0xff]   ;;  %v7251_v28 = vld [vmem:[#allocation12 + $0x8a8] ss:$16 sps:$4 sm:$0xff]  }
 0x316   : > { %v7304_v20 = vld [vmem:[#allocation12 + $0xc0] ss:$16 sps:$4 sm:$0xff]  }
 0x318   : > { %2507 = vmatpush1.bf16.msra.mxu0 %v7193_v29  ;;  %2636 = vmatpush1.bf16.msra.mxu1 %v7196_v36  ;;  %v7256_v29 = vld [vmem:[#allocation12 + $0x8c4] ss:$16 sps:$4 sm:$0xff]   ;;  %v7259_v36 = vld [vmem:[#allocation12 + $0x8cc] ss:$16 sps:$4 sm:$0xff]  }
 0x319   : > { %2508 = vmatprep.subr.bf16.mxu0 %v7201_v39  ;;  %2637 = vmatprep.subr.bf16.mxu1 %v7204_v41  ;;  %v1710_v39 = vshll.u32 %v8527_v26, 16  ;;  %v7257_v41 = vld [vmem:[#allocation12 + $0x8c8] ss:$16 sps:$4 sm:$0xff]  }
 0x31c   : > { %2509 = vmatpush1.bf16.msra.mxu0 %v7199_v42  ;;  %2638 = vmatpush1.bf16.msra.mxu1 %v7202_v43  ;;  %v7262_v42 = vld [vmem:[#allocation12 + $0x8e4] ss:$16 sps:$4 sm:$0xff]   ;;  %v7265_v43 = vld [vmem:[#allocation12 + $0x8ec] ss:$16 sps:$4 sm:$0xff]  }
 0x31d   : > { %2510 = vmatprep.subr.bf16.mxu0 %v7207_v44  ;;  %2639 = vmatprep.subr.bf16.mxu1 %v7210_v45  ;;  %v1712_v44 = vrot.slane %v1710_v39, 1  ;;  %v1715_v45 = vshll.u32 %v8498_v31, 16  ;;  %v7324_v39 = vld [vmem:[#allocation12 + $0x124] ss:$16 sps:$4 sm:$0xff]  }
 0x320   : > { %2511 = vmatpush1.bf16.msra.mxu0 %v7205_v46  ;;  %2640 = vmatpush1.bf16.msra.mxu1 %v7208_v47  ;;  %v7260_v46 = vld [vmem:[#allocation12 + $0x8e0] ss:$16 sps:$4 sm:$0xff]   ;;  %v7263_v47 = vld [vmem:[#allocation12 + $0x8e8] ss:$16 sps:$4 sm:$0xff]  }
 0x321   : > { %2512 = vmatprep.subr.bf16.mxu0 %v7213_v48  ;;  %2641 = vmatprep.subr.bf16.mxu1 %v7216_v49  ;;  %v1708_v48 = vshrl.u32 %v8527_v26, 16  ;;  %v7270_v49 = vld [vmem:[#allocation12 + $0x4] ss:$16 sps:$4 sm:$0xff]  }
 0x324   : > { %2513 = vmatpush1.bf16.msra.mxu0 %v7211_v53  ;;  %2642 = vmatpush1.bf16.msra.mxu1 %v7214_v55  ;;  %v7273_v53 = vld [vmem:[#allocation12 + $0xc] ss:$16 sps:$4 sm:$0xff]   ;;  %v1713_v55 = vor.u32 %v1712_v44, %v1708_v48 }
 0x325   : > { %2514 = vmatprep.subr.bf16.mxu0 %v7219_v56  ;;  %2643 = vmatprep.subr.bf16.mxu1 %v7222_v57  ;;  %v1717_v56 = vrot.slane %v1715_v45, 1  ;;  %v7268_v57 = vld [vmem:[#allocation12] ss:$16 sps:$4 sm:$0xff]   ;;  %v7333_v44 = vld [vmem:[#allocation12 + $0x14c] ss:$16 sps:$4 sm:$0xff]  }
 0x326   : > { %v7328_v45 = vld [vmem:[#allocation12 + $0x140] ss:$16 sps:$4 sm:$0xff]   ;;  %v7339_v48 = vld [vmem:[#allocation12 + $0x16c] ss:$16 sps:$4 sm:$0xff]  }
 0x327   : > { %v1718_v31 = vsel %vm480_vm11, %v1713_v55, %v1717_v56  ;;  %v7342_v55 = vld [vmem:[#allocation12 + $0x184] ss:$16 sps:$4 sm:$0xff]   ;;  %v7345_v56 = vld [vmem:[#allocation12 + $0x18c] ss:$16 sps:$4 sm:$0xff]   ;;  %vm5131_vm11 = vcmask 1041409  }
 0x328   : > { %2515 = vmatpush1.bf16.msra.mxu0 %v7217_v51  ;;  %2644 = vmatpush1.bf16.msra.mxu1 %v7220_v60  ;;  %v7271_v51 = vld [vmem:[#allocation12 + $0x8] ss:$16 sps:$4 sm:$0xff]   ;;  %v7276_v60 = vld [vmem:[#allocation12 + $0x24] ss:$16 sps:$4 sm:$0xff]  }
 0x329   : > { %2516 = vmatprep.subr.bf16.mxu0 %v7225_v61  ;;  %2645 = vmatprep.subr.bf16.mxu1 %v7228_v62  ;;  %v7279_v61 = vld [vmem:[#allocation12 + $0x2c] ss:$16 sps:$4 sm:$0xff]   ;;  %v7274_v62 = vld [vmem:[#allocation12 + $0x20] ss:$16 sps:$4 sm:$0xff]  }
 0x32c   : > { %2517 = vmatpush1.bf16.msra.mxu0 %v7223_v1  ;;  %2646 = vmatpush1.bf16.msra.mxu1 %v7226_v50  ;;  %v7277_v1 = vld [vmem:[#allocation12 + $0x28] ss:$16 sps:$4 sm:$0xff]   ;;  %v7282_v50 = vld [vmem:[#allocation12 + $0x44] ss:$16 sps:$4 sm:$0xff]  }
 0x32d   : > { %2518 = vmatprep.subr.bf16.mxu0 %v7231_v3  ;;  %2647 = vmatprep.subr.bf16.mxu1 %v7234_v4  ;;  %v7285_v3 = vld [vmem:[#allocation12 + $0x4c] ss:$16 sps:$4 sm:$0xff]   ;;  %v7280_v4 = vld [vmem:[#allocation12 + $0x40] ss:$16 sps:$4 sm:$0xff]  }
 0x330   : > { %2519 = vmatpush1.bf16.msra.mxu0 %v7229_v5  ;;  %2648 = vmatpush1.bf16.msra.mxu1 %v7232_v6  ;;  %v7283_v5 = vld [vmem:[#allocation12 + $0x48] ss:$16 sps:$4 sm:$0xff]   ;;  %v7288_v6 = vld [vmem:[#allocation12 + $0x64] ss:$16 sps:$4 sm:$0xff]  }
 0x331   : > { %2520 = vmatprep.subr.bf16.mxu0 %v7237_v10  ;;  %2649 = vmatprep.subr.bf16.mxu1 %v7240_v11  ;;  %v7286_v10 = vld [vmem:[#allocation12 + $0x60] ss:$16 sps:$4 sm:$0xff]   ;;  %v7289_v11 = vld [vmem:[#allocation12 + $0x68] ss:$16 sps:$4 sm:$0xff]  }
 0x334   : > { %2521 = vmatpush1.bf16.msra.mxu0 %v7235_v13  ;;  %2650 = vmatpush1.bf16.msra.mxu1 %v7238_v14  ;;  %v7292_v13 = vld [vmem:[#allocation12 + $0x80] ss:$16 sps:$4 sm:$0xff]   ;;  %v7295_v14 = vld [vmem:[#allocation12 + $0x88] ss:$16 sps:$4 sm:$0xff]  }
 0x335   : > { %2533 = vmatprep.subr.bf16.mxu0 %v7244_v16  ;;  %2662 = vmatprep.subr.bf16.mxu1 %v7247_v17  ;;  %v7303_v16 = vld [vmem:[#allocation12 + $0xac] ss:$16 sps:$4 sm:$0xff]   ;;  %v7298_v17 = vld [vmem:[#allocation12 + $0xa0] ss:$16 sps:$4 sm:$0xff]  }
 0x337   : > { %2523 = vmatmul.mubr.bf16.vlgmr.msra.gmra.mrb[4].mxu0 %v1694_v24  ;;  %2652 = vmatmul.mubr.bf16.vlgmr.msra.gmra.mrb[4].mxu1 %v1694_v24  ;;  %v7313_v24 = vld [vmem:[#allocation12 + $0xe8] ss:$16 sps:$4 sm:$0xff]  }
 0x338   : > { %2534 = vmatpush1.bf16.msra.mxu0 %v7242_v21  ;;  %2663 = vmatpush1.bf16.msra.mxu1 %v7245_v22  ;;  %v7307_v21 = vld [vmem:[#allocation12 + $0xc8] ss:$16 sps:$4 sm:$0xff]   ;;  %v7312_v22 = vld [vmem:[#allocation12 + $0xe4] ss:$16 sps:$4 sm:$0xff]  }
 0x339   : > { %2535 = vmatprep.subr.bf16.mxu0 %v7250_v30  ;;  %2664 = vmatprep.subr.bf16.mxu1 %v7253_v23  ;;  %v7315_v30 = vld [vmem:[#allocation12 + $0xec] ss:$16 sps:$4 sm:$0xff]   ;;  %v7310_v23 = vld [vmem:[#allocation12 + $0xe0] ss:$16 sps:$4 sm:$0xff]  }
 0x33a   : > { %2565 = vmatprep.mubr.bf16.mxu0 %v8369_v32  ;;  %2694 = vmatprep.mubr.bf16.mxu1 %v8369_v32 }
 0x33c   : > { %2536 = vmatpush1.bf16.msra.mxu0 %v7248_v27  ;;  %2665 = vmatpush1.bf16.msra.mxu1 %v7251_v28  ;;  %v7318_v27 = vld [vmem:[#allocation12 + $0x104] ss:$16 sps:$4 sm:$0xff]   ;;  %v7321_v28 = vld [vmem:[#allocation12 + $0x10c] ss:$16 sps:$4 sm:$0xff]  }
 0x33d   : > { %2537 = vmatprep.subr.bf16.mxu0 %v7256_v29  ;;  %2666 = vmatprep.subr.bf16.mxu1 %v7259_v36  ;;  %v7316_v29 = vld [vmem:[#allocation12 + $0x100] ss:$16 sps:$4 sm:$0xff]   ;;  %v7319_v36 = vld [vmem:[#allocation12 + $0x108] ss:$16 sps:$4 sm:$0xff]  }
 0x340   : > { %2538 = vmatpush1.bf16.msra.mxu0 %v7254_v25  ;;  %2667 = vmatpush1.bf16.msra.mxu1 %v7257_v41  ;;  %v7327_v25 = vld [vmem:[#allocation12 + $0x12c] ss:$16 sps:$4 sm:$0xff]   ;;  %v7322_v41 = vld [vmem:[#allocation12 + $0x120] ss:$16 sps:$4 sm:$0xff]  }
 0x341   : > { %2539 = vmatprep.subr.bf16.mxu0 %v7262_v42  ;;  %2668 = vmatprep.subr.bf16.mxu1 %v7265_v43  ;;  %v7325_v42 = vld [vmem:[#allocation12 + $0x128] ss:$16 sps:$4 sm:$0xff]   ;;  %v7330_v43 = vld [vmem:[#allocation12 + $0x144] ss:$16 sps:$4 sm:$0xff]  }
 0x344   : > { %2540 = vmatpush1.bf16.msra.mxu0 %v7260_v46  ;;  %2669 = vmatpush1.bf16.msra.mxu1 %v7263_v47  ;;  %v7331_v46 = vld [vmem:[#allocation12 + $0x148] ss:$16 sps:$4 sm:$0xff]   ;;  %v7336_v47 = vld [vmem:[#allocation12 + $0x164] ss:$16 sps:$4 sm:$0xff]  }
 0x345   : > { %3431 = vmatprep.subr.bf16.mxu0 %v7270_v49  ;;  %3560 = vmatprep.subr.bf16.mxu1 %v7273_v53  ;;  %v7334_v49 = vld [vmem:[#allocation12 + $0x160] ss:$16 sps:$4 sm:$0xff]   ;;  %v7337_v53 = vld [vmem:[#allocation12 + $0x168] ss:$16 sps:$4 sm:$0xff]  }
 0x347   : > { %6432 = vmatmul.mubr.msk.bf16.vlgmr.msra.gmra.mrb[4].mxu0 %vm2443_vm8, %v1718_v31  ;;  %6433 = vmatmul.mubr.msk.bf16.vlgmr.msra.gmra.mrb[4].mxu1 %vm2443_vm8, %v1718_v31  ;;  %v7348_v31 = vld [vmem:[#allocation12 + $0x1a4] ss:$16 sps:$4 sm:$0xff]  }
 0x348   : > { %3432 = vmatpush1.bf16.msra.mxu0 %v7268_v57  ;;  %3463 = vmatprep.mubr.bf16.mxu0 %v8480_v58  ;;  %v7340_v57 = vld [vmem:[#allocation12 + $0x180] ss:$16 sps:$4 sm:$0xff]  }
 0x349   : > { %3561 = vmatpush1.bf16.msra.mxu1 %v7271_v51  ;;  %3592 = vmatprep.mubr.bf16.mxu1 %v8480_v58  ;;  %v7297_v58 = vld [vmem:[#allocation12 + $0x8c] ss:$16 sps:$4 sm:$0xff]   ;;  %v7343_v51 = vld [vmem:[#allocation12 + $0x188] ss:$16 sps:$4 sm:$0xff]  }
 0x34a   : > { %3433 = vmatprep.subr.bf16.mxu0 %v7276_v60  ;;  %3562 = vmatprep.subr.bf16.mxu1 %v7279_v61  ;;  %v7351_v60 = vld [vmem:[#allocation12 + $0x1ac] ss:$16 sps:$4 sm:$0xff]   ;;  %v7346_v61 = vld [vmem:[#allocation12 + $0x1a0] ss:$16 sps:$4 sm:$0xff]  }
 0x34c   : > { %3434 = vmatpush1.bf16.msra.mxu0 %v7274_v62  ;;  %v7349_v62 = vld [vmem:[#allocation12 + $0x1a8] ss:$16 sps:$4 sm:$0xff]  }
 0x34d   : > { %3563 = vmatpush1.bf16.msra.mxu1 %v7277_v1  ;;  %3435 = vmatprep.subr.bf16.mxu0 %v7282_v50  ;;  %v7354_v1 = vld [vmem:[#allocation12 + $0x1c4] ss:$16 sps:$4 sm:$0xff]   ;;  %v7357_v50 = vld [vmem:[#allocation12 + $0x1cc] ss:$16 sps:$4 sm:$0xff]  }
 0x34e   : > { %3564 = vmatprep.subr.bf16.mxu1 %v7285_v3  ;;  %v7352_v3 = vld [vmem:[#allocation12 + $0x1c0] ss:$16 sps:$4 sm:$0xff]  }
 0x350   : > { %3436 = vmatpush1.bf16.msra.mxu0 %v7280_v4  ;;  %v7355_v4 = vld [vmem:[#allocation12 + $0x1c8] ss:$16 sps:$4 sm:$0xff]  }
 0x351   : > { %3565 = vmatpush1.bf16.msra.mxu1 %v7283_v5  ;;  %3437 = vmatprep.subr.bf16.mxu0 %v7288_v6  ;;  %v7360_v5 = vld [vmem:[#allocation12 + $0x1e4] ss:$16 sps:$4 sm:$0xff]   ;;  %v7363_v6 = vld [vmem:[#allocation12 + $0x1ec] ss:$16 sps:$4 sm:$0xff]  }
 0x352   : > { %3566 = vmatprep.subr.bf16.mxu1 %v7291_v9  ;;  %v7358_v9 = vld [vmem:[#allocation12 + $0x1e0] ss:$16 sps:$4 sm:$0xff]  }
 0x354   : > { %3438 = vmatpush1.bf16.msra.mxu0 %v7286_v10  ;;  %v7361_v10 = vld [vmem:[#allocation12 + $0x1e8] ss:$16 sps:$4 sm:$0xff]  }
 0x355   : > { %3567 = vmatpush1.bf16.msra.mxu1 %v7289_v11  ;;  %3439 = vmatprep.subr.bf16.mxu0 %v7294_v12  ;;  %v7366_v11 = vld [vmem:[#allocation12 + $0x204] ss:$16 sps:$4 sm:$0xff]   ;;  %v7369_v12 = vld [vmem:[#allocation12 + $0x20c] ss:$16 sps:$4 sm:$0xff]  }
 0x356   : > { %3568 = vmatprep.subr.bf16.mxu1 %v7297_v58  ;;  %v7364_v58 = vld [vmem:[#allocation12 + $0x200] ss:$16 sps:$4 sm:$0xff]  }
 0x358   : > { %3440 = vmatpush1.bf16.msra.mxu0 %v7292_v13  ;;  %v7367_v13 = vld [vmem:[#allocation12 + $0x208] ss:$16 sps:$4 sm:$0xff]  }
 0x359   : > { %3569 = vmatpush1.bf16.msra.mxu1 %v7295_v14  ;;  %3441 = vmatprep.subr.bf16.mxu0 %v7300_v15  ;;  %v7372_v14 = vld [vmem:[#allocation12 + $0x224] ss:$16 sps:$4 sm:$0xff]   ;;  %v7375_v15 = vld [vmem:[#allocation12 + $0x22c] ss:$16 sps:$4 sm:$0xff]  }
 0x35a   : > { %3570 = vmatprep.subr.bf16.mxu1 %v7303_v16  ;;  %v7370_v16 = vld [vmem:[#allocation12 + $0x220] ss:$16 sps:$4 sm:$0xff]  }
 0x35c   : > { %3442 = vmatpush1.bf16.msra.mxu0 %v7298_v17  ;;  %v7373_v17 = vld [vmem:[#allocation12 + $0x228] ss:$16 sps:$4 sm:$0xff]  }
 0x35d   : > { %3571 = vmatpush1.bf16.msra.mxu1 %v7301_v18  ;;  %3443 = vmatprep.subr.bf16.mxu0 %v7306_v19  ;;  %v7378_v18 = vld [vmem:[#allocation12 + $0x244] ss:$16 sps:$4 sm:$0xff]   ;;  %v7381_v19 = vld [vmem:[#allocation12 + $0x24c] ss:$16 sps:$4 sm:$0xff]  }
 0x35e   : > { %3572 = vmatprep.subr.bf16.mxu1 %v7309_v0  ;;  %v7376_v0 = vld [vmem:[#allocation12 + $0x240] ss:$16 sps:$4 sm:$0xff]  }
 0x360   : > { %3444 = vmatpush1.bf16.msra.mxu0 %v7304_v20  ;;  %v7379_v20 = vld [vmem:[#allocation12 + $0x248] ss:$16 sps:$4 sm:$0xff]  }
 0x361   : > { %3573 = vmatpush1.bf16.msra.mxu1 %v7307_v21  ;;  %3445 = vmatprep.subr.bf16.mxu0 %v7312_v22  ;;  %v7384_v21 = vld [vmem:[#allocation12 + $0x264] ss:$16 sps:$4 sm:$0xff]   ;;  %v7382_v22 = vld [vmem:[#allocation12 + $0x260] ss:$16 sps:$4 sm:$0xff]  }
 0x362   : > { %3574 = vmatprep.subr.bf16.mxu1 %v7315_v30  ;;  %v7385_v30 = vld [vmem:[#allocation12 + $0x268] ss:$16 sps:$4 sm:$0xff]  }
 0x364   : > { %3446 = vmatpush1.bf16.msra.mxu0 %v7310_v23  ;;  %v7390_v23 = vld [vmem:[#allocation12 + $0x284] ss:$16 sps:$4 sm:$0xff]  }
 0x365   : > { %3575 = vmatpush1.bf16.msra.mxu1 %v7313_v24  ;;  %3447 = vmatprep.subr.bf16.mxu0 %v7318_v27  ;;  %v7393_v24 = vld [vmem:[#allocation12 + $0x28c] ss:$16 sps:$4 sm:$0xff]   ;;  %v7391_v27 = vld [vmem:[#allocation12 + $0x288] ss:$16 sps:$4 sm:$0xff]  }
 0x366   : > { %3576 = vmatprep.subr.bf16.mxu1 %v7321_v28  ;;  %v7396_v28 = vld [vmem:[#allocation12 + $0x2a4] ss:$16 sps:$4 sm:$0xff]  }
 0x368   : > { %3448 = vmatpush1.bf16.msra.mxu0 %v7316_v29  ;;  %v7399_v29 = vld [vmem:[#allocation12 + $0x2ac] ss:$16 sps:$4 sm:$0xff]  }
 0x369   : > { %3577 = vmatpush1.bf16.msra.mxu1 %v7319_v36  ;;  %3449 = vmatprep.subr.bf16.mxu0 %v7324_v39  ;;  %v7394_v36 = vld [vmem:[#allocation12 + $0x2a0] ss:$16 sps:$4 sm:$0xff]   ;;  %v7397_v39 = vld [vmem:[#allocation12 + $0x2a8] ss:$16 sps:$4 sm:$0xff]  }
 0x36a   : > { %3578 = vmatprep.subr.bf16.mxu1 %v7327_v25  ;;  %v7402_v25 = vld [vmem:[#allocation12 + $0x2c4] ss:$16 sps:$4 sm:$0xff]  }
 0x36c   : > { %3450 = vmatpush1.bf16.msra.mxu0 %v7322_v41  ;;  %v7405_v41 = vld [vmem:[#allocation12 + $0x2cc] ss:$16 sps:$4 sm:$0xff]  }
 0x36d   : > { %3579 = vmatpush1.bf16.msra.mxu1 %v7325_v42  ;;  %3451 = vmatprep.subr.bf16.mxu0 %v7330_v43  ;;  %v7400_v42 = vld [vmem:[#allocation12 + $0x2c0] ss:$16 sps:$4 sm:$0xff]   ;;  %v7403_v43 = vld [vmem:[#allocation12 + $0x2c8] ss:$16 sps:$4 sm:$0xff]  }
 0x36e   : > { %3580 = vmatprep.subr.bf16.mxu1 %v7333_v44  ;;  %v7408_v44 = vld [vmem:[#allocation12 + $0x2e4] ss:$16 sps:$4 sm:$0xff]  }
 0x370   : > { %3452 = vmatpush1.bf16.msra.mxu0 %v7328_v45  ;;  %v7411_v45 = vld [vmem:[#allocation12 + $0x2ec] ss:$16 sps:$4 sm:$0xff]  }
 0x371   : > { %3581 = vmatpush1.bf16.msra.mxu1 %v7331_v46  ;;  %3453 = vmatprep.subr.bf16.mxu0 %v7336_v47  ;;  %v7406_v46 = vld [vmem:[#allocation12 + $0x2e0] ss:$16 sps:$4 sm:$0xff]   ;;  %v7409_v47 = vld [vmem:[#allocation12 + $0x2e8] ss:$16 sps:$4 sm:$0xff]  }
 0x372   : > { %3582 = vmatprep.subr.bf16.mxu1 %v7339_v48  ;;  %v7414_v48 = vld [vmem:[#allocation12 + $0x304] ss:$16 sps:$4 sm:$0xff]  }
 0x374   : > { %3454 = vmatpush1.bf16.msra.mxu0 %v7334_v49  ;;  %v7417_v49 = vld [vmem:[#allocation12 + $0x30c] ss:$16 sps:$4 sm:$0xff]  }
 0x375   : > { %3583 = vmatpush1.bf16.msra.mxu1 %v7337_v53  ;;  %3455 = vmatprep.subr.bf16.mxu0 %v7342_v55  ;;  %v7412_v53 = vld [vmem:[#allocation12 + $0x300] ss:$16 sps:$4 sm:$0xff]   ;;  %v7415_v55 = vld [vmem:[#allocation12 + $0x308] ss:$16 sps:$4 sm:$0xff]  }
 0x376   : > { %3584 = vmatprep.subr.bf16.mxu1 %v7345_v56  ;;  %v7420_v56 = vld [vmem:[#allocation12 + $0x324] ss:$16 sps:$4 sm:$0xff]  }
 0x378   : > { %3456 = vmatpush1.bf16.msra.mxu0 %v7340_v57  ;;  %v7423_v57 = vld [vmem:[#allocation12 + $0x32c] ss:$16 sps:$4 sm:$0xff]  }
 0x379   : > { %3585 = vmatpush1.bf16.msra.mxu1 %v7343_v51  ;;  %3457 = vmatprep.subr.bf16.mxu0 %v7348_v31  ;;  %v7418_v51 = vld [vmem:[#allocation12 + $0x320] ss:$16 sps:$4 sm:$0xff]   ;;  %v7421_v31 = vld [vmem:[#allocation12 + $0x328] ss:$16 sps:$4 sm:$0xff]  }
 0x37a   : > { %3586 = vmatprep.subr.bf16.mxu1 %v7351_v60  ;;  %v7426_v60 = vld [vmem:[#allocation12 + $0x344] ss:$16 sps:$4 sm:$0xff]  }
 0x37c   : > { %3458 = vmatpush1.bf16.msra.mxu0 %v7346_v61  ;;  %v7429_v61 = vld [vmem:[#allocation12 + $0x34c] ss:$16 sps:$4 sm:$0xff]  }
 0x37d   : > { %3587 = vmatpush1.bf16.msra.mxu1 %v7349_v62  ;;  %3459 = vmatprep.subr.bf16.mxu0 %v7354_v1  ;;  %v7424_v62 = vld [vmem:[#allocation12 + $0x340] ss:$16 sps:$4 sm:$0xff]   ;;  %v7427_v1 = vld [vmem:[#allocation12 + $0x348] ss:$16 sps:$4 sm:$0xff]  }
 0x37e   : > { %3588 = vmatprep.subr.bf16.mxu1 %v7357_v50  ;;  %v7432_v50 = vld [vmem:[#allocation12 + $0x364] ss:$16 sps:$4 sm:$0xff]  }
 0x380   : > { %3460 = vmatpush1.bf16.msra.mxu0 %v7352_v3  ;;  %v7435_v3 = vld [vmem:[#allocation12 + $0x36c] ss:$16 sps:$4 sm:$0xff]  }
 0x381   : > { %3589 = vmatpush1.bf16.msra.mxu1 %v7355_v4  ;;  %3461 = vmatprep.subr.bf16.mxu0 %v7360_v5  ;;  %v7430_v4 = vld [vmem:[#allocation12 + $0x360] ss:$16 sps:$4 sm:$0xff]   ;;  %v7433_v5 = vld [vmem:[#allocation12 + $0x368] ss:$16 sps:$4 sm:$0xff]  }
 0x382   : > { %3590 = vmatprep.subr.bf16.mxu1 %v7363_v6  ;;  %v7438_v6 = vld [vmem:[#allocation12 + $0x384] ss:$16 sps:$4 sm:$0xff]  }
 0x384   : > { %3462 = vmatpush1.bf16.msra.mxu0 %v7358_v9  ;;  %v7441_v9 = vld [vmem:[#allocation12 + $0x38c] ss:$16 sps:$4 sm:$0xff]  }
 0x385   : > { %3591 = vmatpush1.bf16.msra.mxu1 %v7361_v10  ;;  %3474 = vmatprep.subr.bf16.mxu0 %v7366_v11  ;;  %v7436_v10 = vld [vmem:[#allocation12 + $0x380] ss:$16 sps:$4 sm:$0xff]   ;;  %v7439_v11 = vld [vmem:[#allocation12 + $0x388] ss:$16 sps:$4 sm:$0xff]  }
 0x386   : > { %3603 = vmatprep.subr.bf16.mxu1 %v7369_v12  ;;  %v7444_v12 = vld [vmem:[#allocation12 + $0x3a4] ss:$16 sps:$4 sm:$0xff]  }
 0x387   : > { %3464 = vmatmul.mubr.bf16.vlgmr.msra.gmra.mrb[4].mxu0 %v8482_v59 }
 0x388   : > { %3593 = vmatmul.mubr.bf16.vlgmr.msra.gmra.mrb[4].mxu1 %v8482_v59  ;;  %3475 = vmatpush1.bf16.msra.mxu0 %v7364_v58  ;;  %v7387_v59 = vld [vmem:[#allocation12 + $0x26c] ss:$16 sps:$4 sm:$0xff]  }
 0x389   : > { %3506 = vmatprep.mubr.bf16.mxu0 %v8486_v2  ;;  %3604 = vmatpush1.bf16.msra.mxu1 %v7367_v13  ;;  %v7447_v58 = vld [vmem:[#allocation12 + $0x3ac] ss:$16 sps:$4 sm:$0xff]   ;;  %v7442_v13 = vld [vmem:[#allocation12 + $0x3a0] ss:$16 sps:$4 sm:$0xff]  }
 0x38a   : > { %3635 = vmatprep.mubr.bf16.mxu1 %v8486_v2  ;;  %3476 = vmatprep.subr.bf16.mxu0 %v7372_v14  ;;  %v7388_v2 = vld [vmem:[#allocation12 + $0x280] ss:$16 sps:$4 sm:$0xff]   ;;  %v7445_v14 = vld [vmem:[#allocation12 + $0x3a8] ss:$16 sps:$4 sm:$0xff]  }
 0x38b   : > { %3605 = vmatprep.subr.bf16.mxu1 %v7375_v15  ;;  %v7450_v15 = vld [vmem:[#allocation12 + $0x3c4] ss:$16 sps:$4 sm:$0xff]  }
 0x38c   : > { %3477 = vmatpush1.bf16.msra.mxu0 %v7370_v16  ;;  %v7453_v16 = vld [vmem:[#allocation12 + $0x3cc] ss:$16 sps:$4 sm:$0xff]  }
 0x38d   : > { %3606 = vmatpush1.bf16.msra.mxu1 %v7373_v17  ;;  %3478 = vmatprep.subr.bf16.mxu0 %v7378_v18  ;;  %v7448_v17 = vld [vmem:[#allocation12 + $0x3c0] ss:$16 sps:$4 sm:$0xff]   ;;  %v7451_v18 = vld [vmem:[#allocation12 + $0x3c8] ss:$16 sps:$4 sm:$0xff]  }
 0x38e   : > { %3607 = vmatprep.subr.bf16.mxu1 %v7381_v19  ;;  %v7456_v19 = vld [vmem:[#allocation12 + $0x3e4] ss:$16 sps:$4 sm:$0xff]  }
 0x390   : > { %3479 = vmatpush1.bf16.msra.mxu0 %v7376_v0  ;;  %v7459_v0 = vld [vmem:[#allocation12 + $0x3ec] ss:$16 sps:$4 sm:$0xff]  }
 0x391   : > { %3608 = vmatpush1.bf16.msra.mxu1 %v7379_v20  ;;  %3480 = vmatprep.subr.bf16.mxu0 %v7384_v21  ;;  %v7454_v20 = vld [vmem:[#allocation12 + $0x3e0] ss:$16 sps:$4 sm:$0xff]   ;;  %v7457_v21 = vld [vmem:[#allocation12 + $0x3e8] ss:$16 sps:$4 sm:$0xff]  }
 0x392   : > { %3609 = vmatprep.subr.bf16.mxu1 %v7387_v59  ;;  %v7462_v59 = vld [vmem:[#allocation12 + $0x404] ss:$16 sps:$4 sm:$0xff]  }
 0x394   : > { %3481 = vmatpush1.bf16.msra.mxu0 %v7382_v22  ;;  %v7465_v22 = vld [vmem:[#allocation12 + $0x40c] ss:$16 sps:$4 sm:$0xff]  }
 0x395   : > { %3610 = vmatpush1.bf16.msra.mxu1 %v7385_v30  ;;  %3482 = vmatprep.subr.bf16.mxu0 %v7390_v23  ;;  %v7460_v30 = vld [vmem:[#allocation12 + $0x400] ss:$16 sps:$4 sm:$0xff]   ;;  %v7463_v23 = vld [vmem:[#allocation12 + $0x408] ss:$16 sps:$4 sm:$0xff]  }
 0x396   : > { %3611 = vmatprep.subr.bf16.mxu1 %v7393_v24  ;;  %v7468_v24 = vld [vmem:[#allocation12 + $0x424] ss:$16 sps:$4 sm:$0xff]  }
 0x398   : > { %3483 = vmatpush1.bf16.msra.mxu0 %v7388_v2  ;;  %v7471_v2 = vld [vmem:[#allocation12 + $0x42c] ss:$16 sps:$4 sm:$0xff]  }
 0x399   : > { %3612 = vmatpush1.bf16.msra.mxu1 %v7391_v27  ;;  %3484 = vmatprep.subr.bf16.mxu0 %v7396_v28  ;;  %v7466_v27 = vld [vmem:[#allocation12 + $0x420] ss:$16 sps:$4 sm:$0xff]   ;;  %v7469_v28 = vld [vmem:[#allocation12 + $0x428] ss:$16 sps:$4 sm:$0xff]  }
 0x39a   : > { %3613 = vmatprep.subr.bf16.mxu1 %v7399_v29  ;;  %v7474_v29 = vld [vmem:[#allocation12 + $0x444] ss:$16 sps:$4 sm:$0xff]  }
 0x39c   : > { %3485 = vmatpush1.bf16.msra.mxu0 %v7394_v36  ;;  %v7477_v36 = vld [vmem:[#allocation12 + $0x44c] ss:$16 sps:$4 sm:$0xff]  }
 0x39d   : > { %3614 = vmatpush1.bf16.msra.mxu1 %v7397_v39  ;;  %3486 = vmatprep.subr.bf16.mxu0 %v7402_v25  ;;  %v7472_v39 = vld [vmem:[#allocation12 + $0x440] ss:$16 sps:$4 sm:$0xff]   ;;  %v7475_v25 = vld [vmem:[#allocation12 + $0x448] ss:$16 sps:$4 sm:$0xff]  }
 0x39e   : > { %3615 = vmatprep.subr.bf16.mxu1 %v7405_v41  ;;  %v7480_v41 = vld [vmem:[#allocation12 + $0x464] ss:$16 sps:$4 sm:$0xff]  }
 0x3a0   : > { %3487 = vmatpush1.bf16.msra.mxu0 %v7400_v42  ;;  %v7478_v42 = vld [vmem:[#allocation12 + $0x460] ss:$16 sps:$4 sm:$0xff]  }
 0x3a1   : > { %3616 = vmatpush1.bf16.msra.mxu1 %v7403_v43  ;;  %3488 = vmatprep.subr.bf16.mxu0 %v7408_v44  ;;  %v7481_v43 = vld [vmem:[#allocation12 + $0x468] ss:$16 sps:$4 sm:$0xff]   ;;  %v7486_v44 = vld [vmem:[#allocation12 + $0x904] ss:$16 sps:$4 sm:$0xff]  }
 0x3a2   : > { %3617 = vmatprep.subr.bf16.mxu1 %v7411_v45  ;;  %v7489_v45 = vld [vmem:[#allocation12 + $0x90c] ss:$16 sps:$4 sm:$0xff]  }
 0x3a4   : > { %3489 = vmatpush1.bf16.msra.mxu0 %v7406_v46  ;;  %v7484_v46 = vld [vmem:[#allocation12 + $0x900] ss:$16 sps:$4 sm:$0xff]  }
 0x3a5   : > { %3618 = vmatpush1.bf16.msra.mxu1 %v7409_v47  ;;  %3490 = vmatprep.subr.bf16.mxu0 %v7414_v48  ;;  %v7487_v47 = vld [vmem:[#allocation12 + $0x908] ss:$16 sps:$4 sm:$0xff]   ;;  %v7493_v48 = vld [vmem:[#allocation12 + $0x924] ss:$16 sps:$4 sm:$0xff]  }
 0x3a6   : > { %3619 = vmatprep.subr.bf16.mxu1 %v7417_v49  ;;  %v7496_v49 = vld [vmem:[#allocation12 + $0x92c] ss:$16 sps:$4 sm:$0xff]  }
 0x3a8   : > { %3491 = vmatpush1.bf16.msra.mxu0 %v7412_v53  ;;  %v7491_v53 = vld [vmem:[#allocation12 + $0x920] ss:$16 sps:$4 sm:$0xff]  }
 0x3a9   : > { %3620 = vmatpush1.bf16.msra.mxu1 %v7415_v55  ;;  %3492 = vmatprep.subr.bf16.mxu0 %v7420_v56  ;;  %v7494_v55 = vld [vmem:[#allocation12 + $0x928] ss:$16 sps:$4 sm:$0xff]   ;;  %v7499_v56 = vld [vmem:[#allocation12 + $0x944] ss:$16 sps:$4 sm:$0xff]  }
 0x3aa   : > { %3621 = vmatprep.subr.bf16.mxu1 %v7423_v57  ;;  %v7502_v57 = vld [vmem:[#allocation12 + $0x94c] ss:$16 sps:$4 sm:$0xff]  }
 0x3ac   : > { %3493 = vmatpush1.bf16.msra.mxu0 %v7418_v51  ;;  %v7497_v51 = vld [vmem:[#allocation12 + $0x940] ss:$16 sps:$4 sm:$0xff]  }
 0x3ad   : > { %3622 = vmatpush1.bf16.msra.mxu1 %v7421_v31  ;;  %3494 = vmatprep.subr.bf16.mxu0 %v7426_v60  ;;  %v7500_v31 = vld [vmem:[#allocation12 + $0x948] ss:$16 sps:$4 sm:$0xff]   ;;  %v7505_v60 = vld [vmem:[#allocation12 + $0x964] ss:$16 sps:$4 sm:$0xff]  }
 0x3ae   : > { %3623 = vmatprep.subr.bf16.mxu1 %v7429_v61  ;;  %v7503_v61 = vld [vmem:[#allocation12 + $0x960] ss:$16 sps:$4 sm:$0xff]  }
 0x3b0   : > { %3495 = vmatpush1.bf16.msra.mxu0 %v7424_v62  ;;  %v7506_v62 = vld [vmem:[#allocation12 + $0x968] ss:$16 sps:$4 sm:$0xff]  }
 0x3b1   : > { %3624 = vmatpush1.bf16.msra.mxu1 %v7427_v1  ;;  %3496 = vmatprep.subr.bf16.mxu0 %v7432_v50  ;;  %v7511_v1 = vld [vmem:[#allocation12 + $0x984] ss:$16 sps:$4 sm:$0xff]   ;;  %v7514_v50 = vld [vmem:[#allocation12 + $0x98c] ss:$16 sps:$4 sm:$0xff]  }
 0x3b2   : > { %3625 = vmatprep.subr.bf16.mxu1 %v7435_v3  ;;  %v7512_v3 = vld [vmem:[#allocation12 + $0x988] ss:$16 sps:$4 sm:$0xff]  }
 0x3b4   : > { %3497 = vmatpush1.bf16.msra.mxu0 %v7430_v4  ;;  %v7517_v4 = vld [vmem:[#allocation12 + $0x9a4] ss:$16 sps:$4 sm:$0xff]  }
 0x3b5   : > { %3626 = vmatpush1.bf16.msra.mxu1 %v7433_v5  ;;  %3498 = vmatprep.subr.bf16.mxu0 %v7438_v6  ;;  %v7520_v5 = vld [vmem:[#allocation12 + $0x9ac] ss:$16 sps:$4 sm:$0xff]   ;;  %v7515_v6 = vld [vmem:[#allocation12 + $0x9a0] ss:$16 sps:$4 sm:$0xff]  }
 0x3b6   : > { %3627 = vmatprep.subr.bf16.mxu1 %v7441_v9  ;;  %v7518_v9 = vld [vmem:[#allocation12 + $0x9a8] ss:$16 sps:$4 sm:$0xff]  }
 0x3b8   : > { %3499 = vmatpush1.bf16.msra.mxu0 %v7436_v10  ;;  %v7523_v10 = vld [vmem:[#allocation12 + $0x9c4] ss:$16 sps:$4 sm:$0xff]  }
 0x3b9   : > { %3628 = vmatpush1.bf16.msra.mxu1 %v7439_v11  ;;  %3500 = vmatprep.subr.bf16.mxu0 %v7444_v12  ;;  %v7526_v11 = vld [vmem:[#allocation12 + $0x9cc] ss:$16 sps:$4 sm:$0xff]   ;;  %v7521_v12 = vld [vmem:[#allocation12 + $0x9c0] ss:$16 sps:$4 sm:$0xff]  }
 0x3ba   : > { %3629 = vmatprep.subr.bf16.mxu1 %v7447_v58  ;;  %v7524_v58 = vld [vmem:[#allocation12 + $0x9c8] ss:$16 sps:$4 sm:$0xff]  }
 0x3bc   : > { %3501 = vmatpush1.bf16.msra.mxu0 %v7442_v13  ;;  %v7529_v13 = vld [vmem:[#allocation12 + $0x9e4] ss:$16 sps:$4 sm:$0xff]  }
 0x3bd   : > { %3630 = vmatpush1.bf16.msra.mxu1 %v7445_v14  ;;  %3502 = vmatprep.subr.bf16.mxu0 %v7450_v15  ;;  %v7532_v14 = vld [vmem:[#allocation12 + $0x9ec] ss:$16 sps:$4 sm:$0xff]   ;;  %v7527_v15 = vld [vmem:[#allocation12 + $0x9e0] ss:$16 sps:$4 sm:$0xff]  }
 0x3be   : > { %3631 = vmatprep.subr.bf16.mxu1 %v7453_v16  ;;  %v7530_v16 = vld [vmem:[#allocation12 + $0x9e8] ss:$16 sps:$4 sm:$0xff]  }
 0x3c0   : > { %3503 = vmatpush1.bf16.msra.mxu0 %v7448_v17  ;;  %v7535_v17 = vld [vmem:[#allocation12 + $0xa04] ss:$16 sps:$4 sm:$0xff]  }
 0x3c1   : > { %3632 = vmatpush1.bf16.msra.mxu1 %v7451_v18  ;;  %3504 = vmatprep.subr.bf16.mxu0 %v7456_v19  ;;  %v7538_v18 = vld [vmem:[#allocation12 + $0xa0c] ss:$16 sps:$4 sm:$0xff]   ;;  %v7533_v19 = vld [vmem:[#allocation12 + $0xa00] ss:$16 sps:$4 sm:$0xff]  }
 0x3c2   : > { %3633 = vmatprep.subr.bf16.mxu1 %v7459_v0  ;;  %v7536_v0 = vld [vmem:[#allocation12 + $0xa08] ss:$16 sps:$4 sm:$0xff]  }
 0x3c4   : > { %3505 = vmatpush1.bf16.msra.mxu0 %v7454_v20  ;;  %v7541_v20 = vld [vmem:[#allocation12 + $0xa24] ss:$16 sps:$4 sm:$0xff]  }
 0x3c5   : > { %3634 = vmatpush1.bf16.msra.mxu1 %v7457_v21  ;;  %3517 = vmatprep.subr.bf16.mxu0 %v7462_v59  ;;  %v7544_v21 = vld [vmem:[#allocation12 + $0xa2c] ss:$16 sps:$4 sm:$0xff]   ;;  %v7539_v59 = vld [vmem:[#allocation12 + $0xa20] ss:$16 sps:$4 sm:$0xff]  }
 0x3c6   : > { %3646 = vmatprep.subr.bf16.mxu1 %v7465_v22  ;;  %v7542_v22 = vld [vmem:[#allocation12 + $0xa28] ss:$16 sps:$4 sm:$0xff]  }
 0x3c7   : > { %3507 = vmatmul.mubr.bf16.vlgmr.msra.gmra.mrb[4].mxu0 %v8476_v54 }
 0x3c8   : > { %3636 = vmatmul.mubr.bf16.vlgmr.msra.gmra.mrb[4].mxu1 %v8476_v54  ;;  %3518 = vmatpush1.bf16.msra.mxu0 %v7460_v30  ;;  %v7483_v54 = vld [vmem:[#allocation12 + $0x46c] ss:$16 sps:$4 sm:$0xff]   ;;  %v7547_v30 = vld [vmem:[#allocation12 + $0xa44] ss:$16 sps:$4 sm:$0xff]  }
 0x3c9   : > { %3647 = vmatpush1.bf16.msra.mxu1 %v7463_v23  ;;  %3519 = vmatprep.subr.bf16.mxu0 %v7468_v24  ;;  %v7550_v23 = vld [vmem:[#allocation12 + $0xa4c] ss:$16 sps:$4 sm:$0xff]   ;;  %v7545_v24 = vld [vmem:[#allocation12 + $0xa40] ss:$16 sps:$4 sm:$0xff]  }
 0x3ca   : > { %3648 = vmatprep.subr.bf16.mxu1 %v7471_v2  ;;  %3549 = vmatprep.mubr.bf16.mxu0 %v8369_v32  ;;  %v7548_v2 = vld [vmem:[#allocation12 + $0xa48] ss:$16 sps:$4 sm:$0xff]  }
 0x3cb   : > { %3678 = vmatprep.mubr.bf16.mxu1 %v8369_v32 }
 0x3cc   : > { %3520 = vmatpush1.bf16.msra.mxu0 %v7466_v27  ;;  %v7553_v27 = vld [vmem:[#allocation12 + $0xa64] ss:$16 sps:$4 sm:$0xff]  }
 0x3cd   : > { %3649 = vmatpush1.bf16.msra.mxu1 %v7469_v28  ;;  %3521 = vmatprep.subr.bf16.mxu0 %v7474_v29  ;;  %v7556_v28 = vld [vmem:[#allocation12 + $0xa6c] ss:$16 sps:$4 sm:$0xff]   ;;  %v7551_v29 = vld [vmem:[#allocation12 + $0xa60] ss:$16 sps:$4 sm:$0xff]  }
 0x3ce   : > { %3650 = vmatprep.subr.bf16.mxu1 %v7477_v36  ;;  %v7554_v36 = vld [vmem:[#allocation12 + $0xa68] ss:$16 sps:$4 sm:$0xff]  }
 0x3d0   : > { %3522 = vmatpush1.bf16.msra.mxu0 %v7472_v39  ;;  %v7559_v39 = vld [vmem:[#allocation12 + $0xa84] ss:$16 sps:$4 sm:$0xff]  }
 0x3d1   : > { %3651 = vmatpush1.bf16.msra.mxu1 %v7475_v25  ;;  %3523 = vmatprep.subr.bf16.mxu0 %v7480_v41  ;;  %v7562_v25 = vld [vmem:[#allocation12 + $0xa8c] ss:$16 sps:$4 sm:$0xff]   ;;  %v7557_v41 = vld [vmem:[#allocation12 + $0xa80] ss:$16 sps:$4 sm:$0xff]  }
 0x3d2   : > { %3652 = vmatprep.subr.bf16.mxu1 %v7483_v54  ;;  %v7560_v54 = vld [vmem:[#allocation12 + $0xa88] ss:$16 sps:$4 sm:$0xff]  }
 0x3d4   : > { %3524 = vmatpush1.bf16.msra.mxu0 %v7478_v42  ;;  %v7565_v42 = vld [vmem:[#allocation12 + $0xaa4] ss:$16 sps:$4 sm:$0xff]  }
 0x3d5   : > { %3653 = vmatpush1.bf16.msra.mxu1 %v7481_v43  ;;  %4592 = vmatprep.subr.bf16.mxu0 %v7486_v44  ;;  %v7568_v43 = vld [vmem:[#allocation12 + $0xaac] ss:$16 sps:$4 sm:$0xff]   ;;  %v7563_v44 = vld [vmem:[#allocation12 + $0xaa0] ss:$16 sps:$4 sm:$0xff]  }
 0x3d6   : > { %4721 = vmatprep.subr.bf16.mxu1 %v7489_v45  ;;  %v7566_v45 = vld [vmem:[#allocation12 + $0xaa8] ss:$16 sps:$4 sm:$0xff]  }
 0x3d7   : > { %6578 = vmatmul.mubr.msk.bf16.vlgmr.msra.gmra.mrb[4].mxu0 %vm2443_vm8, %v8527_v26 }
 0x3d8   : > { %6579 = vmatmul.mubr.msk.bf16.vlgmr.msra.gmra.mrb[4].mxu1 %vm2443_vm8, %v8527_v26  ;;  %4593 = vmatpush1.bf16.msra.mxu0 %v7484_v46  ;;  %v7508_v26 = vld [vmem:[#allocation12 + $0x96c] ss:$16 sps:$4 sm:$0xff]   ;;  %v7571_v46 = vld [vmem:[#allocation12 + $0xac4] ss:$16 sps:$4 sm:$0xff]  }
 0x3d9   : > { %4624 = vmatprep.mubr.bf16.mxu0 %v8501_v40  ;;  %4722 = vmatpush1.bf16.msra.mxu1 %v7487_v47  ;;  %v7574_v47 = vld [vmem:[#allocation12 + $0xacc] ss:$16 sps:$4 sm:$0xff]  }
 0x3da   : > { %4753 = vmatprep.mubr.bf16.mxu1 %v8501_v40  ;;  %4594 = vmatprep.subr.bf16.mxu0 %v7493_v48  ;;  %v7509_v40 = vld [vmem:[#allocation12 + $0x980] ss:$16 sps:$4 sm:$0xff]  }
 0x3db   : > { %4723 = vmatprep.subr.bf16.mxu1 %v7496_v49  ;;  %v7569_v48 = vld [vmem:[#allocation12 + $0xac0] ss:$16 sps:$4 sm:$0xff]   ;;  %v7572_v49 = vld [vmem:[#allocation12 + $0xac8] ss:$16 sps:$4 sm:$0xff]  }
 0x3dc   : > { %4595 = vmatpush1.bf16.msra.mxu0 %v7491_v53  ;;  %v7577_v53 = vld [vmem:[#allocation12 + $0xae4] ss:$16 sps:$4 sm:$0xff]  }
 0x3dd   : > { %4724 = vmatpush1.bf16.msra.mxu1 %v7494_v55  ;;  %4596 = vmatprep.subr.bf16.mxu0 %v7499_v56  ;;  %v7580_v55 = vld [vmem:[#allocation12 + $0xaec] ss:$16 sps:$4 sm:$0xff]   ;;  %v7575_v56 = vld [vmem:[#allocation12 + $0xae0] ss:$16 sps:$4 sm:$0xff]  }
 0x3de   : > { %4725 = vmatprep.subr.bf16.mxu1 %v7502_v57  ;;  %v7578_v57 = vld [vmem:[#allocation12 + $0xae8] ss:$16 sps:$4 sm:$0xff]  }
 0x3e0   : > { %4597 = vmatpush1.bf16.msra.mxu0 %v7497_v51  ;;  %v7584_v51 = vld [vmem:[#allocation12 + $0xb04] ss:$16 sps:$4 sm:$0xff]  }
 0x3e1   : > { %4726 = vmatpush1.bf16.msra.mxu1 %v7500_v31  ;;  %4598 = vmatprep.subr.bf16.mxu0 %v7505_v60  ;;  %v7587_v31 = vld [vmem:[#allocation12 + $0xb0c] ss:$16 sps:$4 sm:$0xff]   ;;  %v7582_v60 = vld [vmem:[#allocation12 + $0xb00] ss:$16 sps:$4 sm:$0xff]  }
 0x3e2   : > { %4727 = vmatprep.subr.bf16.mxu1 %v7508_v26  ;;  %v7585_v26 = vld [vmem:[#allocation12 + $0xb08] ss:$16 sps:$4 sm:$0xff]  }
 0x3e4   : > { %4599 = vmatpush1.bf16.msra.mxu0 %v7503_v61  ;;  %v7590_v61 = vld [vmem:[#allocation12 + $0xb24] ss:$16 sps:$4 sm:$0xff]  }
 0x3e5   : > { %4728 = vmatpush1.bf16.msra.mxu1 %v7506_v62  ;;  %4600 = vmatprep.subr.bf16.mxu0 %v7511_v1  ;;  %v7593_v62 = vld [vmem:[#allocation12 + $0xb2c] ss:$16 sps:$4 sm:$0xff]   ;;  %v7588_v1 = vld [vmem:[#allocation12 + $0xb20] ss:$16 sps:$4 sm:$0xff]  }
 0x3e6   : > { %4729 = vmatprep.subr.bf16.mxu1 %v7514_v50  ;;  %v7591_v50 = vld [vmem:[#allocation12 + $0xb28] ss:$16 sps:$4 sm:$0xff]  }
 0x3e8   : > { %4601 = vmatpush1.bf16.msra.mxu0 %v7509_v40  ;;  %v7596_v40 = vld [vmem:[#allocation12 + $0xb44] ss:$16 sps:$4 sm:$0xff]  }
 0x3e9   : > { %4730 = vmatpush1.bf16.msra.mxu1 %v7512_v3  ;;  %4602 = vmatprep.subr.bf16.mxu0 %v7517_v4  ;;  %v7599_v3 = vld [vmem:[#allocation12 + $0xb4c] ss:$16 sps:$4 sm:$0xff]   ;;  %v7594_v4 = vld [vmem:[#allocation12 + $0xb40] ss:$16 sps:$4 sm:$0xff]  }
 0x3ea   : > { %4731 = vmatprep.subr.bf16.mxu1 %v7520_v5  ;;  %v7597_v5 = vld [vmem:[#allocation12 + $0xb48] ss:$16 sps:$4 sm:$0xff]  }
 0x3ec   : > { %4603 = vmatpush1.bf16.msra.mxu0 %v7515_v6  ;;  %v7602_v6 = vld [vmem:[#allocation12 + $0xb64] ss:$16 sps:$4 sm:$0xff]  }
 0x3ed   : > { %4732 = vmatpush1.bf16.msra.mxu1 %v7518_v9  ;;  %4604 = vmatprep.subr.bf16.mxu0 %v7523_v10  ;;  %v7600_v9 = vld [vmem:[#allocation12 + $0xb60] ss:$16 sps:$4 sm:$0xff]   ;;  %v7603_v10 = vld [vmem:[#allocation12 + $0xb68] ss:$16 sps:$4 sm:$0xff]  }
 0x3ee   : > { %4733 = vmatprep.subr.bf16.mxu1 %v7526_v11  ;;  %v7608_v11 = vld [vmem:[#allocation12 + $0xb84] ss:$16 sps:$4 sm:$0xff]  }
 0x3f0   : > { %4605 = vmatpush1.bf16.msra.mxu0 %v7521_v12  ;;  %v7611_v12 = vld [vmem:[#allocation12 + $0xb8c] ss:$16 sps:$4 sm:$0xff]  }
 0x3f1   : > { %4734 = vmatpush1.bf16.msra.mxu1 %v7524_v58  ;;  %4606 = vmatprep.subr.bf16.mxu0 %v7529_v13  ;;  %v7609_v58 = vld [vmem:[#allocation12 + $0xb88] ss:$16 sps:$4 sm:$0xff]   ;;  %v7614_v13 = vld [vmem:[#allocation12 + $0xba4] ss:$16 sps:$4 sm:$0xff]  }
 0x3f2   : > { %4735 = vmatprep.subr.bf16.mxu1 %v7532_v14  ;;  %v7617_v14 = vld [vmem:[#allocation12 + $0xbac] ss:$16 sps:$4 sm:$0xff]  }
 0x3f4   : > { %4607 = vmatpush1.bf16.msra.mxu0 %v7527_v15  ;;  %v7612_v15 = vld [vmem:[#allocation12 + $0xba0] ss:$16 sps:$4 sm:$0xff]  }
 0x3f5   : > { %4736 = vmatpush1.bf16.msra.mxu1 %v7530_v16  ;;  %4608 = vmatprep.subr.bf16.mxu0 %v7535_v17  ;;  %v7615_v16 = vld [vmem:[#allocation12 + $0xba8] ss:$16 sps:$4 sm:$0xff]   ;;  %v7620_v17 = vld [vmem:[#allocation12 + $0xbc4] ss:$16 sps:$4 sm:$0xff]  }
 0x3f6   : > { %4737 = vmatprep.subr.bf16.mxu1 %v7538_v18  ;;  %v7623_v18 = vld [vmem:[#allocation12 + $0xbcc] ss:$16 sps:$4 sm:$0xff]  }
 0x3f8   : > { %4609 = vmatpush1.bf16.msra.mxu0 %v7533_v19  ;;  %v7618_v19 = vld [vmem:[#allocation12 + $0xbc0] ss:$16 sps:$4 sm:$0xff]  }
 0x3f9   : > { %4738 = vmatpush1.bf16.msra.mxu1 %v7536_v0  ;;  %4610 = vmatprep.subr.bf16.mxu0 %v7541_v20  ;;  %v7621_v0 = vld [vmem:[#allocation12 + $0xbc8] ss:$16 sps:$4 sm:$0xff]   ;;  %v7626_v20 = vld [vmem:[#allocation12 + $0xbe4] ss:$16 sps:$4 sm:$0xff]  }
 0x3fa   : > { %4739 = vmatprep.subr.bf16.mxu1 %v7544_v21  ;;  %v7629_v21 = vld [vmem:[#allocation12 + $0xbec] ss:$16 sps:$4 sm:$0xff]  }
 0x3fc   : > { %4611 = vmatpush1.bf16.msra.mxu0 %v7539_v59  ;;  %v7624_v59 = vld [vmem:[#allocation12 + $0xbe0] ss:$16 sps:$4 sm:$0xff]  }
 0x3fd   : > { %4740 = vmatpush1.bf16.msra.mxu1 %v7542_v22  ;;  %4612 = vmatprep.subr.bf16.mxu0 %v7547_v30  ;;  %v7627_v22 = vld [vmem:[#allocation12 + $0xbe8] ss:$16 sps:$4 sm:$0xff]   ;;  %v7632_v30 = vld [vmem:[#allocation12 + $0xc04] ss:$16 sps:$4 sm:$0xff]  }
 0x3fe   : > { %4741 = vmatprep.subr.bf16.mxu1 %v7550_v23  ;;  %v7635_v23 = vld [vmem:[#allocation12 + $0xc0c] ss:$16 sps:$4 sm:$0xff]  }
 0x400   : > { %4613 = vmatpush1.bf16.msra.mxu0 %v7545_v24  ;;  %v7630_v24 = vld [vmem:[#allocation12 + $0xc00] ss:$16 sps:$4 sm:$0xff]  }
 0x401   : > { %4742 = vmatpush1.bf16.msra.mxu1 %v7548_v2  ;;  %4614 = vmatprep.subr.bf16.mxu0 %v7553_v27  ;;  %v7633_v2 = vld [vmem:[#allocation12 + $0xc08] ss:$16 sps:$4 sm:$0xff]   ;;  %v7638_v27 = vld [vmem:[#allocation12 + $0xc24] ss:$16 sps:$4 sm:$0xff]  }
 0x402   : > { %4743 = vmatprep.subr.bf16.mxu1 %v7556_v28  ;;  %v7641_v28 = vld [vmem:[#allocation12 + $0xc2c] ss:$16 sps:$4 sm:$0xff]  }
 0x404   : > { %4615 = vmatpush1.bf16.msra.mxu0 %v7551_v29  ;;  %v7636_v29 = vld [vmem:[#allocation12 + $0xc20] ss:$16 sps:$4 sm:$0xff]  }
 0x405   : > { %4744 = vmatpush1.bf16.msra.mxu1 %v7554_v36  ;;  %4616 = vmatprep.subr.bf16.mxu0 %v7559_v39  ;;  %v7639_v36 = vld [vmem:[#allocation12 + $0xc28] ss:$16 sps:$4 sm:$0xff]   ;;  %v7644_v39 = vld [vmem:[#allocation12 + $0xc44] ss:$16 sps:$4 sm:$0xff]  }
 0x406   : > { %4745 = vmatprep.subr.bf16.mxu1 %v7562_v25  ;;  %v7647_v25 = vld [vmem:[#allocation12 + $0xc4c] ss:$16 sps:$4 sm:$0xff]  }
 0x408   : > { %4617 = vmatpush1.bf16.msra.mxu0 %v7557_v41  ;;  %v7642_v41 = vld [vmem:[#allocation12 + $0xc40] ss:$16 sps:$4 sm:$0xff]  }
 0x409   : > { %4746 = vmatpush1.bf16.msra.mxu1 %v7560_v54  ;;  %4618 = vmatprep.subr.bf16.mxu0 %v7565_v42  ;;  %v7645_v54 = vld [vmem:[#allocation12 + $0xc48] ss:$16 sps:$4 sm:$0xff]   ;;  %v7650_v42 = vld [vmem:[#allocation12 + $0xc64] ss:$16 sps:$4 sm:$0xff]  }
 0x40a   : > { %4747 = vmatprep.subr.bf16.mxu1 %v7568_v43  ;;  %v7653_v43 = vld [vmem:[#allocation12 + $0xc6c] ss:$16 sps:$4 sm:$0xff]  }
 0x40c   : > { %4619 = vmatpush1.bf16.msra.mxu0 %v7563_v44  ;;  %v7648_v44 = vld [vmem:[#allocation12 + $0xc60] ss:$16 sps:$4 sm:$0xff]  }
 0x40d   : > { %4748 = vmatpush1.bf16.msra.mxu1 %v7566_v45  ;;  %4620 = vmatprep.subr.bf16.mxu0 %v7571_v46  ;;  %v7651_v45 = vld [vmem:[#allocation12 + $0xc68] ss:$16 sps:$4 sm:$0xff]   ;;  %v7656_v46 = vld [vmem:[#allocation12 + $0xc84] ss:$16 sps:$4 sm:$0xff]  }
 0x40e   : > { %4749 = vmatprep.subr.bf16.mxu1 %v7574_v47  ;;  %v7659_v47 = vld [vmem:[#allocation12 + $0xc8c] ss:$16 sps:$4 sm:$0xff]  }
 0x410   : > { %4621 = vmatpush1.bf16.msra.mxu0 %v7569_v48  ;;  %v7654_v48 = vld [vmem:[#allocation12 + $0xc80] ss:$16 sps:$4 sm:$0xff]  }
 0x411   : > { %4750 = vmatpush1.bf16.msra.mxu1 %v7572_v49  ;;  %4622 = vmatprep.subr.bf16.mxu0 %v7577_v53  ;;  %v7657_v49 = vld [vmem:[#allocation12 + $0xc88] ss:$16 sps:$4 sm:$0xff]   ;;  %v7662_v53 = vld [vmem:[#allocation12 + $0xca4] ss:$16 sps:$4 sm:$0xff]  }
 0x412   : > { %4751 = vmatprep.subr.bf16.mxu1 %v7580_v55  ;;  %v7665_v55 = vld [vmem:[#allocation12 + $0xcac] ss:$16 sps:$4 sm:$0xff]  }
 0x414   : > { %4623 = vmatpush1.bf16.msra.mxu0 %v7575_v56  ;;  %v7660_v56 = vld [vmem:[#allocation12 + $0xca0] ss:$16 sps:$4 sm:$0xff]  }
 0x415   : > { %4752 = vmatpush1.bf16.msra.mxu1 %v7578_v57  ;;  %4635 = vmatprep.subr.bf16.mxu0 %v7584_v51  ;;  %v7663_v57 = vld [vmem:[#allocation12 + $0xca8] ss:$16 sps:$4 sm:$0xff]   ;;  %v7668_v51 = vld [vmem:[#allocation12 + $0xcc4] ss:$16 sps:$4 sm:$0xff]  }
 0x416   : > { %4764 = vmatprep.subr.bf16.mxu1 %v7587_v31  ;;  %v7671_v31 = vld [vmem:[#allocation12 + $0xccc] ss:$16 sps:$4 sm:$0xff]  }
 0x417   : > { %4625 = vmatmul.mubr.bf16.vlgmr.msra.gmra.mrb[4].mxu0 %v8507_v52 }
 0x418   : > { %4754 = vmatmul.mubr.bf16.vlgmr.msra.gmra.mrb[4].mxu1 %v8507_v52  ;;  %4636 = vmatpush1.bf16.msra.mxu0 %v7582_v60  ;;  %v7605_v52 = vld [vmem:[#allocation12 + $0xb6c] ss:$16 sps:$4 sm:$0xff]   ;;  %v7666_v60 = vld [vmem:[#allocation12 + $0xcc0] ss:$16 sps:$4 sm:$0xff]  }
 0x419   : > { %4667 = vmatprep.mubr.bf16.mxu0 %v8511_v63  ;;  %4765 = vmatpush1.bf16.msra.mxu1 %v7585_v26  ;;  %v7669_v26 = vld [vmem:[#allocation12 + $0xcc8] ss:$16 sps:$4 sm:$0xff]  }
 0x41a   : > { %4796 = vmatprep.mubr.bf16.mxu1 %v8511_v63  ;;  %4637 = vmatprep.subr.bf16.mxu0 %v7590_v61  ;;  %v7606_v63 = vld [vmem:[#allocation12 + $0xb80] ss:$16 sps:$4 sm:$0xff]   ;;  %v7674_v61 = vld [vmem:[#allocation12 + $0xce4] ss:$16 sps:$4 sm:$0xff]  }
 0x41b   : > { %4766 = vmatprep.subr.bf16.mxu1 %v7593_v62  ;;  %v7677_v62 = vld [vmem:[#allocation12 + $0xcec] ss:$16 sps:$4 sm:$0xff]  }
 0x41c   : > { %4638 = vmatpush1.bf16.msra.mxu0 %v7588_v1  ;;  %v7672_v1 = vld [vmem:[#allocation12 + $0xce0] ss:$16 sps:$4 sm:$0xff]  }
 0x41d   : > { %4767 = vmatpush1.bf16.msra.mxu1 %v7591_v50  ;;  %4639 = vmatprep.subr.bf16.mxu0 %v7596_v40  ;;  %v7675_v50 = vld [vmem:[#allocation12 + $0xce8] ss:$16 sps:$4 sm:$0xff]   ;;  %v7680_v40 = vld [vmem:[#allocation12 + $0xd04] ss:$16 sps:$4 sm:$0xff]  }
 0x41e   : > { %4768 = vmatprep.subr.bf16.mxu1 %v7599_v3  ;;  %v7683_v3 = vld [vmem:[#allocation12 + $0xd0c] ss:$16 sps:$4 sm:$0xff]  }
 0x420   : > { %4640 = vmatpush1.bf16.msra.mxu0 %v7594_v4  ;;  %v7678_v4 = vld [vmem:[#allocation12 + $0xd00] ss:$16 sps:$4 sm:$0xff]  }
 0x421   : > { %4769 = vmatpush1.bf16.msra.mxu1 %v7597_v5  ;;  %4641 = vmatprep.subr.bf16.mxu0 %v7602_v6  ;;  %v7681_v5 = vld [vmem:[#allocation12 + $0xd08] ss:$16 sps:$4 sm:$0xff]   ;;  %v7686_v6 = vld [vmem:[#allocation12 + $0xd24] ss:$16 sps:$4 sm:$0xff]  }
 0x422   : > { %4770 = vmatprep.subr.bf16.mxu1 %v7605_v52  ;;  %v7689_v52 = vld [vmem:[#allocation12 + $0xd2c] ss:$16 sps:$4 sm:$0xff]  }
 0x424   : > { %4642 = vmatpush1.bf16.msra.mxu0 %v7600_v9  ;;  %v7684_v9 = vld [vmem:[#allocation12 + $0xd20] ss:$16 sps:$4 sm:$0xff]  }
 0x425   : > { %4771 = vmatpush1.bf16.msra.mxu1 %v7603_v10  ;;  %4643 = vmatprep.subr.bf16.mxu0 %v7608_v11  ;;  %v7687_v10 = vld [vmem:[#allocation12 + $0xd28] ss:$16 sps:$4 sm:$0xff]   ;;  %v7692_v11 = vld [vmem:[#allocation12 + $0xd44] ss:$16 sps:$4 sm:$0xff]  }
 0x426   : > { %4772 = vmatprep.subr.bf16.mxu1 %v7611_v12  ;;  %v7695_v12 = vld [vmem:[#allocation12 + $0xd4c] ss:$16 sps:$4 sm:$0xff]  }
 0x428   : > { %4644 = vmatpush1.bf16.msra.mxu0 %v7606_v63  ;;  %v7690_v63 = vld [vmem:[#allocation12 + $0xd40] ss:$16 sps:$4 sm:$0xff]  }
 0x429   : > { %4773 = vmatpush1.bf16.msra.mxu1 %v7609_v58  ;;  %4645 = vmatprep.subr.bf16.mxu0 %v7614_v13  ;;  %v7693_v58 = vld [vmem:[#allocation12 + $0xd48] ss:$16 sps:$4 sm:$0xff]   ;;  %v7698_v13 = vld [vmem:[#allocation12 + $0xd64] ss:$16 sps:$4 sm:$0xff]  }
 0x42a   : > { %4774 = vmatprep.subr.bf16.mxu1 %v7617_v14  ;;  %v7696_v14 = vld [vmem:[#allocation12 + $0xd60] ss:$16 sps:$4 sm:$0xff]  }
 0x42c   : > { %4646 = vmatpush1.bf16.msra.mxu0 %v7612_v15  ;;  %v7699_v15 = vld [vmem:[#allocation12 + $0xd68] ss:$16 sps:$4 sm:$0xff]  }
 0x42d   : > { %4775 = vmatpush1.bf16.msra.mxu1 %v7615_v16  ;;  %4647 = vmatprep.subr.bf16.mxu0 %v7620_v17  ;;  %v7996_v16 = vmov 1983009808  }
 0x42e   : > { %4776 = vmatprep.subr.bf16.mxu1 %v7623_v18  ;;  %v4947_v17 = vunpack.c.l.s4 %v7996_v16  ;;  %v4888_v18 = vld [vmem:[#allocation15] sm:$0xf] }
 0x430   : > { %4648 = vmatpush1.bf16.msra.mxu0 %v7618_v19 }
 0x431   : > { %4777 = vmatpush1.bf16.msra.mxu1 %v7621_v0  ;;  %4649 = vmatprep.subr.bf16.mxu0 %v7626_v20 }
 0x432   : > { %4778 = vmatprep.subr.bf16.mxu1 %v7629_v21  ;;  %v4948_v21 = vunpack.c.0.s8 %v4947_v17 }
 0x434   : > { %4650 = vmatpush1.bf16.msra.mxu0 %v7624_v59  ;;  %v4893_v59 = vrot.slane %v4888_v18, %v8385_v34 }
 0x435   : > { %4779 = vmatpush1.bf16.msra.mxu1 %v7627_v22  ;;  %4651 = vmatprep.subr.bf16.mxu0 %v7632_v30 }
 0x436   : > { %4780 = vmatprep.subr.bf16.mxu1 %v7635_v23  ;;  %v4901_v23 = vrot.slane %v4888_v18, %v8388_v35 }
 0x438   : > { %4652 = vmatpush1.bf16.msra.mxu0 %v7630_v24 }
 0x439   : > { %4781 = vmatpush1.bf16.msra.mxu1 %v7633_v2  ;;  %4653 = vmatprep.subr.bf16.mxu0 %v7638_v27 }
 0x43a   : > { %4782 = vmatprep.subr.bf16.mxu1 %v7641_v28  ;;  %v4905_v28 = vrot.slane %v4888_v18, %v8394_v38 }
 0x43c   : > { %4654 = vmatpush1.bf16.msra.mxu0 %v7636_v29 }
 0x43d   : > { %4783 = vmatpush1.bf16.msra.mxu1 %v7639_v36  ;;  %4655 = vmatprep.subr.bf16.mxu0 %v7644_v39 }
 0x43e   : > { %4784 = vmatprep.subr.bf16.mxu1 %v7647_v25 }
 0x440   : > { %4656 = vmatpush1.bf16.msra.mxu0 %v7642_v41  ;;  %v8574_v41 = vsub.s32 %v4948_v21, %v8382_v33 }
 0x441   : > { %4785 = vmatpush1.bf16.msra.mxu1 %v7645_v54  ;;  %4657 = vmatprep.subr.bf16.mxu0 %v7650_v42 }
 0x442   : > { %4786 = vmatprep.subr.bf16.mxu1 %v7653_v43 }
 0x444   : > { %4658 = vmatpush1.bf16.msra.mxu0 %v7648_v44 }
 0x445   : > { %4787 = vmatpush1.bf16.msra.mxu1 %v7651_v45  ;;  %4659 = vmatprep.subr.bf16.mxu0 %v7656_v46 }
 0x446   : > { %4788 = vmatprep.subr.bf16.mxu1 %v7659_v47 }
 0x448   : > { %4660 = vmatpush1.bf16.msra.mxu0 %v7654_v48 }
 0x449   : > { %4789 = vmatpush1.bf16.msra.mxu1 %v7657_v49  ;;  %4661 = vmatprep.subr.bf16.mxu0 %v7662_v53 }
 0x44a   : > { %4790 = vmatprep.subr.bf16.mxu1 %v7665_v55 }
 0x44c   : > { %4662 = vmatpush1.bf16.msra.mxu0 %v7660_v56 }
 0x44d   : > { %4791 = vmatpush1.bf16.msra.mxu1 %v7663_v57  ;;  %4663 = vmatprep.subr.bf16.mxu0 %v7668_v51 }
 0x44e   : > { %4792 = vmatprep.subr.bf16.mxu1 %v7671_v31 }
 0x450   : > { %4664 = vmatpush1.bf16.msra.mxu0 %v7666_v60 }
 0x451   : > { %4793 = vmatpush1.bf16.msra.mxu1 %v7669_v26  ;;  %4665 = vmatprep.subr.bf16.mxu0 %v7674_v61 }
 0x452   : > { %4794 = vmatprep.subr.bf16.mxu1 %v7677_v62 }
 0x454   : > { %4666 = vmatpush1.bf16.msra.mxu0 %v7672_v1 }
 0x455   : > { %4795 = vmatpush1.bf16.msra.mxu1 %v7675_v50  ;;  %4678 = vmatprep.subr.bf16.mxu0 %v7680_v40 }
 0x456   : > { %4807 = vmatprep.subr.bf16.mxu1 %v7683_v3 }
 0x457   : > { %4668 = vmatmul.mubr.bf16.vlgmr.msra.gmra.mrb[4].mxu0 %v8517_v7 }
 0x458   : > { %4797 = vmatmul.mubr.bf16.vlgmr.msra.gmra.mrb[4].mxu1 %v8517_v7  ;;  %4679 = vmatpush1.bf16.msra.mxu0 %v7678_v4  ;;  %v7701_v7 = vld [vmem:[#allocation12 + $0xd6c] ss:$16 sps:$4 sm:$0xff]  }
 0x459   : > { %4808 = vmatpush1.bf16.msra.mxu1 %v7681_v5  ;;  %4680 = vmatprep.subr.bf16.mxu0 %v7686_v6 }
 0x45a   : > { %4809 = vmatprep.subr.bf16.mxu1 %v7689_v52  ;;  %4710 = vmatprep.mubr.bf16.mxu0 %v8369_v32 }
 0x45b   : > { %4839 = vmatprep.mubr.bf16.mxu1 %v8369_v32  ;;  %v4858_v32 = vld [vmem:[#allocation13] sm:$0xf] }
 0x45c   : > { %4681 = vmatpush1.bf16.msra.mxu0 %v7684_v9  ;;  %v4863_v19 = vrot.slane %v4858_v32, %v8385_v34  ;;  %v4871_v0 = vrot.slane %v4858_v32, %v8388_v35  ;;  %v4867_v20 = vrot.slane %v4858_v32, %v8391_v37  ;;  %v4875_v22 = vrot.slane %v4858_v32, %v8394_v38 }
 0x45d   : > { %4810 = vmatpush1.bf16.msra.mxu1 %v7687_v10  ;;  %4682 = vmatprep.subr.bf16.mxu0 %v7692_v11 }
 0x45e   : > { %4811 = vmatprep.subr.bf16.mxu1 %v7695_v12 }
 0x460   : > { %4683 = vmatpush1.bf16.msra.mxu0 %v7690_v63 }
 0x461   : > { %4812 = vmatpush1.bf16.msra.mxu1 %v7693_v58  ;;  %4684 = vmatprep.subr.bf16.mxu0 %v7698_v13 }
 0x462   : > { %4813 = vmatprep.subr.bf16.mxu1 %v7701_v7 }
 0x464   : > { %4685 = vmatpush1.bf16.msra.mxu0 %v7696_v14 }
 0x465   : > { %4814 = vmatpush1.bf16.msra.mxu1 %v7699_v15 }
 0x467   : > { %6729 = vmatmul.mubr.msk.bf16.vlgmr.msra.gmra.mrb[4].mxu0 %vm2443_vm8, %v8520_v8 }
 0x468   : > { %6730 = vmatmul.mubr.msk.bf16.vlgmr.msra.gmra.mrb[4].mxu1 %vm2443_vm8, %v8520_v8  ;;  %v4897_v8 = vrot.slane %v4888_v18, %v8391_v37 }
 0x53a   : > { %v4712_v30 = vpop.f32.mrb[4].mxu0 }
 0x53b   : > { %v4880_v24 = vmul.f32 %v4863_v19, %v4712_v30  ;;  %v4841_v2 = vpop.f32.mrb[4].mxu1  ;;  %v4714_v27 = vpop.f32.mrb[5].mxu0 }
 0x53c   : > { %v4882_v29 = vmul.f32 %v4871_v0, %v4841_v2  ;;  %v4881_v36 = vmul.f32 %v4867_v20, %v4714_v27  ;;  %v4843_v39 = vpop.f32.mrb[5].mxu1  ;;  %v4716_v25 = vpop.f32.mrb[6].mxu0 }
 0x53d   : > { %v4910_v34 = vadd.f32 %v4893_v59, %v4880_v24  ;;  %v4883_v54 = vmul.f32 %v4875_v22, %v4843_v39  ;;  %v4884_v42 = vmul.f32 %v4863_v19, %v4716_v25  ;;  %v4845_v43 = vpop.f32.mrb[6].mxu1  ;;  %v4718_v44 = vpop.f32.mrb[7].mxu0 }
 0x53e   : > { %v4912_v35 = vadd.f32 %v4901_v23, %v4882_v29  ;;  %v4911_v45 = vadd.f32 %v4897_v8, %v4881_v36  ;;  %v4886_v37 = vmul.f32 %v4871_v0, %v4845_v43  ;;  %v4885_v46 = vmul.f32 %v4867_v20, %v4718_v44  ;;  %v4847_v47 = vpop.f32.mrb[7].mxu1 }
 0x53f   : > { %v4918_v48 = vmul.f32 0.01, %v4910_v34  ;;  %v4913_v49 = vadd.f32 %v4905_v28, %v4883_v54  ;;  %v4914_v38 = vadd.f32 %v4893_v59, %v4884_v42  ;;  %v4887_v53 = vmul.f32 %v4875_v22, %v4847_v47 }
 0x540   : > { %v4920_v55 = vmul.f32 0.01, %v4912_v35  ;;  %v4919_v56 = vmul.f32 0.01, %v4911_v45  ;;  %v4916_v57 = vadd.f32 %v4901_v23, %v4886_v37  ;;  %v4915_v51 = vadd.f32 %v4897_v8, %v4885_v46 }
 0x541   : > { %v4926_v31 = vmax.f32 %v4910_v34, %v4918_v48  ;;  %v4921_v60 = vmul.f32 0.01, %v4913_v49  ;;  %v4922_v26 = vmul.f32 0.01, %v4914_v38  ;;  %v4917_v61 = vadd.f32 %v4905_v28, %v4887_v53 }
 0x542   : > { %v4928_v62 = vmax.f32 %v4912_v35, %v4920_v55  ;;  %v4927_v1 = vmax.f32 %v4911_v45, %v4919_v56  ;;  %v4924_v50 = vmul.f32 0.01, %v4916_v57  ;;  %v4923_v40 = vmul.f32 0.01, %v4915_v51 }
 0x543   : > { %v4929_v3 = vmax.f32 %v4913_v49, %v4921_v60  ;;  %v4930_v4 = vmax.f32 %v4914_v38, %v4922_v26  ;;  %v4925_v5 = vmul.f32 0.01, %v4917_v61 }
 0x544   : > { %v4942_v6 = vcombine.low %v4926_v31, %v4927_v1  ;;  %v4943_v52 = vcombine.high %v4926_v31, %v4927_v1  ;;  %v4932_v9 = vmax.f32 %v4916_v57, %v4924_v50  ;;  %v4931_v10 = vmax.f32 %v4915_v51, %v4923_v40 }
 0x545   : > { %v4944_v11 = vcombine.low %v4928_v62, %v4929_v3  ;;  %v4945_v12 = vcombine.high %v4928_v62, %v4929_v3  ;;  %v4933_v63 = vmax.f32 %v4917_v61, %v4925_v5 }
 0x546   : > { %v4952_v58 = vrot.slane %v4942_v6, %v8574_v41  ;;  %v4959_v13 = vrot.slane %v4943_v52, %v8574_v41  ;;  %v4978_v7 = vcombine.low %v4930_v4, %v4931_v10  ;;  %v4979_v14 = vcombine.high %v4930_v4, %v4931_v10 }
 0x547   : > { %v4966_v15 = vrot.slane %v4944_v11, %v8574_v41  ;;  %v4973_v32 = vrot.slane %v4945_v12, %v8574_v41  ;;  %v4980_v16 = vcombine.low %v4932_v9, %v4933_v63  ;;  %v4981_v17 = vcombine.high %v4932_v9, %v4933_v63 }
 0x548   : > { %v4988_v18 = vrot.slane %v4978_v7, %v8574_v41  ;;  %v4995_v19 = vrot.slane %v4979_v14, %v8574_v41 }
 0x549   : > { %v4974_v0 = vcombine.low %v4952_v58, %v4966_v15  ;;  %v4975_v20 = vcombine.high %v4952_v58, %v4966_v15  ;;  %v4976_v21 = vcombine.low %v4959_v13, %v4973_v32  ;;  %v4977_v59 = vcombine.high %v4959_v13, %v4973_v32 }
 0x54a   : > { %v5002_v22 = vrot.slane %v4980_v16, %v8574_v41  ;;  %v5009_v30 = vrot.slane %v4981_v17, %v8574_v41 }
 0x54b   : > { %v6731_v23 = vrot.slane %v4974_v0, 9  ;;  %v6732_v8 = vrot.slane %v4975_v20, 9  ;;  %v6733_v24 = vrot.slane %v4976_v21, 9  ;;  %v6734_v2 = vrot.slane %v4977_v59, 9 }
 0x54c   : > { %v5010_v27 = vcombine.low %v4988_v18, %v5002_v22  ;;  %v5011_v28 = vcombine.high %v4988_v18, %v5002_v22  ;;  %v5012_v29 = vcombine.low %v4995_v19, %v5009_v30  ;;  %v5013_v36 = vcombine.high %v4995_v19, %v5009_v30 }
 0x54d   : > { %v8584_v39 = vmax.f32 %v4977_v59, %v6734_v2  ;;  %v8586_v25 = vmax.f32 %v4975_v20, %v6732_v8  ;;  %v8588_v34 = vmax.f32 %v4976_v21, %v6733_v24  ;;  %v8590_v54 = vmax.f32 %v4974_v0, %v6731_v23 }
 0x54e   : > { %v6735_v42 = vrot.slane %v5010_v27, 9  ;;  %v6736_v43 = vrot.slane %v5011_v28, 9  ;;  %v6737_v44 = vrot.slane %v5012_v29, 9  ;;  %v6738_v35 = vrot.slane %v5013_v36, 9 }
 0x54f   : > { %5076 = vrot.lane.b32.xlu0 %v8584_v39, %s7997_s23  ;;  %5072 = vrot.lane.b32.xlu1 %v8586_v25, %s7997_s23  ;;  %v5130_v45 = vrot.slane %v8586_v25, 7  ;;  %v5095_v37 = vrot.slane %v8586_v25, 4  ;;  %v5141_v46 = vrot.slane %v8584_v39, 7  ;;  %v5094_v38 = vrot.slane %v8590_v54, 4 }
 0x550   : > { %v8599_v47 = vmax.f32 %v5013_v36, %v6738_v35  ;;  %v8601_v48 = vmax.f32 %v5011_v28, %v6736_v43  ;;  %v8603_v49 = vmax.f32 %v5012_v29, %v6737_v44  ;;  %v8606_v53 = vmax.f32 %v5010_v27, %v6735_v42 }
 0x551   : > { %v5132_v55 = vsel %vm5131_vm11, %v5130_v45, %v8590_v54  ;;  %v5246_v56 = vrot.slane %v5095_v37, 7  ;;  %v5142_v57 = vsel %vm5131_vm11, %v5141_v46, %v8588_v34  ;;  %v5096_v60 = vrot.slane %v8588_v34, 4 }
 0x552   : > { %v5134_v51 = vsel %vm5133_vm9, %v5130_v45, %v5132_v55  ;;  %v5143_v31 = vsel %vm5133_vm9, %v5141_v46, %v5142_v57  ;;  %v5097_v26 = vrot.slane %v8584_v39, 4  ;;  %v5111_v50 = vrot.slane %v8586_v25, 6 }
 0x553   : > { %5074 = vrot.lane.b32.xlu0 %v8588_v34, %s7997_s23  ;;  %5070 = vrot.lane.b32.xlu1 %v8590_v54, %s7997_s23  ;;  %v5136_v61 = vsel %vm5135_vm0, %v5130_v45, %v5134_v51  ;;  %v5247_v62 = vsel %vm5131_vm11, %v5246_v56, %v5094_v38  ;;  %v5144_v1 = vsel %vm5135_vm0, %v5141_v46, %v5143_v31  ;;  %v5110_v52 = vrot.slane %v8590_v54, 6 }
 0x554   : > { %v8625_v40 = vsel %vm5137_vm1, %v5130_v45, %v5136_v61  ;;  %v5248_v3 = vsel %vm5133_vm9, %v5246_v56, %v5247_v62  ;;  %v8629_v4 = vsel %vm5137_vm1, %v5141_v46, %v5144_v1  ;;  %v5253_v5 = vrot.slane %v5097_v26, 7 }
 0x555   : > { %v5249_v6 = vsel %vm5135_vm0, %v5246_v56, %v5248_v3  ;;  %v5302_v9 = vrot.slane %v5111_v50, 7  ;;  %v5113_v10 = vrot.slane %v8584_v39, 6  ;;  %v5148_v63 = vrot.slane %v8601_v48, 7 }
 0x556   : > { %v8635_v11 = vsel %vm5137_vm1, %v5246_v56, %v5249_v6  ;;  %v5254_v12 = vsel %vm5131_vm11, %v5253_v5, %v5096_v60  ;;  %v5155_v58 = vrot.slane %v8599_v47, 7  ;;  %v5112_v14 = vrot.slane %v8588_v34, 6 }
 0x557   : > { %5084 = vrot.lane.b32.xlu0 %v8599_v47, %s7997_s23  ;;  %5080 = vrot.lane.b32.xlu1 %v8601_v48, %s7997_s23  ;;  %v5255_v13 = vsel %vm5133_vm9, %v5253_v5, %v5254_v12  ;;  %v5303_v7 = vsel %vm5131_vm11, %v5302_v9, %v5110_v52  ;;  %v5309_v15 = vrot.slane %v5113_v10, 7  ;;  %v5149_v17 = vsel %vm5131_vm11, %v5148_v63, %v8606_v53 }
 0x558   : > { %v5256_v32 = vsel %vm5135_vm0, %v5253_v5, %v5255_v13  ;;  %v5304_v16 = vsel %vm5133_vm9, %v5302_v9, %v5303_v7  ;;  %v5156_v18 = vsel %vm5131_vm11, %v5155_v58, %v8603_v49  ;;  %v5150_v21 = vsel %vm5133_vm9, %v5148_v63, %v5149_v17 }
 0x559   : > { %v8654_v19 = vsel %vm5137_vm1, %v5253_v5, %v5256_v32  ;;  %v5305_v0 = vsel %vm5135_vm0, %v5302_v9, %v5304_v16  ;;  %v5310_v20 = vsel %vm5131_vm11, %v5309_v15, %v5112_v14  ;;  %v5151_v30 = vsel %vm5135_vm0, %v5148_v63, %v5150_v21 }
 0x55a   : > { %v8660_v59 = vsel %vm5137_vm1, %v5302_v9, %v5305_v0  ;;  %v5311_v22 = vsel %vm5133_vm9, %v5309_v15, %v5310_v20  ;;  %v5157_v23 = vsel %vm5133_vm9, %v5155_v58, %v5156_v18  ;;  %v8671_v24 = vsel %vm5137_vm1, %v5148_v63, %v5151_v30 }
 0x55b   : > { %5082 = vrot.lane.b32.xlu0 %v8603_v49, %s7997_s23  ;;  %5078 = vrot.lane.b32.xlu1 %v8606_v53, %s7997_s23  ;;  %v5312_v8 = vsel %vm5135_vm0, %v5309_v15, %v5311_v22  ;;  %v5158_v2 = vsel %vm5135_vm0, %v5155_v58, %v5157_v23  ;;  %v5062_v29 = vrot.slane %v8590_v54, 2  ;;  %v5063_v36 = vrot.slane %v8586_v25, 2 }
 0x55c   : > { %v8675_v27 = vsel %vm5137_vm1, %v5309_v15, %v5312_v8  ;;  %v8678_v28 = vsel %vm5137_vm1, %v5155_v58, %v5158_v2  ;;  %v5098_v42 = vrot.slane %v8606_v53, 4  ;;  %v5099_v43 = vrot.slane %v8601_v48, 4 }
 0x55d   : > { %v5064_v44 = vrot.slane %v8588_v34, 2  ;;  %v5065_v35 = vrot.slane %v8584_v39, 2  ;;  %v5190_v45 = vrot.slane %v5063_v36, 7  ;;  %v5100_v37 = vrot.slane %v8603_v49, 4 }
 0x55e   : > { %v5101_v46 = vrot.slane %v8599_v47, 4  ;;  %v5115_v38 = vrot.slane %v8601_v48, 6  ;;  %v5260_v55 = vrot.slane %v5099_v43, 7  ;;  %v5114_v54 = vrot.slane %v8606_v53, 6 }
 0x55f   : > { %v5197_v56 = vrot.slane %v5065_v35, 7  ;;  %v5117_v25 = vrot.slane %v8599_v47, 6  ;;  %v5191_v57 = vsel %vm5131_vm11, %v5190_v45, %v5062_v29  ;;  %v5116_v34 = vrot.slane %v8603_v49, 6 }
 0x560   : > { %v5267_v51 = vrot.slane %v5101_v46, 7  ;;  %v5316_v31 = vrot.slane %v5115_v38, 7  ;;  %v5192_v39 = vsel %vm5133_vm9, %v5190_v45, %v5191_v57  ;;  %v5261_v60 = vsel %vm5131_vm11, %v5260_v55, %v5098_v42 }
 0x561   : > { %v5198_v26 = vsel %vm5131_vm11, %v5197_v56, %v5064_v44  ;;  %v5323_v61 = vrot.slane %v5117_v25, 7  ;;  %v5193_v62 = vsel %vm5135_vm0, %v5190_v45, %v5192_v39  ;;  %v5262_v1 = vsel %vm5133_vm9, %v5260_v55, %v5261_v60 }
 0x562   : > { %v5199_v50 = vsel %vm5133_vm9, %v5197_v56, %v5198_v26  ;;  %v5268_v3 = vsel %vm5131_vm11, %v5267_v51, %v5100_v37  ;;  %v8701_v5 = vsel %vm5137_vm1, %v5190_v45, %v5193_v62  ;;  %v5263_v6 = vsel %vm5135_vm0, %v5260_v55, %v5262_v1 }
 0x563   : > { %v5200_v52 = vsel %vm5135_vm0, %v5197_v56, %v5199_v50  ;;  %v5269_v9 = vsel %vm5133_vm9, %v5267_v51, %v5268_v3  ;;  %v8707_v10 = vsel %vm5137_vm1, %v5260_v55, %v5263_v6  ;;  %v5317_v58 = vsel %vm5131_vm11, %v5316_v31, %v5114_v54 }
 0x564   : > { %v8710_v12 = vsel %vm5137_vm1, %v5197_v56, %v5200_v52  ;;  %v5270_v63 = vsel %vm5135_vm0, %v5267_v51, %v5269_v9  ;;  %v5318_v7 = vsel %vm5133_vm9, %v5316_v31, %v5317_v58  ;;  %v5324_v14 = vsel %vm5131_vm11, %v5323_v61, %v5116_v34 }
 0x565   : > { %v8715_v13 = vsel %vm5137_vm1, %v5267_v51, %v5270_v63  ;;  %v5067_v15 = vrot.slane %v8601_v48, 2  ;;  %v5319_v32 = vsel %vm5135_vm0, %v5316_v31, %v5318_v7  ;;  %v5325_v16 = vsel %vm5133_vm9, %v5323_v61, %v5324_v14 }
 0x566   : > { %v5069_v17 = vrot.slane %v8599_v47, 2  ;;  %v8724_v18 = vsel %vm5137_vm1, %v5316_v31, %v5319_v32  ;;  %v5326_v0 = vsel %vm5135_vm0, %v5323_v61, %v5325_v16  ;;  %v5066_v20 = vrot.slane %v8606_v53, 2 }
 0x567   : > { %v5204_v21 = vrot.slane %v5067_v15, 7  ;;  %v8729_v22 = vsel %vm5137_vm1, %v5323_v61, %v5326_v0  ;;  %v5068_v30 = vrot.slane %v8603_v49, 2  ;;  %v7998_v45 = vmov 1934713408  }
 0x568   : > { %v5211_v48 = vrot.slane %v5069_v17, 7  ;;  %v5390_v37 = vunpack.c.l.s4 %v7998_v45 }
 0x569   : > { %v5205_v23 = vsel %vm5131_vm11, %v5204_v21, %v5066_v20 }
 0x56a   : > { %v5206_v8 = vsel %vm5133_vm9, %v5204_v21, %v5205_v23  ;;  %v5212_v47 = vsel %vm5131_vm11, %v5211_v48, %v5068_v30  ;;  %v5391_v26 = vunpack.c.0.s8 %v5390_v37 }
 0x56b   : > { %v5207_v2 = vsel %vm5135_vm0, %v5204_v21, %v5206_v8  ;;  %v5213_v29 = vsel %vm5133_vm9, %v5211_v48, %v5212_v47 }
 0x56c   : > { %v8738_v36 = vsel %vm5137_vm1, %v5204_v21, %v5207_v2  ;;  %v5214_v53 = vsel %vm5135_vm0, %v5211_v48, %v5213_v29  ;;  %v8780_v16 = vsub.s32 %v5391_v26, %v8382_v33 }
 0x56d   : > { %v8742_v42 = vsel %vm5137_vm1, %v5211_v48, %v5214_v53 }
 0x5c1   : > { %v8744_v49 = vpop.permute.xlu1 %5072  ;;  %v8746_v43 = vpop.permute.xlu0 %5076 }
 0x5c2   : > { %v5162_v35 = vrot.slane %v8744_v49, 7  ;;  %v5105_v55 = vrot.slane %v8746_v43, 4  ;;  %v5169_v56 = vrot.slane %v8746_v43, 7  ;;  %v5103_v54 = vrot.slane %v8744_v49, 4 }
 0x5c3   : > { %v5121_v51 = vrot.slane %v8746_v43, 6  ;;  %v5119_v31 = vrot.slane %v8744_v49, 6  ;;  %v5089_v26 = vrot.slane %v8746_v43, 2  ;;  %v8000_v43 = vmov 0.0  }
 0x5c4   : > { %v5281_v1 = vrot.slane %v5105_v55, 7  ;;  %v5274_v50 = vrot.slane %v5103_v54, 7  ;;  %v5087_v55 = vrot.slane %v8744_v49, 2 }
 0x5c5   : > { %v8748_v44 = vpop.permute.xlu1 %5070  ;;  %v8751_v46 = vpop.permute.xlu0 %5074  ;;  %v5337_v6 = vrot.slane %v5121_v51, 7  ;;  %v5330_v52 = vrot.slane %v5119_v31, 7 }
 0x5c6   : > { %v5163_v38 = vsel %vm5131_vm11, %v5162_v35, %v8748_v44  ;;  %v5104_v34 = vrot.slane %v8751_v46, 4  ;;  %v5170_v39 = vsel %vm5131_vm11, %v5169_v56, %v8751_v46  ;;  %v5102_v60 = vrot.slane %v8748_v44, 4 }
 0x5c7   : > { %v5164_v25 = vsel %vm5133_vm9, %v5162_v35, %v5163_v38  ;;  %v5118_v61 = vrot.slane %v8748_v44, 6  ;;  %v5120_v3 = vrot.slane %v8751_v46, 6  ;;  %v5171_v9 = vsel %vm5133_vm9, %v5169_v56, %v5170_v39 }
 0x5c8   : > { %v5165_v62 = vsel %vm5135_vm0, %v5162_v35, %v5164_v25  ;;  %v5282_v58 = vsel %vm5131_vm11, %v5281_v1, %v5104_v34  ;;  %v5275_v7 = vsel %vm5131_vm11, %v5274_v50, %v5102_v60  ;;  %v5172_v48 = vsel %vm5135_vm0, %v5169_v56, %v5171_v9 }
 0x5c9   : > { %v8759_v57 = vpop.permute.xlu1 %5080  ;;  %v8775_v14 = vpop.permute.xlu0 %5084  ;;  %v5166_v32 = vsel %vm5137_vm1, %v5162_v35, %v5165_v62  ;;  %v5331_v17 = vsel %vm5131_vm11, %v5330_v52, %v5118_v61  ;;  %v5338_v0 = vsel %vm5131_vm11, %v5337_v6, %v5120_v3  ;;  %v5276_v30 = vsel %vm5133_vm9, %v5274_v50, %v5275_v7 }
 0x5ca   : > { %v5176_v15 = vrot.slane %v8759_v57, 7  ;;  %v5388_v21 = vcombine.low %v8625_v40, %v5166_v32  ;;  %v5283_v23 = vsel %vm5133_vm9, %v5281_v1, %v5282_v58  ;;  %v5277_v8 = vsel %vm5135_vm0, %v5274_v50, %v5276_v30 }
 0x5cb   : > { %v5173_v33 = vsel %vm5137_vm1, %v5169_v56, %v5172_v48  ;;  %v5284_v47 = vsel %vm5135_vm0, %v5281_v1, %v5283_v23  ;;  %v5332_v2 = vsel %vm5133_vm9, %v5330_v52, %v5331_v17  ;;  %v5278_v53 = vsel %vm5137_vm1, %v5274_v50, %v5277_v8 }
 0x5cc   : > { %v8795_v29 = vrot.slane %v5388_v21, %v8780_v16  ;;  %v5424_v40 = vcombine.low %v8629_v4, %v5173_v33  ;;  %v5285_v35 = vsel %vm5137_vm1, %v5281_v1, %v5284_v47  ;;  %v5406_v37 = vcombine.low %v8635_v11, %v5278_v53 }
 0x5cd   : > { %v8771_v63 = vpop.permute.xlu1 %5078  ;;  %v8800_v45 = vpop.permute.xlu0 %5082  ;;  %v5333_v38 = vsel %vm5135_vm0, %v5330_v52, %v5332_v2  ;;  %v5183_v56 = vrot.slane %v8775_v14, 7  ;;  %v5339_v54 = vsel %vm5133_vm9, %v5337_v6, %v5338_v0  ;;  %v5442_v51 = vcombine.low %v8654_v19, %v5285_v35 }
 0x5ce   : > { %v5177_v20 = vsel %vm5131_vm11, %v5176_v15, %v8771_v63  ;;  %5564 = vrot.lane.b32.xlu1 %v8795_v29, %s7999_s14  ;;  %v8811_v25 = vrot.slane %v5406_v37, %v8780_v16  ;;  %v5086_v11 = vrot.slane %v8748_v44, 2  ;;  %v8818_v31 = vrot.slane %v5424_v40, %v8780_v16 }
 0x5cf   : > { %v5178_v4 = vsel %vm5133_vm9, %v5176_v15, %v5177_v20  ;;  %v5184_v49 = vsel %vm5131_vm11, %v5183_v56, %v8800_v45  ;;  %v5334_v34 = vsel %vm5137_vm1, %v5330_v52, %v5333_v38  ;;  %v5107_v39 = vrot.slane %v8759_v57, 4 }
 0x5d0   : > { %5568 = vrot.lane.b32.xlu0 %v8811_v25, %s7999_s14  ;;  %v5340_v60 = vsel %vm5135_vm0, %v5337_v6, %v5339_v54  ;;  %v5218_v19 = vrot.slane %v5087_v55, 7  ;;  %v5179_v44 = vsel %vm5135_vm0, %v5176_v15, %v5178_v4  ;;  %v5185_v61 = vsel %vm5133_vm9, %v5183_v56, %v5184_v49 }
 0x5d1   : > { %v5106_v62 = vrot.slane %v8771_v63, 4  ;;  %v8832_v1 = vrot.slane %v5442_v51, %v8780_v16  ;;  %v5415_v50 = vcombine.low %v8660_v59, %v5334_v34  ;;  %v5088_v3 = vrot.slane %v8751_v46, 2 }
 0x5d2   : > { %5580 = vrot.lane.b32.xlu1 %v8818_v31, %s7999_s14  ;;  %v5219_v52 = vsel %vm5131_vm11, %v5218_v19, %v5086_v11  ;;  %v8839_v9 = vcombine.high %v8795_v29, %v8000_v43  ;;  %v5341_v58 = vsel %vm5137_vm1, %v5337_v6, %v5340_v60  ;;  %v5109_v7 = vrot.slane %v8775_v14, 4 }
 0x5d3   : > { %v5288_v32 = vrot.slane %v5107_v39, 7  ;;  %v5180_v17 = vsel %vm5137_vm1, %v5176_v15, %v5179_v44  ;;  %v5225_v59 = vrot.slane %v5089_v26, 7  ;;  %v5108_v46 = vrot.slane %v8800_v45, 4 }
 0x5d4   : > { %5584 = vrot.lane.b32.xlu0 %v8832_v1, %s7999_s14  ;;  %v5186_v0 = vsel %vm5135_vm0, %v5183_v56, %v5185_v61  ;;  %v8852_v6 = vrot.slane %v5415_v50, %v8780_v16  ;;  %v5451_v21 = vcombine.low %v8675_v27, %v5341_v58  ;;  %v5220_v30 = vsel %vm5133_vm9, %v5218_v19, %v5219_v52 }
 0x5d5   : > { %v5289_v20 = vsel %vm5131_vm11, %v5288_v32, %v5106_v62  ;;  %v5226_v48 = vsel %vm5131_vm11, %v5225_v59, %v5088_v3  ;;  %v8859_v15 = vcombine.high %v8818_v31, %v8000_v43  ;;  %v5460_v23 = vcombine.low %v8671_v24, %v5180_v17 }
 0x5d6   : > { %5572 = vrot.lane.b32.xlu1 %v8839_v9, %s7999_s14  ;;  %v5295_v8 = vrot.slane %v5109_v7, 7  ;;  %v5187_v33 = vsel %vm5137_vm1, %v5183_v56, %v5186_v0  ;;  %v5221_v27 = vsel %vm5135_vm0, %v5218_v19, %v5220_v30  ;;  %v5290_v47 = vsel %vm5133_vm9, %v5288_v32, %v5289_v20 }
 0x5d7   : > { %v8871_v53 = vrot.slane %v5451_v21, %v8780_v16  ;;  %v5227_v24 = vsel %vm5133_vm9, %v5225_v59, %v5226_v48  ;;  %v8875_v40 = vrot.slane %v5460_v23, %v8780_v16  ;;  %v5496_v35 = vcombine.low %v8678_v28, %v5187_v33 }
 0x5d8   : > { %5570 = vrot.lane.b32.xlu0 %v8852_v6, %s7999_s14  ;;  %v5296_v2 = vsel %vm5131_vm11, %v5295_v8, %v5108_v46  ;;  %v5222_v37 = vsel %vm5137_vm1, %v5218_v19, %v5221_v27  ;;  %v5291_v38 = vsel %vm5135_vm0, %v5288_v32, %v5290_v47  ;;  %v5228_v55 = vsel %vm5135_vm0, %v5225_v59, %v5227_v24 }
 0x5d9   : > { %v5297_v56 = vsel %vm5133_vm9, %v5295_v8, %v5296_v2  ;;  %v8888_v54 = vcombine.high %v8811_v25, %v8000_v43  ;;  %v8891_v28 = vrot.slane %v5496_v35, %v8780_v16  ;;  %v5397_v4 = vcombine.low %v8701_v5, %v5222_v37 }
 0x5da   : > { %5588 = vrot.lane.b32.xlu1 %v8859_v15, %s7999_s14  ;;  %v5292_v51 = vsel %vm5137_vm1, %v5288_v32, %v5291_v38  ;;  %v5123_v11 = vrot.slane %v8759_v57, 6  ;;  %v5229_v49 = vsel %vm5137_vm1, %v5225_v59, %v5228_v55  ;;  %v5298_v34 = vsel %vm5135_vm0, %v5295_v8, %v5297_v56 }
 0x5db   : > { %v5122_v39 = vrot.slane %v8771_v63, 6  ;;  %v8905_v60 = vcombine.high %v8832_v1, %v8000_v43  ;;  %v5478_v5 = vcombine.low %v8707_v10, %v5292_v51  ;;  %v8909_v26 = vrot.slane %v5397_v4, %v8780_v16 }
 0x5dc   : > { %5586 = vrot.lane.b32.xlu0 %v8871_v53, %s7999_s14  ;;  %v5433_v19 = vcombine.low %v8710_v12, %v5229_v49  ;;  %v5299_v44 = vsel %vm5137_vm1, %v5295_v8, %v5298_v34  ;;  %v5125_v61 = vrot.slane %v8775_v14, 6  ;;  %v5344_v62 = vrot.slane %v5123_v11, 7 }
 0x5dd   : > { %v5091_v50 = vrot.slane %v8759_v57, 2  ;;  %v5124_v10 = vrot.slane %v8800_v45, 6  ;;  %v8922_v52 = vrot.slane %v5478_v5, %v8780_v16  ;;  %v5514_v12 = vcombine.low %v8715_v13, %v5299_v44 }
 0x5de   : > { %5596 = vrot.lane.b32.xlu1 %v8875_v40, %s7999_s14  ;;  %v5345_v3 = vsel %vm5131_vm11, %v5344_v62, %v5122_v39  ;;  %v5090_v58 = vrot.slane %v8771_v63, 2  ;;  %v8927_v7 = vrot.slane %v5433_v19, %v8780_v16  ;;  %v5351_v32 = vrot.slane %v5125_v61, 7 }
 0x5df   : > { %v5093_v57 = vrot.slane %v8775_v14, 2  ;;  %v5232_v17 = vrot.slane %v5091_v50, 7  ;;  %v5346_v59 = vsel %vm5133_vm9, %v5344_v62, %v5345_v3  ;;  %v8937_v13 = vrot.slane %v5514_v12, %v8780_v16 }
 0x5e0   : > { %5576 = vrot.lane.b32.xlu0 %v8888_v54, %s7999_s14  ;;  %v5352_v46 = vsel %vm5131_vm11, %v5351_v32, %v5124_v10  ;;  %v5092_v63 = vrot.slane %v8800_v45, 2  ;;  %v8943_v20 = vcombine.high %v8875_v40, %v8000_v43  ;;  %v5347_v14 = vsel %vm5135_vm0, %v5344_v62, %v5346_v59 }
 0x5e1   : > { %v5233_v0 = vsel %vm5131_vm11, %v5232_v17, %v5090_v58  ;;  %v5239_v21 = vrot.slane %v5093_v57, 7  ;;  %v5353_v30 = vsel %vm5133_vm9, %v5351_v32, %v5352_v46  ;;  %v8953_v45 = vcombine.high %v8852_v6, %v8000_v43 }
 0x5e2   : > { %5612 = vrot.lane.b32.xlu1 %v8891_v28, %s7999_s14  ;;  %v5234_v48 = vsel %vm5133_vm9, %v5232_v17, %v5233_v0  ;;  %v8959_v8 = vcombine.high %v8891_v28, %v8000_v43  ;;  %v5348_v33 = vsel %vm5137_vm1, %v5344_v62, %v5347_v14  ;;  %v5354_v27 = vsel %vm5135_vm0, %v5351_v32, %v5353_v30 }
 0x5e3   : > { %v5240_v23 = vsel %vm5131_vm11, %v5239_v21, %v5092_v63  ;;  %v5235_v47 = vsel %vm5135_vm0, %v5232_v17, %v5234_v48  ;;  %v8970_v2 = vcombine.high %v8871_v53, %v8000_v43  ;;  %v5487_v24 = vcombine.low %v8724_v18, %v5348_v33 }
 0x5e4   : > { %5592 = vrot.lane.b32.xlu0 %v8905_v60, %s7999_s14  ;;  %v5241_v35 = vsel %vm5133_vm9, %v5239_v21, %v5240_v23  ;;  %v8976_v37 = vcombine.high %v8909_v26, %v8000_v43  ;;  %v5355_v38 = vsel %vm5137_vm1, %v5351_v32, %v5354_v27  ;;  %v5236_v55 = vsel %vm5137_vm1, %v5232_v17, %v5235_v47 }
 0x5e5   : > { %v5242_v56 = vsel %vm5135_vm0, %v5239_v21, %v5241_v35  ;;  %v8986_v18 = vrot.slane %v5487_v24, %v8780_v16  ;;  %v5523_v4 = vcombine.low %v8729_v22, %v5355_v38  ;;  %v8991_v51 = vcombine.high %v8927_v7, %v8000_v43 }
 0x5e6   : > { %5566 = vrot.lane.b32.xlu1 %v8909_v26, %s7999_s14  ;;  %v5469_v11 = vcombine.low %v8738_v36, %v5236_v55  ;;  %v5243_v49 = vsel %vm5137_vm1, %v5239_v21, %v5242_v56  ;;  %v9012_v36 = vcombine.high %v8922_v52, %v8000_v43 }
 0x5e7   : > { %v9000_v34 = vrot.slane %v5523_v4, %v8780_v16  ;;  %v5505_v22 = vcombine.low %v8742_v42, %v5243_v49  ;;  %v9023_v42 = vcombine.high %v8937_v13, %v8000_v43  ;;  %v9035_v44 = vcombine.high %v8986_v18, %v8000_v43 }
 0x5e8   : > { %5600 = vrot.lane.b32.xlu0 %v8922_v52, %s7999_s14  ;;  %v9003_v39 = vrot.slane %v5469_v11, %v8780_v16 }
 0x5e9   : > { %v9015_v5 = vrot.slane %v5505_v22, %v8780_v16  ;;  %v9047_v62 = vcombine.high %v9000_v34, %v8000_v43 }
 0x5ea   : > { %5582 = vrot.lane.b32.xlu1 %v8927_v7, %s7999_s14  ;;  %v9027_v19 = vcombine.high %v9003_v39, %v8000_v43 }
 0x5eb   : > { %v9039_v61 = vcombine.high %v9015_v5, %v8000_v43 }
 0x5ec   : > { %5616 = vrot.lane.b32.xlu0 %v8937_v13, %s7999_s14 }
 0x5ee   : > { %5604 = vrot.lane.b32.xlu1 %v8943_v20, %s7999_s14 }
 0x5f0   : > { %5578 = vrot.lane.b32.xlu0 %v8953_v45, %s7999_s14 }
 0x5f2   : > { %5620 = vrot.lane.b32.xlu1 %v8959_v8, %s7999_s14 }
 0x5f4   : > { %5594 = vrot.lane.b32.xlu0 %v8970_v2, %s7999_s14 }
 0x5f6   : > { %5574 = vrot.lane.b32.xlu1 %v8976_v37, %s7999_s14 }
 0x5f8   : > { %5602 = vrot.lane.b32.xlu0 %v8986_v18, %s7999_s14 }
 0x5fa   : > { %5590 = vrot.lane.b32.xlu1 %v8991_v51, %s7999_s14 }
 0x5fc   : > { %5618 = vrot.lane.b32.xlu0 %v9000_v34, %s7999_s14 }
 0x5fe   : > { %5598 = vrot.lane.b32.xlu1 %v9003_v39, %s7999_s14 }
 0x600   : > { %5608 = vrot.lane.b32.xlu0 %v9012_v36, %s7999_s14 }
 0x602   : > { %5614 = vrot.lane.b32.xlu1 %v9015_v5, %s7999_s14 }
 0x604   : > { %5624 = vrot.lane.b32.xlu0 %v9023_v42, %s7999_s14 }
 0x606   : > { %5606 = vrot.lane.b32.xlu1 %v9027_v19, %s7999_s14 }
 0x608   : > { %5610 = vrot.lane.b32.xlu0 %v9035_v44, %s7999_s14 }
 0x60a   : > { %5622 = vrot.lane.b32.xlu1 %v9039_v61, %s7999_s14 }
 0x60c   : > { %5626 = vrot.lane.b32.xlu0 %v9047_v62, %s7999_s14 }
 0x640   : > { %v5565_v50 = vpop.permute.xlu1 %5564 }
 0x641   : > { %v5660_v57 = vmax.f32 %v8795_v29, %v5565_v50 }
 0x642   : > { %v5569_v10 = vpop.permute.xlu0 %5568 }
 0x643   : > { %v5662_v27 = vmax.f32 %v8811_v25, %v5569_v10 }
 0x644   : > { %v5581_v3 = vpop.permute.xlu1 %5580 }
 0x645   : > { %v5668_v46 = vmax.f32 %v8818_v31, %v5581_v3 }
 0x646   : > { %v5585_v12 = vpop.permute.xlu0 %5584 }
 0x647   : > { %v5670_v31 = vmax.f32 %v8832_v1, %v5585_v12 }
 0x648   : > { %v5573_v58 = vpop.permute.xlu1 %5572 }
 0x649   : > { %v5664_v32 = vmax.f32 %v8839_v9, %v5573_v58 }
 0x64a   : > { %v9053_v17 = vpop.permute.xlu0 %5570 }
 0x64b   : > { %v5692_v63 = vcombine.low %v5660_v57, %v5664_v32 }
 0x64c   : > { %v5589_v59 = vpop.permute.xlu1 %5588 }
 0x64d   : > { %v5672_v43 = vmax.f32 %v8859_v15, %v5589_v59  ;;  %v5699_v30 = vrot.slane %v5692_v63, %v8780_v16 }
 0x64e   : > { %v9057_v14 = vpop.permute.xlu0 %5586 }
 0x64f   : > { %v5701_v0 = vcombine.low %v5668_v46, %v5672_v43 }
 0x650   : > { %v5597_v21 = vpop.permute.xlu1 %5596 }
 0x651   : > { %v5708_v48 = vrot.slane %v5701_v0, %v8780_v16  ;;  %v5676_v1 = vmax.f32 %v8875_v40, %v5597_v21 }
 0x652   : > { %v5577_v9 = vpop.permute.xlu0 %5576 }
 0x653   : > { %v5840_v23 = vcombine.low %v5699_v30, %v5708_v48  ;;  %v5666_v29 = vmax.f32 %v8888_v54, %v5577_v9  ;;  %v6739_v59 = vcombine.high %v5699_v30, %v5708_v48 }
 0x654   : > { %v5613_v33 = vpop.permute.xlu1 %5612 }
 0x655   : > { %v5764_v24 = vcombine.low %v5662_v27, %v5666_v29  ;;  %v5870_v40 = vrot.slane %v6739_v59, %v8574_v41 }
 0x656   : > { %v5593_v47 = vpop.permute.xlu0 %5592 }
 0x657   : > { %v5674_v15 = vmax.f32 %v8905_v60, %v5593_v47  ;;  %v9066_v56 = vrot.slane %v5764_v24, %v8780_v16  ;;  %v5684_v60 = vmax.f32 %v8891_v28, %v5613_v33  ;;  %v9079_v28 = vrot.slane %v5840_v23, %v8574_v41 }
 0x658   : > { %v5567_v35 = vpop.permute.xlu1 %5566 }
 0x659   : > { %v5773_v38 = vcombine.low %v5670_v31, %v5674_v15 }
 0x65a   : > { %v5601_v55 = vpop.permute.xlu0 %5600 }
 0x65b   : > { %v5780_v4 = vrot.slane %v5773_v38, %v8780_v16  ;;  %v5678_v23 = vmax.f32 %v8922_v52, %v5601_v55  ;;  %v5661_v52 = vmax.f32 %v8909_v26, %v5567_v35 }
 0x65c   : > { %v5583_v11 = vpop.permute.xlu1 %5582 }
 0x65d   : > { %v5934_v54 = vcombine.low %v9066_v56, %v5780_v4  ;;  %v6743_v15 = vcombine.high %v9066_v56, %v5780_v4  ;;  %v5669_v38 = vmax.f32 %v8927_v7, %v5583_v11  ;;  %v5663_v7 = vmax.f32 %v8852_v6, %v9053_v17 }
 0x65e   : > { %v5617_v49 = vpop.permute.xlu0 %5616 }
 0x65f   : > { %v9109_v35 = vrot.slane %v5934_v54, %v8574_v41 }
 0x660   : > { %v5605_v22 = vpop.permute.xlu1 %5604 }
 0x661   : > { %v5680_v25 = vmax.f32 %v8943_v20, %v5605_v22 }
 0x662   : > { %v5579_v50 = vpop.permute.xlu0 %5578 }
 0x663   : > { %v5710_v3 = vcombine.low %v5676_v1, %v5680_v25 }
 0x664   : > { %v5621_v10 = vpop.permute.xlu1 %5620 }
 0x665   : > { %v5688_v12 = vmax.f32 %v8959_v8, %v5621_v10  ;;  %v5717_v46 = vrot.slane %v5710_v3, %v8780_v16  ;;  %v5686_v10 = vmax.f32 %v8937_v13, %v5617_v49  ;;  %v5964_v49 = vrot.slane %v6743_v15, %v8574_v41 }
 0x666   : > { %v5595_v32 = vpop.permute.xlu0 %5594 }
 0x667   : > { %v5719_v58 = vcombine.low %v5684_v60, %v5688_v12  ;;  %v5675_v22 = vmax.f32 %v8970_v2, %v5595_v32  ;;  %v5667_v2 = vmax.f32 %v8953_v45, %v5579_v50 }
 0x668   : > { %v5575_v57 = vpop.permute.xlu1 %5574 }
 0x669   : > { %v5726_v63 = vrot.slane %v5719_v58, %v8780_v16  ;;  %v5665_v25 = vmax.f32 %v8976_v37, %v5575_v57  ;;  %v5800_v50 = vcombine.low %v5663_v7, %v5667_v2 }
 0x66a   : > { %v5603_v20 = vpop.permute.xlu0 %5602 }
 0x66b   : > { %v5841_v43 = vcombine.low %v5717_v46, %v5726_v63  ;;  %v6740_v0 = vcombine.high %v5717_v46, %v5726_v63  ;;  %v5728_v13 = vcombine.low %v5661_v52, %v5665_v25  ;;  %v5679_v12 = vmax.f32 %v8986_v18, %v5603_v20 }
 0x66c   : > { %v5591_v9 = vpop.permute.xlu1 %5590 }
 0x66d   : > { %v5877_v21 = vrot.slane %v6740_v0, %v8574_v41  ;;  %v9082_v8 = vrot.slane %v5841_v43, %v8574_v41  ;;  %v5673_v24 = vmax.f32 %v8991_v51, %v5591_v9  ;;  %v5671_v51 = vmax.f32 %v8871_v53, %v9057_v14 }
 0x66e   : > { %v5619_v29 = vpop.permute.xlu0 %5618  ;;  %v5807_v9 = vrot.slane %v5800_v50, %v8780_v16 }
 0x66f   : > { %v5878_v30 = vcombine.low %v5870_v40, %v5877_v21  ;;  %v5856_v48 = vcombine.low %v9079_v28, %v9082_v8  ;;  %v5737_v55 = vcombine.low %v5669_v38, %v5673_v24  ;;  %v5809_v4 = vcombine.low %v5671_v51, %v5675_v22 }
 0x670   : > { %v5599_v33 = vpop.permute.xlu1 %5598  ;;  %v5687_v59 = vmax.f32 %v9000_v34, %v5619_v29 }
 0x671   : > { %5879 = vrot.lane.b32.xlu1 %v5878_v30, %s7995_s22  ;;  %v5677_v11 = vmax.f32 %v9003_v39, %v5599_v33  ;;  %v5744_v6 = vrot.slane %v5737_v55, %v8780_v16  ;;  %v5816_v57 = vrot.slane %v5809_v4, %v8780_v16 }
 0x672   : > { %v5609_v27 = vpop.permute.xlu0 %5608 }
 0x673   : > { %v5682_v47 = vmax.f32 %v9012_v36, %v5609_v27  ;;  %v5980_v33 = vcombine.low %v5807_v9, %v5816_v57  ;;  %v6745_v25 = vcombine.high %v5807_v9, %v5816_v57 }
 0x674   : > { %v5615_v31 = vpop.permute.xlu1 %5614 }
 0x675   : > { %v5782_v60 = vcombine.low %v5678_v23, %v5682_v47  ;;  %v5685_v45 = vmax.f32 %v9015_v5, %v5615_v31  ;;  %v6012_v51 = vrot.slane %v6745_v25, %v8574_v41 }
 0x676   : > { %v5625_v1 = vpop.permute.xlu0 %5624 }
 0x677   : > { %v5690_v3 = vmax.f32 %v9023_v42, %v5625_v1  ;;  %v5789_v53 = vrot.slane %v5782_v60, %v8780_v16  ;;  %v5988_v1 = vrot.slane %v5980_v33, %v8574_v41 }
 0x678   : > { %v5607_v36 = vpop.permute.xlu1 %5606 }
 0x679   : > { %v5681_v56 = vmax.f32 %v9027_v19, %v5607_v36  ;;  %v5791_v37 = vcombine.low %v5686_v10, %v5690_v3 }
 0x67a   : > { %v5611_v42 = vpop.permute.xlu0 %5610 }
 0x67b   : > { %v5798_v26 = vrot.slane %v5791_v37, %v8780_v16  ;;  %v5683_v14 = vmax.f32 %v9035_v44, %v5611_v42  ;;  %v5746_v17 = vcombine.low %v5677_v11, %v5681_v56  ;;  %v5735_v44 = vrot.slane %v5728_v13, %v8780_v16 }
 0x67c   : > { %v5623_v19 = vpop.permute.xlu1 %5622 }
 0x67d   : > { %v5689_v39 = vmax.f32 %v9039_v61, %v5623_v19  ;;  %v5935_v58 = vcombine.low %v5789_v53, %v5798_v26  ;;  %v6744_v32 = vcombine.high %v5789_v53, %v5798_v26  ;;  %v5818_v63 = vcombine.low %v5679_v12, %v5683_v14 }
 0x67e   : > { %v5627_v46 = vpop.permute.xlu0 %5626  ;;  %v5886_v0 = vcombine.low %v5735_v44, %v5744_v6  ;;  %v5753_v18 = vrot.slane %v5746_v17, %v8780_v16  ;;  %v6741_v47 = vcombine.high %v5735_v44, %v5744_v6 }
 0x67f   : > { %v5755_v54 = vcombine.low %v5685_v45, %v5689_v39  ;;  %v5691_v43 = vmax.f32 %v9047_v62, %v5627_v46  ;;  %v5971_v5 = vrot.slane %v6744_v32, %v8574_v41  ;;  %v5949_v61 = vrot.slane %v5935_v58, %v8574_v41 }
 0x680   : > { %v5825_v62 = vrot.slane %v5818_v63, %v8780_v16  ;;  %v5894_v31 = vrot.slane %v5886_v0, %v8574_v41 }
 0x681   : > { %v5762_v20 = vrot.slane %v5755_v54, %v8780_v16  ;;  %v5827_v40 = vcombine.low %v5687_v59, %v5691_v43  ;;  %v5972_v21 = vcombine.low %v5964_v49, %v5971_v5  ;;  %v5950_v34 = vcombine.low %v9109_v35, %v5949_v61 }
 0x683   : > { %v5887_v29 = vcombine.low %v5753_v18, %v5762_v20  ;;  %v6742_v30 = vcombine.high %v5753_v18, %v5762_v20  ;;  %v5834_v27 = vrot.slane %v5827_v40, %v8780_v16  ;;  %5973 = vrot.lane.b32.xlu0 %v5972_v21, %s7995_s22  ;;  %v5918_v16 = vrot.slane %v6741_v47, %v8574_v41 }
 0x685   : > { %v5901_v24 = vrot.slane %v5887_v29, %v8574_v41  ;;  %v5981_v23 = vcombine.low %v5825_v62, %v5834_v27  ;;  %v6746_v15 = vcombine.high %v5825_v62, %v5834_v27  ;;  %v5925_v22 = vrot.slane %v6742_v30, %v8574_v41 }
 0x687   : > { %v5902_v38 = vcombine.low %v5894_v31, %v5901_v24  ;;  %v5995_v10 = vrot.slane %v5981_v23, %v8574_v41  ;;  %v6019_v3 = vrot.slane %v6746_v15, %v8574_v41  ;;  %v5926_v36 = vcombine.low %v5918_v16, %v5925_v22 }
 0x689   : > { %5903 = vrot.lane.b32.xlu1 %v5902_v38, %s7997_s23  ;;  %v5996_v60 = vcombine.low %v5988_v1, %v5995_v10  ;;  %v6020_v52 = vcombine.low %v6012_v51, %v6019_v3 }
 0x68b   : > { %5997 = vrot.lane.b32.xlu0 %v5996_v60, %s7997_s23 }
 0x68d   : > { %5927 = vrot.lane.b32.xlu1 %v5926_v36, %s7999_s14 }
 0x68f   : > { %6021 = vrot.lane.b32.xlu0 %v6020_v52, %s7999_s14 }
 0x6e3   : > { %v5880_v55 = vpop.permute.xlu1 %5879 }
 0x6e4   : > { %v6025_v2 = vsel %vm1261_vm12, %v5856_v48, %v5880_v55 }
 0x6f5   : > { %v5974_v56 = vpop.permute.xlu0 %5973 }
 0x6f6   : > { %v6029_v11 = vsel %vm1261_vm12, %v5950_v34, %v5974_v56 }
 0x6fb   : > { %v5904_v7 = vpop.permute.xlu1 %5903 }
 0x6fc   : > { %v6026_v4 = vsel %vm2443_vm8, %v6025_v2, %v5904_v7 }
 0x6fd   : > { %v5998_v37 = vpop.permute.xlu0 %5997 }
 0x6fe   : > { %v6030_v42 = vsel %vm2443_vm8, %v6029_v11, %v5998_v37 }
 0x6ff   : > { %v5928_v41 = vpop.permute.xlu1 %5927 }
 0x700   : > { %v6028_v13 = vsel %vm6027_vm10, %v6026_v4, %v5928_v41 }
 0x701   : > { %6032 = vst [vmem:[%s375_s19] sm:$0xff] %v6028_v13  ;;  %v6022_v49 = vpop.permute.xlu0 %6021 }
 0x702   : > { %v6031_v28 = vsel %vm6027_vm10, %v6030_v42, %v6022_v49 }
 0x703   : > { %6033 = vst [vmem:[%s375_s19 + $0x8] sm:$0xff] %v6031_v28 }
 0x704   : > { %7915 = shalt.err (!%p7912_p8)
}
 0x705   : > { %s7916_s20 = scalar_lea.hbm %s9153_s29, 256  ;;  %s7920_s14 = scalar_lea.hbm %s9204_s7, 512 }
 0x706   : > { %p7917_p4 = scmp.ne.s32.totalorder %s9153_s29, %s7916_s20  ;;  %p7921_p0 = scmp.lt.u32.totalorder %s9153_s29, %s9204_s7 }
 0x707   : > { %p7922_p5 = scmp.lt.u32.totalorder %s7920_s14, %s7916_s20  ;;  %p7924_p6 = scmp.lt.u32.totalorder %s7916_s20, %s9153_s29 }
 0x708   : > { %p7918_p10 = pnand %p7917_p4, %p9242_p9 }
 0x709   : > { %p7923_p7 = por %p7922_p5, %p7921_p0 }
 0x70a   : > { %p7919_p11 = pneg %p7918_p10 }
 0x70b   : > { %p7925_p12 = por %p7924_p6, %p7923_p7 }
 0x70d   : > { %p7926_p13 = pnand %p7925_p12, %p7919_p11 }
 0x70f   : > { %7929 = shalt.err (!%p7926_p13)
}
 0x710   : > { %6866 = dma.vmem_to_hbm [thread:$0]  (%p9242_p9), %s9155_s21, 256, %s9153_s29, %s6035_s30  }
 0x711 PF: > { %s6061_s18 = sand.u32 1, %s7968_s24   ;;  %p9243_p1 = scmp.ne.s32.totalorder %s9216_s16, 0 }
 0x712   : > { %p9244_p3 = scmp.ge.s32.totalorder %s7980_s27, 2  ;;  %s6062_s9 = scalar_lea.sflag [#allocation6], %s6061_s18 }
 0x714   : > { %p6892_p2 = pnand %p9244_p3, %p9243_p1 }
 0x716   : > { %7963 = dma.done.wait (!%p6892_p2), %s6062_s9, 256  }
 0x717   : > { %7965 = vsyncadd (!%p6892_p2), %s6062_s9, 4294967040  ;;  %p23_p8 = scmp.ge.s32.totalorder %s8224_s11, 4   ;;  %s9245_s24 = smov %s7972_s25 }
 0x718   : > { %s9246_s25 = smov %s7976_s26  ;;  %s9247_s26 = smov %s8235_s13 }
 0x719   : > { %s9248_s27 = smov %s8224_s11  ;;  %25 = sbr.rel (!%p23_p8) target bundleno = 8 (0x8), region = 121 }
 0x720   :  { %6067 = vsyncpa [#allocation5], 1 }
 0x721   :  { %6069 = vsyncpa [#allocation5 + $0x1], 1 }
 0x722   :  { %6070 = vsyncpa [#allocation8], 1 }
 0x723   :  { %6071 = vsyncpa [#allocation11], 1 }
 0x724   :  { %6072 = vsyncpa [#allocation14], 1 }
 0x725   :  { %6073 = vsyncpa [#allocation6], 1 }
 0x726   :  { %6075 = vsyncpa [#allocation6 + $0x1], 1 }

</bundles_post_ra>
